<compile_context>
chip_gen: v7x
topology: tpu7x:2x2x1
jax: 0.10.0
libtpu: 0.0.40
codegen_flags: <defaults>
</compile_context>

<pallas_src>
import functools

import jax
import jax.numpy as jnp
from jax.experimental import pallas as pl
from jax.experimental.pallas import tpu as pltpu

LANE = 128      # lane-dense output-channel padding (keep at 128, not 256)
TM_MAX = 1024   # max row tile for the conv matmul kernel (rows = N*Ho*Wo)
TB_HEAD = 32    # batch tile for the fused head kernel


def _round_up(x, m):
    return (x + m - 1) // m * m


def _bn_fold(gamma, beta, rmean, rvar, eps):
    scale = gamma / jnp.sqrt(rvar + eps)
    shift = beta - rmean * scale
    return scale, shift


def _im2col_3x3(x):
    """x: (N, H, W, C) NHWC (already padded) -> ((N*Ho*Wo, 9*C), Ho, Wo).

    Tap order along the column axis is (i, j, c) so it matches
    w.transpose(2, 3, 1, 0).reshape(9*Cin, Cout).
    """
    N, H, W, C = x.shape
    Ho, Wo = H - 2, W - 2
    pats = jnp.concatenate(
        [x[:, i:i + Ho, j:j + Wo, :] for i in range(3) for j in range(3)], axis=-1)
    return pats.reshape(N * Ho * Wo, 9 * C), Ho, Wo


def _wmat_3x3(w, c_pad):
    """w: (Cout, Cin, 3, 3) torch layout -> (9*Cin, c_pad) bf16, Cout zero-padded."""
    cout, cin = w.shape[0], w.shape[1]
    wm = w.transpose(2, 3, 1, 0).reshape(9 * cin, cout)
    wm = jnp.pad(wm, ((0, 0), (0, c_pad - cout)))
    return wm.astype(jnp.bfloat16)


# --------------------------------------------------------------------------
# Kernel 1: fused  patches @ W + bias -> ReLU -> BatchNorm affine  (bf16 out)
# --------------------------------------------------------------------------
def _conv_bn_relu_kernel(p_ref, w_ref, b_ref, s_ref, t_ref, o_ref):
    acc = jnp.dot(p_ref[...], w_ref[...], preferred_element_type=jnp.float32)
    y = jnp.maximum(acc + b_ref[...], 0.0)                       # bias + ReLU (f32)
    o_ref[...] = (y * s_ref[...] + t_ref[...]).astype(o_ref.dtype)  # BN affine -> bf16


def conv3x3_bn_relu(x, *, w, b, gamma, beta, rmean, rvar, padding=0, eps=1e-5):
    """x: (N, H, W, Cin) NHWC bf16, w: (Cout, Cin, 3, 3) -> (N, Ho, Wo, Cout) bf16."""
    N, H, W, Cin = x.shape
    Cout = w.shape[0]
    if padding:
        x = jnp.pad(x, ((0, 0), (padding, padding), (padding, padding), (0, 0)))
    pats, Ho, Wo = _im2col_3x3(x)                    # (P, K) bf16, K unpadded

    K = 9 * Cin                                      # full-extent last dim (no 128 pad)
    CP = LANE                                        # lane-dense output channels
    wmat = _wmat_3x3(w, CP)

    scale, shift = _bn_fold(gamma, beta, rmean, rvar, eps)
    bP = jnp.pad(b, (0, CP - Cout)).reshape(1, CP)        # padded lanes: 0
    sP = jnp.pad(scale, (0, CP - Cout)).reshape(1, CP)    # padded lanes: 0
    tP = jnp.pad(shift, (0, CP - Cout)).reshape(1, CP)    # padded lanes: 0

    # Big row tiles amortize per-step overhead; even block count so the two
    # v7x TensorCores split the "parallel" axis evenly; tm multiple of 16
    # (bf16 sublane pairs).
    P = N * Ho * Wo
    nblk = pl.cdiv(P, TM_MAX)
    if nblk > 1:
        nblk = _round_up(nblk, 2)
    tm = _round_up(pl.cdiv(P, nblk), 16)
    P_pad = tm * nblk
    if P_pad != P:
        pats = jnp.pad(pats, ((0, P_pad - P), (0, 0)))

    out = pl.pallas_call(
        _conv_bn_relu_kernel,
        out_shape=jax.ShapeDtypeStruct((P_pad, CP), jnp.bfloat16),
        grid=(nblk,),
        in_specs=[
            pl.BlockSpec((tm, K), lambda i: (i, 0)),
            pl.BlockSpec((K, CP), lambda i: (0, 0)),
            pl.BlockSpec((1, CP), lambda i: (0, 0)),
            pl.BlockSpec((1, CP), lambda i: (0, 0)),
            pl.BlockSpec((1, CP), lambda i: (0, 0)),
        ],
        out_specs=pl.BlockSpec((tm, CP), lambda i: (i, 0)),
        compiler_params=pltpu.CompilerParams(dimension_semantics=("parallel",)),
        cost_estimate=pl.CostEstimate(
            flops=2 * P * K * Cout,
            transcendentals=0,
            bytes_accessed=P * K * 2 + K * CP * 2 + 3 * CP * 4 + P * Cout * 2),
    )(pats, wmat, bP, sP, tP)

    return out[:P, :Cout].reshape(N, Ho, Wo, Cout)


# --------------------------------------------------------------------------
# 2x2 max pool (plain JAX on purpose — lane-sparse Pallas reduction was a
# net loss vs. XLA's fused reshape/reduce; input/output are bf16 now)
# --------------------------------------------------------------------------
def maxpool2x2(x):
    N, H, W, C = x.shape
    return x.reshape(N, H // 2, 2, W // 2, 2, C).max(axis=(2, 4))


# --------------------------------------------------------------------------
# Kernel 2 (head): conv5 + ReLU + BN -> GAP(3x3) -> Linear(20,10) -> log_softmax
# Tiled over batch; GAP is a tiny constant block-local pooling matmul.
# --------------------------------------------------------------------------
def _conv5_head_kernel(p_ref, w_ref, b_ref, s_ref, t_ref,
                       agg_ref, fw_ref, fb_ref, o_ref, *, inv_r):
    acc = jnp.dot(p_ref[...], w_ref[...], preferred_element_type=jnp.float32)
    y = jnp.maximum(acc + b_ref[...], 0.0) * s_ref[...] + t_ref[...]   # (9*tb, 128) f32
    # GAP: 0/1 pooling matrix sums each sample's 9 spatial rows; scale by 1/9 in f32.
    g = jnp.dot(agg_ref[...], y.astype(jnp.bfloat16),
                preferred_element_type=jnp.float32) * inv_r            # (tb, 128) f32
    # FC on 128-lane padded bf16 weights; padded logit lanes carry -1e30 bias
    # so they vanish from the logsumexp.
    logits = jnp.dot(g.astype(jnp.bfloat16), fw_ref[...],
                     preferred_element_type=jnp.float32) + fb_ref[...]
    m = jnp.max(logits, axis=1, keepdims=True)
    e = jnp.exp(logits - m)
    lse = jnp.log(jnp.sum(e, axis=1, keepdims=True)) + m
    o_ref[...] = logits - lse                                          # log_softmax


def conv5_gap_fc_logsoftmax(x, *, conv5, fc_w, fc_b, eps=1e-5):
    """x: (N, 5, 5, 16) NHWC bf16 -> (N, 10) f32 log-probabilities."""
    N, H, W, Cin = x.shape
    Cout = conv5["w"].shape[0]                       # 20
    pats, Ho, Wo = _im2col_3x3(x)                    # (9N, 144) bf16
    R = Ho * Wo                                      # 9 spatial rows per sample
    K = 9 * Cin                                      # 144
    CP = LANE

    wmat = _wmat_3x3(conv5["w"], CP)
    scale, shift = _bn_fold(conv5["gamma"], conv5["beta"],
                            conv5["rmean"], conv5["rvar"], eps)
    bP = jnp.pad(conv5["b"], (0, CP - Cout)).reshape(1, CP)
    sP = jnp.pad(scale, (0, CP - Cout)).reshape(1, CP)
    tP = jnp.pad(shift, (0, CP - Cout)).reshape(1, CP)

    # Batch tiling: grid over ceil(N / tb); padded samples produce garbage
    # rows that are sliced off below.
    tb = min(TB_HEAD, _round_up(N, 8))
    nblk = pl.cdiv(N, tb)
    Np = tb * nblk
    if Np != N:
        pats = jnp.pad(pats, ((0, R * (Np - N)), (0, 0)))

    # Constant block-local pooling matrix: row b sums the 9 rows of sample b.
    agg = jnp.kron(jnp.eye(tb, dtype=jnp.float32),
                   jnp.ones((1, R), jnp.float32)).astype(jnp.bfloat16)   # (tb, 9*tb)

    fw = jnp.zeros((CP, CP), jnp.float32).at[:Cout, :10].set(fc_w.T).astype(jnp.bfloat16)
    fb = jnp.full((1, CP), -1e30, jnp.float32).at[0, :10].set(fc_b)

    out = pl.pallas_call(
        functools.partial(_conv5_head_kernel, inv_r=1.0 / R),
        out_shape=jax.ShapeDtypeStruct((Np, CP), jnp.float32),
        grid=(nblk,),
        in_specs=[
            pl.BlockSpec((R * tb, K), lambda i: (i, 0)),
            pl.BlockSpec((K, CP), lambda i: (0, 0)),
            pl.BlockSpec((1, CP), lambda i: (0, 0)),
            pl.BlockSpec((1, CP), lambda i: (0, 0)),
            pl.BlockSpec((1, CP), lambda i: (0, 0)),
            pl.BlockSpec((tb, R * tb), lambda i: (0, 0)),
            pl.BlockSpec((CP, CP), lambda i: (0, 0)),
            pl.BlockSpec((1, CP), lambda i: (0, 0)),
        ],
        out_specs=pl.BlockSpec((tb, CP), lambda i: (i, 0)),
        compiler_params=pltpu.CompilerParams(dimension_semantics=("parallel",)),
        cost_estimate=pl.CostEstimate(
            flops=2 * R * N * K * Cout + 2 * N * R * Cout + 2 * N * Cout * 10,
            transcendentals=N * (LANE + 1),
            bytes_accessed=R * N * K * 2 + K * CP * 2 + CP * CP * 2
                           + 4 * CP * 4 + tb * R * tb * 2 + N * CP * 4),
    )(pats, wmat, bP, sP, tP, agg, fw, fb)

    return out[:N, :10]


# --------------------------------------------------------------------------
# Parameters + forward
# --------------------------------------------------------------------------
def _conv_block_params(key, cout, cin):
    k1, k2, k3, k4, k5, k6 = jax.random.split(key, 6)
    return dict(
        w=jax.random.normal(k1, (cout, cin, 3, 3), jnp.float32) * 0.1,
        b=jax.random.normal(k2, (cout,), jnp.float32) * 0.05,
        gamma=jax.random.uniform(k3, (cout,), jnp.float32, minval=0.5, maxval=1.5),
        beta=jax.random.normal(k4, (cout,), jnp.float32) * 0.05,
        rmean=jax.random.normal(k5, (cout,), jnp.float32) * 0.05,
        rvar=jax.random.uniform(k6, (cout,), jnp.float32, minval=0.5, maxval=1.5),
    )


def init_params(key):
    ks = jax.random.split(key, 7)
    return dict(
        conv1=_conv_block_params(ks[0], 8, 1),
        conv2=_conv_block_params(ks[1], 8, 8),
        conv3=_conv_block_params(ks[2], 12, 8),
        conv4=_conv_block_params(ks[3], 16, 12),
        conv5=_conv_block_params(ks[4], 20, 16),
        fc_w=jax.random.normal(ks[5], (10, 20), jnp.float32) * 0.1,
        fc_b=jax.random.normal(ks[6], (10,), jnp.float32) * 0.05,
    )


def model3_forward(params, x):
    # TODO(synk): Dropout2d / BN batch-stat updates are training-only; eval semantics used.
    x = jnp.transpose(x, (0, 2, 3, 1)).astype(jnp.bfloat16)   # NCHW -> NHWC, bf16 once
    x = conv3x3_bn_relu(x, **params["conv1"], padding=1)      # (N, 28, 28, 8)  bf16
    x = conv3x3_bn_relu(x, **params["conv2"], padding=1)      # (N, 28, 28, 8)  bf16
    x = maxpool2x2(x)                                         # (N, 14, 14, 8)  bf16
    x = conv3x3_bn_relu(x, **params["conv3"], padding=0)      # (N, 12, 12, 12) bf16
    x = conv3x3_bn_relu(x, **params["conv4"], padding=0)      # (N, 10, 10, 16) bf16
    x = maxpool2x2(x)                                         # (N, 5, 5, 16)   bf16
    return conv5_gap_fc_logsoftmax(x, conv5=params["conv5"],
                                   fc_w=params["fc_w"], fc_b=params["fc_b"])


if __name__ == "__main__":
    key = jax.random.PRNGKey(0)
    pkey, xkey = jax.random.split(key)
    params = init_params(pkey)
    x = jax.random.normal(xkey, (2, 1, 28, 28), jnp.float32)  # NCHW, MNIST-sized

    fwd = jax.jit(functools.partial(model3_forward, params))
    out = jax.block_until_ready(fwd(x))

    assert out.shape == (2, 10), out.shape
    # log_softmax sanity check: exp(out) rows sum to 1
    row_sums = jnp.exp(out).sum(axis=1)
    assert jnp.allclose(row_sums, 1.0, atol=1e-3), row_sums
    print("KERNEL_OK")
</pallas_src>

<mosaic_0001>
module attributes {stable_mosaic.version = 11 : i64} {
  func.func @_conv_bn_relu_kernel(%arg0: i32, %arg1: memref<784x9xbf16, #tpu.memory_space<vmem>>, %arg2: memref<9x128xbf16, #tpu.memory_space<vmem>>, %arg3: memref<1x128xf32, #tpu.memory_space<vmem>>, %arg4: memref<1x128xf32, #tpu.memory_space<vmem>>, %arg5: memref<1x128xf32, #tpu.memory_space<vmem>>, %arg6: memref<784x128xbf16, #tpu.memory_space<vmem>>) attributes {dimension_semantics = [#tpu.dimension_semantics<parallel>], iteration_bounds = array<i64: 2>, scalar_prefetch = 0 : i64, scratch_operands = 0 : i64, tpu.core_type = #tpu.core_type<tc>, window_params = [{transform_indices = @transform_0, window_bounds = array<i64: 784, 9>}, {pipeline_mode = #tpu.pipeline_mode<synchronous>, transform_indices = @transform_1, window_bounds = array<i64: 9, 128>}, {pipeline_mode = #tpu.pipeline_mode<synchronous>, transform_indices = @transform_2, window_bounds = array<i64: 1, 128>}, {pipeline_mode = #tpu.pipeline_mode<synchronous>, transform_indices = @transform_3, window_bounds = array<i64: 1, 128>}, {pipeline_mode = #tpu.pipeline_mode<synchronous>, transform_indices = @transform_4, window_bounds = array<i64: 1, 128>}, {transform_indices = @transform_5, window_bounds = array<i64: 784, 128>}]} {
    %c0 = arith.constant 0 : index
    %c0_0 = arith.constant 0 : index
    %0 = vector.load %arg1[%c0, %c0_0] : memref<784x9xbf16, #tpu.memory_space<vmem>>, vector<784x9xbf16>
    %c0_1 = arith.constant 0 : index
    %c0_2 = arith.constant 0 : index
    %1 = vector.load %arg2[%c0_1, %c0_2] : memref<9x128xbf16, #tpu.memory_space<vmem>>, vector<9x128xbf16>
    %cst = arith.constant dense<0.000000e+00> : vector<784x128xf32>
    %2 = tpu.matmul %0, %1, %cst {dimension_numbers = #tpu.dot_dimension_numbers<[1], [0], [0], [1], [0, 0, 1, 1], [], []>} : vector<784x9xbf16>, vector<9x128xbf16>, vector<784x128xf32> -> vector<784x128xf32>
    %c0_3 = arith.constant 0 : index
    %c0_4 = arith.constant 0 : index
    %3 = vector.load %arg3[%c0_3, %c0_4] : memref<1x128xf32, #tpu.memory_space<vmem>>, vector<1x128xf32>
    %4 = vector.broadcast %3 : vector<1x128xf32> to vector<784x128xf32>
    %5 = arith.addf %2, %4 : vector<784x128xf32>
    %cst_5 = arith.constant 0.000000e+00 : f32
    %6 = vector.broadcast %cst_5 : f32 to vector<784x128xf32>
    %7 = arith.maximumf %5, %6 : vector<784x128xf32>
    %c0_6 = arith.constant 0 : index
    %c0_7 = arith.constant 0 : index
    %8 = vector.load %arg4[%c0_6, %c0_7] : memref<1x128xf32, #tpu.memory_space<vmem>>, vector<1x128xf32>
    %9 = vector.broadcast %8 : vector<1x128xf32> to vector<784x128xf32>
    %10 = arith.mulf %7, %9 : vector<784x128xf32>
    %c0_8 = arith.constant 0 : index
    %c0_9 = arith.constant 0 : index
    %11 = vector.load %arg5[%c0_8, %c0_9] : memref<1x128xf32, #tpu.memory_space<vmem>>, vector<1x128xf32>
    %12 = vector.broadcast %11 : vector<1x128xf32> to vector<784x128xf32>
    %13 = arith.addf %10, %12 : vector<784x128xf32>
    %14 = arith.truncf %13 : vector<784x128xf32> to vector<784x128xbf16>
    %c0_10 = arith.constant 0 : index
    %c0_11 = arith.constant 0 : index
    %15 = vector.load %arg6[%c0_10, %c0_11] : memref<784x128xbf16, #tpu.memory_space<vmem>>, vector<784x128xbf16>
    tpu.vector_store %arg6[%c0_10, %c0_11], %14 {strides = array<i32>} : memref<784x128xbf16, #tpu.memory_space<vmem>>, vector<784x128xbf16>,
    return
  }
  func.func @transform_0(%arg0: i32) -> (i32, i32) {
    %c0_i32 = arith.constant 0 : i32
    %c0_i32_0 = arith.constant 0 : i32
    return %arg0, %c0_i32 : i32, i32
  }
  func.func @transform_1(%arg0: i32) -> (i32, i32) {
    %c0_i32 = arith.constant 0 : i32
    %c0_i32_0 = arith.constant 0 : i32
    %c0_i32_1 = arith.constant 0 : i32
    return %c0_i32, %c0_i32_0 : i32, i32
  }
  func.func @transform_2(%arg0: i32) -> (i32, i32) {
    %c0_i32 = arith.constant 0 : i32
    %c0_i32_0 = arith.constant 0 : i32
    %c0_i32_1 = arith.constant 0 : i32
    return %c0_i32, %c0_i32_0 : i32, i32
  }
  func.func @transform_3(%arg0: i32) -> (i32, i32) {
    %c0_i32 = arith.constant 0 : i32
    %c0_i32_0 = arith.constant 0 : i32
    %c0_i32_1 = arith.constant 0 : i32
    return %c0_i32, %c0_i32_0 : i32, i32
  }
  func.func @transform_4(%arg0: i32) -> (i32, i32) {
    %c0_i32 = arith.constant 0 : i32
    %c0_i32_0 = arith.constant 0 : i32
    %c0_i32_1 = arith.constant 0 : i32
    return %c0_i32, %c0_i32_0 : i32, i32
  }
  func.func @transform_5(%arg0: i32) -> (i32, i32) {
    %c0_i32 = arith.constant 0 : i32
    %c0_i32_0 = arith.constant 0 : i32
    return %arg0, %c0_i32 : i32, i32
  }
}

module attributes {stable_mosaic.version = 11 : i64} {
  func.func @_conv_bn_relu_kernel(%arg0: i32, %arg1: memref<784x72xbf16, #tpu.memory_space<vmem>>, %arg2: memref<72x128xbf16, #tpu.memory_space<vmem>>, %arg3: memref<1x128xf32, #tpu.memory_space<vmem>>, %arg4: memref<1x128xf32, #tpu.memory_space<vmem>>, %arg5: memref<1x128xf32, #tpu.memory_space<vmem>>, %arg6: memref<784x128xbf16, #tpu.memory_space<vmem>>) attributes {dimension_semantics = [#tpu.dimension_semantics<parallel>], iteration_bounds = array<i64: 2>, scalar_prefetch = 0 : i64, scratch_operands = 0 : i64, tpu.core_type = #tpu.core_type<tc>, window_params = [{transform_indices = @transform_0, window_bounds = array<i64: 784, 72>}, {pipeline_mode = #tpu.pipeline_mode<synchronous>, transform_indices = @transform_1, window_bounds = array<i64: 72, 128>}, {pipeline_mode = #tpu.pipeline_mode<synchronous>, transform_indices = @transform_2, window_bounds = array<i64: 1, 128>}, {pipeline_mode = #tpu.pipeline_mode<synchronous>, transform_indices = @transform_3, window_bounds = array<i64: 1, 128>}, {pipeline_mode = #tpu.pipeline_mode<synchronous>, transform_indices = @transform_4, window_bounds = array<i64: 1, 128>}, {transform_indices = @transform_5, window_bounds = array<i64: 784, 128>}]} {
    %c0 = arith.constant 0 : index
    %c0_0 = arith.constant 0 : index
    %0 = vector.load %arg1[%c0, %c0_0] : memref<784x72xbf16, #tpu.memory_space<vmem>>, vector<784x72xbf16>
    %c0_1 = arith.constant 0 : index
    %c0_2 = arith.constant 0 : index
    %1 = vector.load %arg2[%c0_1, %c0_2] : memref<72x128xbf16, #tpu.memory_space<vmem>>, vector<72x128xbf16>
    %cst = arith.constant dense<0.000000e+00> : vector<784x128xf32>
    %2 = tpu.matmul %0, %1, %cst {dimension_numbers = #tpu.dot_dimension_numbers<[1], [0], [0], [1], [0, 0, 1, 1], [], []>} : vector<784x72xbf16>, vector<72x128xbf16>, vector<784x128xf32> -> vector<784x128xf32>
    %c0_3 = arith.constant 0 : index
    %c0_4 = arith.constant 0 : index
    %3 = vector.load %arg3[%c0_3, %c0_4] : memref<1x128xf32, #tpu.memory_space<vmem>>, vector<1x128xf32>
    %4 = vector.broadcast %3 : vector<1x128xf32> to vector<784x128xf32>
    %5 = arith.addf %2, %4 : vector<784x128xf32>
    %cst_5 = arith.constant 0.000000e+00 : f32
    %6 = vector.broadcast %cst_5 : f32 to vector<784x128xf32>
    %7 = arith.maximumf %5, %6 : vector<784x128xf32>
    %c0_6 = arith.constant 0 : index
    %c0_7 = arith.constant 0 : index
    %8 = vector.load %arg4[%c0_6, %c0_7] : memref<1x128xf32, #tpu.memory_space<vmem>>, vector<1x128xf32>
    %9 = vector.broadcast %8 : vector<1x128xf32> to vector<784x128xf32>
    %10 = arith.mulf %7, %9 : vector<784x128xf32>
    %c0_8 = arith.constant 0 : index
    %c0_9 = arith.constant 0 : index
    %11 = vector.load %arg5[%c0_8, %c0_9] : memref<1x128xf32, #tpu.memory_space<vmem>>, vector<1x128xf32>
    %12 = vector.broadcast %11 : vector<1x128xf32> to vector<784x128xf32>
    %13 = arith.addf %10, %12 : vector<784x128xf32>
    %14 = arith.truncf %13 : vector<784x128xf32> to vector<784x128xbf16>
    %c0_10 = arith.constant 0 : index
    %c0_11 = arith.constant 0 : index
    %15 = vector.load %arg6[%c0_10, %c0_11] : memref<784x128xbf16, #tpu.memory_space<vmem>>, vector<784x128xbf16>
    tpu.vector_store %arg6[%c0_10, %c0_11], %14 {strides = array<i32>} : memref<784x128xbf16, #tpu.memory_space<vmem>>, vector<784x128xbf16>,
    return
  }
  func.func @transform_0(%arg0: i32) -> (i32, i32) {
    %c0_i32 = arith.constant 0 : i32
    %c0_i32_0 = arith.constant 0 : i32
    return %arg0, %c0_i32 : i32, i32
  }
  func.func @transform_1(%arg0: i32) -> (i32, i32) {
    %c0_i32 = arith.constant 0 : i32
    %c0_i32_0 = arith.constant 0 : i32
    %c0_i32_1 = arith.constant 0 : i32
    return %c0_i32, %c0_i32_0 : i32, i32
  }
  func.func @transform_2(%arg0: i32) -> (i32, i32) {
    %c0_i32 = arith.constant 0 : i32
    %c0_i32_0 = arith.constant 0 : i32
    %c0_i32_1 = arith.constant 0 : i32
    return %c0_i32, %c0_i32_0 : i32, i32
  }
  func.func @transform_3(%arg0: i32) -> (i32, i32) {
    %c0_i32 = arith.constant 0 : i32
    %c0_i32_0 = arith.constant 0 : i32
    %c0_i32_1 = arith.constant 0 : i32
    return %c0_i32, %c0_i32_0 : i32, i32
  }
  func.func @transform_4(%arg0: i32) -> (i32, i32) {
    %c0_i32 = arith.constant 0 : i32
    %c0_i32_0 = arith.constant 0 : i32
    %c0_i32_1 = arith.constant 0 : i32
    return %c0_i32, %c0_i32_0 : i32, i32
  }
  func.func @transform_5(%arg0: i32) -> (i32, i32) {
    %c0_i32 = arith.constant 0 : i32
    %c0_i32_0 = arith.constant 0 : i32
    return %arg0, %c0_i32 : i32, i32
  }
}

module attributes {stable_mosaic.version = 11 : i64} {
  func.func @_conv_bn_relu_kernel(%arg0: i32, %arg1: memref<288x72xbf16, #tpu.memory_space<vmem>>, %arg2: memref<72x128xbf16, #tpu.memory_space<vmem>>, %arg3: memref<1x128xf32, #tpu.memory_space<vmem>>, %arg4: memref<1x128xf32, #tpu.memory_space<vmem>>, %arg5: memref<1x128xf32, #tpu.memory_space<vmem>>, %arg6: memref<288x128xbf16, #tpu.memory_space<vmem>>) attributes {dimension_semantics = [#tpu.dimension_semantics<parallel>], iteration_bounds = array<i64: 1>, scalar_prefetch = 0 : i64, scratch_operands = 0 : i64, tpu.core_type = #tpu.core_type<tc>, window_params = [{transform_indices = @transform_0, window_bounds = array<i64: 288, 72>}, {pipeline_mode = #tpu.pipeline_mode<synchronous>, transform_indices = @transform_1, window_bounds = array<i64: 72, 128>}, {pipeline_mode = #tpu.pipeline_mode<synchronous>, transform_indices = @transform_2, window_bounds = array<i64: 1, 128>}, {pipeline_mode = #tpu.pipeline_mode<synchronous>, transform_indices = @transform_3, window_bounds = array<i64: 1, 128>}, {pipeline_mode = #tpu.pipeline_mode<synchronous>, transform_indices = @transform_4, window_bounds = array<i64: 1, 128>}, {transform_indices = @transform_5, window_bounds = array<i64: 288, 128>}]} {
    %c0 = arith.constant 0 : index
    %c0_0 = arith.constant 0 : index
    %0 = vector.load %arg1[%c0, %c0_0] : memref<288x72xbf16, #tpu.memory_space<vmem>>, vector<288x72xbf16>
    %c0_1 = arith.constant 0 : index
    %c0_2 = arith.constant 0 : index
    %1 = vector.load %arg2[%c0_1, %c0_2] : memref<72x128xbf16, #tpu.memory_space<vmem>>, vector<72x128xbf16>
    %cst = arith.constant dense<0.000000e+00> : vector<288x128xf32>
    %2 = tpu.matmul %0, %1, %cst {dimension_numbers = #tpu.dot_dimension_numbers<[1], [0], [0], [1], [0, 0, 1, 1], [], []>} : vector<288x72xbf16>, vector<72x128xbf16>, vector<288x128xf32> -> vector<288x128xf32>
    %c0_3 = arith.constant 0 : index
    %c0_4 = arith.constant 0 : index
    %3 = vector.load %arg3[%c0_3, %c0_4] : memref<1x128xf32, #tpu.memory_space<vmem>>, vector<1x128xf32>
    %4 = vector.broadcast %3 : vector<1x128xf32> to vector<288x128xf32>
    %5 = arith.addf %2, %4 : vector<288x128xf32>
    %cst_5 = arith.constant 0.000000e+00 : f32
    %6 = vector.broadcast %cst_5 : f32 to vector<288x128xf32>
    %7 = arith.maximumf %5, %6 : vector<288x128xf32>
    %c0_6 = arith.constant 0 : index
    %c0_7 = arith.constant 0 : index
    %8 = vector.load %arg4[%c0_6, %c0_7] : memref<1x128xf32, #tpu.memory_space<vmem>>, vector<1x128xf32>
    %9 = vector.broadcast %8 : vector<1x128xf32> to vector<288x128xf32>
    %10 = arith.mulf %7, %9 : vector<288x128xf32>
    %c0_8 = arith.constant 0 : index
    %c0_9 = arith.constant 0 : index
    %11 = vector.load %arg5[%c0_8, %c0_9] : memref<1x128xf32, #tpu.memory_space<vmem>>, vector<1x128xf32>
    %12 = vector.broadcast %11 : vector<1x128xf32> to vector<288x128xf32>
    %13 = arith.addf %10, %12 : vector<288x128xf32>
    %14 = arith.truncf %13 : vector<288x128xf32> to vector<288x128xbf16>
    %c0_10 = arith.constant 0 : index
    %c0_11 = arith.constant 0 : index
    %15 = vector.load %arg6[%c0_10, %c0_11] : memref<288x128xbf16, #tpu.memory_space<vmem>>, vector<288x128xbf16>
    tpu.vector_store %arg6[%c0_10, %c0_11], %14 {strides = array<i32>} : memref<288x128xbf16, #tpu.memory_space<vmem>>, vector<288x128xbf16>,
    return
  }
  func.func @transform_0(%arg0: i32) -> (i32, i32) {
    %c0_i32 = arith.constant 0 : i32
    %c0_i32_0 = arith.constant 0 : i32
    return %arg0, %c0_i32 : i32, i32
  }
  func.func @transform_1(%arg0: i32) -> (i32, i32) {
    %c0_i32 = arith.constant 0 : i32
    %c0_i32_0 = arith.constant 0 : i32
    %c0_i32_1 = arith.constant 0 : i32
    return %c0_i32, %c0_i32_0 : i32, i32
  }
  func.func @transform_2(%arg0: i32) -> (i32, i32) {
    %c0_i32 = arith.constant 0 : i32
    %c0_i32_0 = arith.constant 0 : i32
    %c0_i32_1 = arith.constant 0 : i32
    return %c0_i32, %c0_i32_0 : i32, i32
  }
  func.func @transform_3(%arg0: i32) -> (i32, i32) {
    %c0_i32 = arith.constant 0 : i32
    %c0_i32_0 = arith.constant 0 : i32
    %c0_i32_1 = arith.constant 0 : i32
    return %c0_i32, %c0_i32_0 : i32, i32
  }
  func.func @transform_4(%arg0: i32) -> (i32, i32) {
    %c0_i32 = arith.constant 0 : i32
    %c0_i32_0 = arith.constant 0 : i32
    %c0_i32_1 = arith.constant 0 : i32
    return %c0_i32, %c0_i32_0 : i32, i32
  }
  func.func @transform_5(%arg0: i32) -> (i32, i32) {
    %c0_i32 = arith.constant 0 : i32
    %c0_i32_0 = arith.constant 0 : i32
    return %arg0, %c0_i32 : i32, i32
  }
}

module attributes {stable_mosaic.version = 11 : i64} {
  func.func @_conv_bn_relu_kernel(%arg0: i32, %arg1: memref<208x108xbf16, #tpu.memory_space<vmem>>, %arg2: memref<108x128xbf16, #tpu.memory_space<vmem>>, %arg3: memref<1x128xf32, #tpu.memory_space<vmem>>, %arg4: memref<1x128xf32, #tpu.memory_space<vmem>>, %arg5: memref<1x128xf32, #tpu.memory_space<vmem>>, %arg6: memref<208x128xbf16, #tpu.memory_space<vmem>>) attributes {dimension_semantics = [#tpu.dimension_semantics<parallel>], iteration_bounds = array<i64: 1>, scalar_prefetch = 0 : i64, scratch_operands = 0 : i64, tpu.core_type = #tpu.core_type<tc>, window_params = [{transform_indices = @transform_0, window_bounds = array<i64: 208, 108>}, {pipeline_mode = #tpu.pipeline_mode<synchronous>, transform_indices = @transform_1, window_bounds = array<i64: 108, 128>}, {pipeline_mode = #tpu.pipeline_mode<synchronous>, transform_indices = @transform_2, window_bounds = array<i64: 1, 128>}, {pipeline_mode = #tpu.pipeline_mode<synchronous>, transform_indices = @transform_3, window_bounds = array<i64: 1, 128>}, {pipeline_mode = #tpu.pipeline_mode<synchronous>, transform_indices = @transform_4, window_bounds = array<i64: 1, 128>}, {transform_indices = @transform_5, window_bounds = array<i64: 208, 128>}]} {
    %c0 = arith.constant 0 : index
    %c0_0 = arith.constant 0 : index
    %0 = vector.load %arg1[%c0, %c0_0] : memref<208x108xbf16, #tpu.memory_space<vmem>>, vector<208x108xbf16>
    %c0_1 = arith.constant 0 : index
    %c0_2 = arith.constant 0 : index
    %1 = vector.load %arg2[%c0_1, %c0_2] : memref<108x128xbf16, #tpu.memory_space<vmem>>, vector<108x128xbf16>
    %cst = arith.constant dense<0.000000e+00> : vector<208x128xf32>
    %2 = tpu.matmul %0, %1, %cst {dimension_numbers = #tpu.dot_dimension_numbers<[1], [0], [0], [1], [0, 0, 1, 1], [], []>} : vector<208x108xbf16>, vector<108x128xbf16>, vector<208x128xf32> -> vector<208x128xf32>
    %c0_3 = arith.constant 0 : index
    %c0_4 = arith.constant 0 : index
    %3 = vector.load %arg3[%c0_3, %c0_4] : memref<1x128xf32, #tpu.memory_space<vmem>>, vector<1x128xf32>
    %4 = vector.broadcast %3 : vector<1x128xf32> to vector<208x128xf32>
    %5 = arith.addf %2, %4 : vector<208x128xf32>
    %cst_5 = arith.constant 0.000000e+00 : f32
    %6 = vector.broadcast %cst_5 : f32 to vector<208x128xf32>
    %7 = arith.maximumf %5, %6 : vector<208x128xf32>
    %c0_6 = arith.constant 0 : index
    %c0_7 = arith.constant 0 : index
    %8 = vector.load %arg4[%c0_6, %c0_7] : memref<1x128xf32, #tpu.memory_space<vmem>>, vector<1x128xf32>
    %9 = vector.broadcast %8 : vector<1x128xf32> to vector<208x128xf32>
    %10 = arith.mulf %7, %9 : vector<208x128xf32>
    %c0_8 = arith.constant 0 : index
    %c0_9 = arith.constant 0 : index
    %11 = vector.load %arg5[%c0_8, %c0_9] : memref<1x128xf32, #tpu.memory_space<vmem>>, vector<1x128xf32>
    %12 = vector.broadcast %11 : vector<1x128xf32> to vector<208x128xf32>
    %13 = arith.addf %10, %12 : vector<208x128xf32>
    %14 = arith.truncf %13 : vector<208x128xf32> to vector<208x128xbf16>
    %c0_10 = arith.constant 0 : index
    %c0_11 = arith.constant 0 : index
    %15 = vector.load %arg6[%c0_10, %c0_11] : memref<208x128xbf16, #tpu.memory_space<vmem>>, vector<208x128xbf16>
    tpu.vector_store %arg6[%c0_10, %c0_11], %14 {strides = array<i32>} : memref<208x128xbf16, #tpu.memory_space<vmem>>, vector<208x128xbf16>,
    return
  }
  func.func @transform_0(%arg0: i32) -> (i32, i32) {
    %c0_i32 = arith.constant 0 : i32
    %c0_i32_0 = arith.constant 0 : i32
    return %arg0, %c0_i32 : i32, i32
  }
  func.func @transform_1(%arg0: i32) -> (i32, i32) {
    %c0_i32 = arith.constant 0 : i32
    %c0_i32_0 = arith.constant 0 : i32
    %c0_i32_1 = arith.constant 0 : i32
    return %c0_i32, %c0_i32_0 : i32, i32
  }
  func.func @transform_2(%arg0: i32) -> (i32, i32) {
    %c0_i32 = arith.constant 0 : i32
    %c0_i32_0 = arith.constant 0 : i32
    %c0_i32_1 = arith.constant 0 : i32
    return %c0_i32, %c0_i32_0 : i32, i32
  }
  func.func @transform_3(%arg0: i32) -> (i32, i32) {
    %c0_i32 = arith.constant 0 : i32
    %c0_i32_0 = arith.constant 0 : i32
    %c0_i32_1 = arith.constant 0 : i32
    return %c0_i32, %c0_i32_0 : i32, i32
  }
  func.func @transform_4(%arg0: i32) -> (i32, i32) {
    %c0_i32 = arith.constant 0 : i32
    %c0_i32_0 = arith.constant 0 : i32
    %c0_i32_1 = arith.constant 0 : i32
    return %c0_i32, %c0_i32_0 : i32, i32
  }
  func.func @transform_5(%arg0: i32) -> (i32, i32) {
    %c0_i32 = arith.constant 0 : i32
    %c0_i32_0 = arith.constant 0 : i32
    return %arg0, %c0_i32 : i32, i32
  }
}

module attributes {stable_mosaic.version = 11 : i64} {
  func.func @_conv5_head_kernel(%arg0: i32, %arg1: memref<72x144xbf16, #tpu.memory_space<vmem>>, %arg2: memref<144x128xbf16, #tpu.memory_space<vmem>>, %arg3: memref<1x128xf32, #tpu.memory_space<vmem>>, %arg4: memref<1x128xf32, #tpu.memory_space<vmem>>, %arg5: memref<1x128xf32, #tpu.memory_space<vmem>>, %arg6: memref<8x72xbf16, #tpu.memory_space<vmem>>, %arg7: memref<128x128xbf16, #tpu.memory_space<vmem>>, %arg8: memref<1x128xf32, #tpu.memory_space<vmem>>, %arg9: memref<8x128xf32, #tpu.memory_space<vmem>>) attributes {dimension_semantics = [#tpu.dimension_semantics<parallel>], iteration_bounds = array<i64: 1>, scalar_prefetch = 0 : i64, scratch_operands = 0 : i64, tpu.core_type = #tpu.core_type<tc>, window_params = [{transform_indices = @transform_0, window_bounds = array<i64: 72, 144>}, {pipeline_mode = #tpu.pipeline_mode<synchronous>, transform_indices = @transform_1, window_bounds = array<i64: 144, 128>}, {pipeline_mode = #tpu.pipeline_mode<synchronous>, transform_indices = @transform_2, window_bounds = array<i64: 1, 128>}, {pipeline_mode = #tpu.pipeline_mode<synchronous>, transform_indices = @transform_3, window_bounds = array<i64: 1, 128>}, {pipeline_mode = #tpu.pipeline_mode<synchronous>, transform_indices = @transform_4, window_bounds = array<i64: 1, 128>}, {pipeline_mode = #tpu.pipeline_mode<synchronous>, transform_indices = @transform_5, window_bounds = array<i64: 8, 72>}, {pipeline_mode = #tpu.pipeline_mode<synchronous>, transform_indices = @transform_6, window_bounds = array<i64: 128, 128>}, {pipeline_mode = #tpu.pipeline_mode<synchronous>, transform_indices = @transform_7, window_bounds = array<i64: 1, 128>}, {transform_indices = @transform_8, window_bounds = array<i64: 8, 128>}]} {
    %c0 = arith.constant 0 : index
    %c0_0 = arith.constant 0 : index
    %0 = vector.load %arg1[%c0, %c0_0] : memref<72x144xbf16, #tpu.memory_space<vmem>>, vector<72x144xbf16>
    %c0_1 = arith.constant 0 : index
    %c0_2 = arith.constant 0 : index
    %1 = vector.load %arg2[%c0_1, %c0_2] : memref<144x128xbf16, #tpu.memory_space<vmem>>, vector<144x128xbf16>
    %cst = arith.constant dense<0.000000e+00> : vector<72x128xf32>
    %2 = tpu.matmul %0, %1, %cst {dimension_numbers = #tpu.dot_dimension_numbers<[1], [0], [0], [1], [0, 0, 1, 1], [], []>} : vector<72x144xbf16>, vector<144x128xbf16>, vector<72x128xf32> -> vector<72x128xf32>
    %c0_3 = arith.constant 0 : index
    %c0_4 = arith.constant 0 : index
    %3 = vector.load %arg3[%c0_3, %c0_4] : memref<1x128xf32, #tpu.memory_space<vmem>>, vector<1x128xf32>
    %4 = vector.broadcast %3 : vector<1x128xf32> to vector<72x128xf32>
    %5 = arith.addf %2, %4 : vector<72x128xf32>
    %cst_5 = arith.constant 0.000000e+00 : f32
    %6 = vector.broadcast %cst_5 : f32 to vector<72x128xf32>
    %7 = arith.maximumf %5, %6 : vector<72x128xf32>
    %c0_6 = arith.constant 0 : index
    %c0_7 = arith.constant 0 : index
    %8 = vector.load %arg4[%c0_6, %c0_7] : memref<1x128xf32, #tpu.memory_space<vmem>>, vector<1x128xf32>
    %9 = vector.broadcast %8 : vector<1x128xf32> to vector<72x128xf32>
    %10 = arith.mulf %7, %9 : vector<72x128xf32>
    %c0_8 = arith.constant 0 : index
    %c0_9 = arith.constant 0 : index
    %11 = vector.load %arg5[%c0_8, %c0_9] : memref<1x128xf32, #tpu.memory_space<vmem>>, vector<1x128xf32>
    %12 = vector.broadcast %11 : vector<1x128xf32> to vector<72x128xf32>
    %13 = arith.addf %10, %12 : vector<72x128xf32>
    %c0_10 = arith.constant 0 : index
    %c0_11 = arith.constant 0 : index
    %14 = vector.load %arg6[%c0_10, %c0_11] : memref<8x72xbf16, #tpu.memory_space<vmem>>, vector<8x72xbf16>
    %15 = arith.truncf %13 : vector<72x128xf32> to vector<72x128xbf16>
    %cst_12 = arith.constant dense<0.000000e+00> : vector<8x128xf32>
    %16 = tpu.matmul %14, %15, %cst_12 {dimension_numbers = #tpu.dot_dimension_numbers<[1], [0], [0], [1], [0, 0, 1, 1], [], []>} : vector<8x72xbf16>, vector<72x128xbf16>, vector<8x128xf32> -> vector<8x128xf32>
    %cst_13 = arith.constant 0.111111112 : f32
    %17 = vector.broadcast %cst_13 : f32 to vector<8x128xf32>
    %18 = arith.mulf %16, %17 : vector<8x128xf32>
    %19 = arith.truncf %18 : vector<8x128xf32> to vector<8x128xbf16>
    %c0_14 = arith.constant 0 : index
    %c0_15 = arith.constant 0 : index
    %20 = vector.load %arg7[%c0_14, %c0_15] : memref<128x128xbf16, #tpu.memory_space<vmem>>, vector<128x128xbf16>
    %cst_16 = arith.constant dense<0.000000e+00> : vector<8x128xf32>
    %21 = tpu.matmul %19, %20, %cst_16 {dimension_numbers = #tpu.dot_dimension_numbers<[1], [0], [0], [1], [0, 0, 1, 1], [], []>} : vector<8x128xbf16>, vector<128x128xbf16>, vector<8x128xf32> -> vector<8x128xf32>
    %c0_17 = arith.constant 0 : index
    %c0_18 = arith.constant 0 : index
    %22 = vector.load %arg8[%c0_17, %c0_18] : memref<1x128xf32, #tpu.memory_space<vmem>>, vector<1x128xf32>
    %23 = vector.broadcast %22 : vector<1x128xf32> to vector<8x128xf32>
    %24 = arith.addf %21, %23 : vector<8x128xf32>
    %cst_19 = arith.constant dense<0xFF800000> : vector<8xf32>
    %25 = vector.multi_reduction <maximumf>, %24, %cst_19 [1] : vector<8x128xf32> to vector<8xf32>
    %26 = vector.shape_cast %25 : vector<8xf32> to vector<8x1xf32>
    %27 = vector.broadcast %26 : vector<8x1xf32> to vector<8x128xf32>
    %28 = arith.subf %24, %27 : vector<8x128xf32>
    %29 = math.exp %28 : vector<8x128xf32>
    %cst_20 = arith.constant dense<0.000000e+00> : vector<8xf32>
    %30 = vector.multi_reduction <add>, %29, %cst_20 [1] : vector<8x128xf32> to vector<8xf32>
    %31 = vector.shape_cast %30 : vector<8xf32> to vector<8x1xf32>
    %32 = math.log %31 : vector<8x1xf32>
    %33 = arith.addf %32, %26 : vector<8x1xf32>
    %34 = vector.broadcast %33 : vector<8x1xf32> to vector<8x128xf32>
    %35 = arith.subf %24, %34 : vector<8x128xf32>
    %c0_21 = arith.constant 0 : index
    %c0_22 = arith.constant 0 : index
    %36 = vector.load %arg9[%c0_21, %c0_22] : memref<8x128xf32, #tpu.memory_space<vmem>>, vector<8x128xf32>
    tpu.vector_store %arg9[%c0_21, %c0_22], %35 {strides = array<i32>} : memref<8x128xf32, #tpu.memory_space<vmem>>, vector<8x128xf32>,
    return
  }
  func.func @transform_0(%arg0: i32) -> (i32, i32) {
    %c0_i32 = arith.constant 0 : i32
    %c0_i32_0 = arith.constant 0 : i32
    return %arg0, %c0_i32 : i32, i32
  }
  func.func @transform_1(%arg0: i32) -> (i32, i32) {
    %c0_i32 = arith.constant 0 : i32
    %c0_i32_0 = arith.constant 0 : i32
    %c0_i32_1 = arith.constant 0 : i32
    return %c0_i32, %c0_i32_0 : i32, i32
  }
  func.func @transform_2(%arg0: i32) -> (i32, i32) {
    %c0_i32 = arith.constant 0 : i32
    %c0_i32_0 = arith.constant 0 : i32
    %c0_i32_1 = arith.constant 0 : i32
    return %c0_i32, %c0_i32_0 : i32, i32
  }
  func.func @transform_3(%arg0: i32) -> (i32, i32) {
    %c0_i32 = arith.constant 0 : i32
    %c0_i32_0 = arith.constant 0 : i32
    %c0_i32_1 = arith.constant 0 : i32
    return %c0_i32, %c0_i32_0 : i32, i32
  }
  func.func @transform_4(%arg0: i32) -> (i32, i32) {
    %c0_i32 = arith.constant 0 : i32
    %c0_i32_0 = arith.constant 0 : i32
    %c0_i32_1 = arith.constant 0 : i32
    return %c0_i32, %c0_i32_0 : i32, i32
  }
  func.func @transform_5(%arg0: i32) -> (i32, i32) {
    %c0_i32 = arith.constant 0 : i32
    %c0_i32_0 = arith.constant 0 : i32
    %c0_i32_1 = arith.constant 0 : i32
    return %c0_i32, %c0_i32_0 : i32, i32
  }
  func.func @transform_6(%arg0: i32) -> (i32, i32) {
    %c0_i32 = arith.constant 0 : i32
    %c0_i32_0 = arith.constant 0 : i32
    %c0_i32_1 = arith.constant 0 : i32
    return %c0_i32, %c0_i32_0 : i32, i32
  }
  func.func @transform_7(%arg0: i32) -> (i32, i32) {
    %c0_i32 = arith.constant 0 : i32
    %c0_i32_0 = arith.constant 0 : i32
    %c0_i32_1 = arith.constant 0 : i32
    return %c0_i32, %c0_i32_0 : i32, i32
  }
  func.func @transform_8(%arg0: i32) -> (i32, i32) {
    %c0_i32 = arith.constant 0 : i32
    %c0_i32_0 = arith.constant 0 : i32
    return %arg0, %c0_i32 : i32, i32
  }
}

</mosaic_0001>

<bundles_post_ra>
// kernel: model3_forward.5
= control target key start
LH: loop header
LB: loop body
LE: loop exit
PB: predicated region body
PF: predicated region fallthrough
CT: control target
= control target key end

     0   :  { %s2975_s18 = smov 0   ;;  %s3577_s0 = inlined_call_operand.vmem [shape: bf16[1568,9], index: 0, kind: input, shape index: {}]   ;;  %s3578_s1 = inlined_call_operand.vmem [shape: bf16[9,128], index: 1, kind: input, shape index: {}]   ;;  %s3579_s2 = inlined_call_operand.vmem [shape: f32[1,128], index: 2, kind: input, shape index: {}]   ;;  %s3580_s3 = inlined_call_operand.vmem [shape: f32[1,128], index: 3, kind: input, shape index: {}]   ;;  %s3581_s4 = inlined_call_operand.vmem [shape: f32[1,128], index: 4, kind: input, shape index: {}]   ;;  %s3582_s5 = inlined_call_operand.vmem [shape: bf16[1568,128], index: 5, kind: output, shape index: {}]  }
   0x1 LB: > { %s2020_s19 = sadd.s32 4294967295, %s2940_s18   ;;  %p2024_p0 = scmp.ge.s32.totalorder %s2940_s18, 1  ;;  %s2940_s18 = sphi %s2975_s18, %s15_s18  }
   0x2   : > { %p188_p1 = scmp.lt.s32.totalorder %s2940_s18, 3 }
   0x4   : > { %p189_p2 = pnand %p2024_p0, %p188_p1 }
   0x5   : > { %vm734_vm0 = vcmask (!%p189_p2), 1043456   ;;  %v2942_v0 = vmov (!%p189_p2), 0.0   ;;  %v2881_v1 = vld [vmem:[%s3578_s1] sm:$0x1f] (!%p189_p2)   ;;  %vm735_vm1 = vcmask (!%p189_p2), 1044480   ;;  %s216_s22 = smul.u32 (!%p189_p2), 98, %s2020_s19 }
   0x6   : > { %192 = sbr.rel (%p189_p2) target bundleno = 434 (0x1b2), region = 40  ;;  %2670 = vmatprep.subr.bf16.mxu0 (!%p189_p2), %v2942_v0  ;;  %2868 = vmatprep.subr.bf16.mxu1 (!%p189_p2), %v2942_v0  ;;  %v2943_v2 = vmov (!%p189_p2), 65535   ;;  %vm2944_vm2 = vmmov (!%p189_p2), 0   ;;  %vm586_vm3 = vcmask (!%p189_p2), 72704   ;;  %v3197_v55 = vld [vmem:[%s3579_s2] ss:$0 sm:$0xff] (!%p189_p2) }
   0x7   : > { %v736_v3 = vsel (!%p189_p2), %vm734_vm0, 4294967295, %v2943_v2  ;;  %2672 = vmatprep.mubr.msk.bf16.mxu0 (!%p189_p2), %vm2944_vm2, %v2942_v0  ;;  %2772 = vmatprep.mubr.msk.bf16.mxu1 (!%p189_p2), %vm2944_vm2, %v2942_v0  ;;  %p217_p3 = scmp.lt.s32.totalorder (!%p189_p2), %s216_s22, 195  ;;  %v3203_v60 = vld [vmem:[%s3580_s3] ss:$0 sm:$0xff] (!%p189_p2) }
   0x8   : > { %v737_v4 = vsel (!%p189_p2), %vm735_vm1, %v736_v3, 0 }
   0x9   : > { %v739_v5 = vand.u32 (!%p189_p2), %v2881_v1, %v737_v4 }
   0xb   : > { %2671 = vmatpush3.bf16.msra.mxu0 (!%p189_p2), %v739_v5  ;;  %2869 = vmatpush3.bf16.msra.mxu1 (!%p189_p2), %v739_v5 }
   0xd   : > { %s3584_s22 = smov (!%p217_p3, %s216_s22), 195 }
   0xe   : > { %s2025_s23 = sshll.u32 %s3584_s22, 2 }
   0xf   : > { %s3000_s26 = scalar_lea.vmem %s3577_s0, %s2025_s23  ;;  %s3226_s10 = scalar_lea.vmem %s3582_s5, %s2025_s23 }
  0x10   : > { %v2882_v6 = vld [vmem:[%s3000_s26] sm:$0xff]   ;;  %v2883_v7 = vld [vmem:[%s3000_s26 + $0xc8] sm:$0xff]   ;;  %v2885_v9 = vld [vmem:[%s3000_s26 + $0xd0] sm:$0xff]  }
  0x11   : > { %2673 = vmatmul.mubr.msk.bf16.vlgmr.msra.gmra.mrb[0].mxu0 %vm586_vm3, %v2882_v6  ;;  %2773 = vmatmul.mubr.msk.bf16.vlgmr.msra.gmra.mrb[0].mxu1 %vm586_vm3, %v2883_v7  ;;  %v2884_v8 = vld [vmem:[%s3000_s26 + $0x8] sm:$0xff]   ;;  %v2886_v10 = vld [vmem:[%s3000_s26 + $0x10] sm:$0xff]   ;;  %v2887_v11 = vld [vmem:[%s3000_s26 + $0xd8] sm:$0xff]  }
  0x12   : > { %2676 = vmatprep.mubr.msk.bf16.mxu0 %vm2944_vm2, %v2942_v0  ;;  %2776 = vmatprep.mubr.msk.bf16.mxu1 %vm2944_vm2, %v2942_v0  ;;  %v2888_v12 = vld [vmem:[%s3000_s26 + $0x18] sm:$0xff]   ;;  %v2889_v13 = vld [vmem:[%s3000_s26 + $0xe0] sm:$0xff]   ;;  %v2891_v15 = vld [vmem:[%s3000_s26 + $0xe8] sm:$0xff]  }
  0x13   : > { %v2890_v14 = vld [vmem:[%s3000_s26 + $0x20] sm:$0xff]   ;;  %v2892_v16 = vld [vmem:[%s3000_s26 + $0x28] sm:$0xff]   ;;  %v2893_v17 = vld [vmem:[%s3000_s26 + $0xf0] sm:$0xff]  }
  0x14   : > { %v2894_v18 = vld [vmem:[%s3000_s26 + $0x30] sm:$0xff]   ;;  %v2895_v19 = vld [vmem:[%s3000_s26 + $0xf8] sm:$0xff]   ;;  %v2897_v21 = vld [vmem:[%s3000_s26 + $0x100] sm:$0xff]  }
  0x15   : > { %v2896_v20 = vld [vmem:[%s3000_s26 + $0x38] sm:$0xff]   ;;  %v2898_v22 = vld [vmem:[%s3000_s26 + $0x40] sm:$0xff]   ;;  %v2899_v23 = vld [vmem:[%s3000_s26 + $0x108] sm:$0xff]  }
  0x16   : > { %v2900_v24 = vld [vmem:[%s3000_s26 + $0x48] sm:$0xff]   ;;  %v2901_v25 = vld [vmem:[%s3000_s26 + $0x110] sm:$0xff]   ;;  %v2903_v27 = vld [vmem:[%s3000_s26 + $0x118] sm:$0xff]  }
  0x17   : > { %v2902_v26 = vld [vmem:[%s3000_s26 + $0x50] sm:$0xff]   ;;  %v2904_v28 = vld [vmem:[%s3000_s26 + $0x58] sm:$0xff]   ;;  %v2905_v29 = vld [vmem:[%s3000_s26 + $0x120] sm:$0xff]  }
  0x18   : > { %v2906_v30 = vld [vmem:[%s3000_s26 + $0x60] sm:$0xff]   ;;  %v2907_v31 = vld [vmem:[%s3000_s26 + $0x128] sm:$0xff]   ;;  %v2909_v33 = vld [vmem:[%s3000_s26 + $0x130] sm:$0xff]  }
  0x19   : > { %2677 = vmatmul.mubr.msk.bf16.gmra.mrb[4].mxu0 %vm586_vm3, %v2884_v8  ;;  %2777 = vmatmul.mubr.msk.bf16.gmra.mrb[4].mxu1 %vm586_vm3, %v2885_v9  ;;  %v2908_v32 = vld [vmem:[%s3000_s26 + $0x68] sm:$0xff]   ;;  %v2910_v34 = vld [vmem:[%s3000_s26 + $0x70] sm:$0xff]   ;;  %v2911_v35 = vld [vmem:[%s3000_s26 + $0x138] sm:$0xff]  }
  0x1a   : > { %2680 = vmatprep.mubr.msk.bf16.mxu0 %vm2944_vm2, %v2942_v0  ;;  %2780 = vmatprep.mubr.msk.bf16.mxu1 %vm2944_vm2, %v2942_v0  ;;  %v2912_v36 = vld [vmem:[%s3000_s26 + $0x78] sm:$0xff]   ;;  %v2913_v37 = vld [vmem:[%s3000_s26 + $0x140] sm:$0xff]   ;;  %v2915_v39 = vld [vmem:[%s3000_s26 + $0x148] sm:$0xff]  }
  0x1b   : > { %v2914_v38 = vld [vmem:[%s3000_s26 + $0x80] sm:$0xff]   ;;  %v2916_v40 = vld [vmem:[%s3000_s26 + $0x88] sm:$0xff]   ;;  %v2917_v41 = vld [vmem:[%s3000_s26 + $0x150] sm:$0xff]  }
  0x1c   : > { %v2918_v42 = vld [vmem:[%s3000_s26 + $0x90] sm:$0xff]   ;;  %v2919_v43 = vld [vmem:[%s3000_s26 + $0x158] sm:$0xff]   ;;  %v2921_v45 = vld [vmem:[%s3000_s26 + $0x160] sm:$0xff]  }
  0x1d   : > { %v2920_v44 = vld [vmem:[%s3000_s26 + $0x98] sm:$0xff]   ;;  %v2922_v46 = vld [vmem:[%s3000_s26 + $0xa0] sm:$0xff]   ;;  %v2923_v47 = vld [vmem:[%s3000_s26 + $0x168] sm:$0xff]  }
  0x1e   : > { %v2924_v48 = vld [vmem:[%s3000_s26 + $0xa8] sm:$0xff]   ;;  %v2925_v49 = vld [vmem:[%s3000_s26 + $0x170] sm:$0xff]   ;;  %v2927_v51 = vld [vmem:[%s3000_s26 + $0x178] sm:$0xff]  }
  0x1f   : > { %v2926_v50 = vld [vmem:[%s3000_s26 + $0xb0] sm:$0xff]   ;;  %v2928_v52 = vld [vmem:[%s3000_s26 + $0xb8] sm:$0xff]   ;;  %v2929_v53 = vld [vmem:[%s3000_s26 + $0x180] sm:$0xff]  }
  0x20   : > { %v2930_v54 = vld [vmem:[%s3000_s26 + $0xc0] sm:$0xff]  }
  0x21   : > { %2681 = vmatmul.mubr.msk.bf16.gmra.mrb[8].mxu0 %vm586_vm3, %v2886_v10  ;;  %2781 = vmatmul.mubr.msk.bf16.gmra.mrb[8].mxu1 %vm586_vm3, %v2887_v11  ;;  %v3212_v9 = vld [vmem:[%s3581_s4] ss:$0 sm:$0xff] }
  0x22   : > { %2684 = vmatprep.mubr.msk.bf16.mxu0 %vm2944_vm2, %v2942_v0  ;;  %2784 = vmatprep.mubr.msk.bf16.mxu1 %vm2944_vm2, %v2942_v0 }
  0x29   : > { %2685 = vmatmul.mubr.msk.bf16.gmra.mrb[12].mxu0 %vm586_vm3, %v2888_v12  ;;  %2785 = vmatmul.mubr.msk.bf16.gmra.mrb[12].mxu1 %vm586_vm3, %v2889_v13 }
  0x2a   : > { %2688 = vmatprep.mubr.msk.bf16.mxu0 %vm2944_vm2, %v2942_v0  ;;  %2788 = vmatprep.mubr.msk.bf16.mxu1 %vm2944_vm2, %v2942_v0 }
  0x31   : > { %2689 = vmatmul.mubr.msk.bf16.gmra.mrb[16].mxu0 %vm586_vm3, %v2890_v14  ;;  %2789 = vmatmul.mubr.msk.bf16.gmra.mrb[16].mxu1 %vm586_vm3, %v2891_v15 }
  0x32   : > { %2692 = vmatprep.mubr.msk.bf16.mxu0 %vm2944_vm2, %v2942_v0  ;;  %2792 = vmatprep.mubr.msk.bf16.mxu1 %vm2944_vm2, %v2942_v0 }
  0x39   : > { %2693 = vmatmul.mubr.msk.bf16.gmra.mrb[20].mxu0 %vm586_vm3, %v2892_v16  ;;  %2793 = vmatmul.mubr.msk.bf16.gmra.mrb[20].mxu1 %vm586_vm3, %v2893_v17 }
  0x3a   : > { %2696 = vmatprep.mubr.msk.bf16.mxu0 %vm2944_vm2, %v2942_v0  ;;  %2796 = vmatprep.mubr.msk.bf16.mxu1 %vm2944_vm2, %v2942_v0 }
  0x41   : > { %2697 = vmatmul.mubr.msk.bf16.gmra.mrb[24].mxu0 %vm586_vm3, %v2894_v18  ;;  %2797 = vmatmul.mubr.msk.bf16.gmra.mrb[24].mxu1 %vm586_vm3, %v2895_v19 }
  0x42   : > { %2700 = vmatprep.mubr.msk.bf16.mxu0 %vm2944_vm2, %v2942_v0  ;;  %2800 = vmatprep.mubr.msk.bf16.mxu1 %vm2944_vm2, %v2942_v0 }
  0x49   : > { %2701 = vmatmul.mubr.msk.bf16.gmra.mrb[28].mxu0 %vm586_vm3, %v2896_v20  ;;  %2801 = vmatmul.mubr.msk.bf16.gmra.mrb[28].mxu1 %vm586_vm3, %v2897_v21 }
  0x4a   : > { %2704 = vmatprep.mubr.msk.bf16.mxu0 %vm2944_vm2, %v2942_v0  ;;  %2804 = vmatprep.mubr.msk.bf16.mxu1 %vm2944_vm2, %v2942_v0 }
  0x51   : > { %2705 = vmatmul.mubr.msk.bf16.gmra.mrb[32].mxu0 %vm586_vm3, %v2898_v22  ;;  %2805 = vmatmul.mubr.msk.bf16.gmra.mrb[32].mxu1 %vm586_vm3, %v2899_v23 }
  0x52   : > { %2708 = vmatprep.mubr.msk.bf16.mxu0 %vm2944_vm2, %v2942_v0  ;;  %2808 = vmatprep.mubr.msk.bf16.mxu1 %vm2944_vm2, %v2942_v0 }
  0x59   : > { %2709 = vmatmul.mubr.msk.bf16.gmra.mrb[36].mxu0 %vm586_vm3, %v2900_v24  ;;  %2809 = vmatmul.mubr.msk.bf16.gmra.mrb[36].mxu1 %vm586_vm3, %v2901_v25 }
  0x5a   : > { %2712 = vmatprep.mubr.msk.bf16.mxu0 %vm2944_vm2, %v2942_v0  ;;  %2812 = vmatprep.mubr.msk.bf16.mxu1 %vm2944_vm2, %v2942_v0 }
  0x61   : > { %2713 = vmatmul.mubr.msk.bf16.gmra.mrb[40].mxu0 %vm586_vm3, %v2902_v26  ;;  %2813 = vmatmul.mubr.msk.bf16.gmra.mrb[40].mxu1 %vm586_vm3, %v2903_v27 }
  0x62   : > { %2716 = vmatprep.mubr.msk.bf16.mxu0 %vm2944_vm2, %v2942_v0  ;;  %2816 = vmatprep.mubr.msk.bf16.mxu1 %vm2944_vm2, %v2942_v0 }
  0x69   : > { %2717 = vmatmul.mubr.msk.bf16.gmra.mrb[44].mxu0 %vm586_vm3, %v2904_v28  ;;  %2817 = vmatmul.mubr.msk.bf16.gmra.mrb[44].mxu1 %vm586_vm3, %v2905_v29 }
  0x6a   : > { %2720 = vmatprep.mubr.msk.bf16.mxu0 %vm2944_vm2, %v2942_v0  ;;  %2820 = vmatprep.mubr.msk.bf16.mxu1 %vm2944_vm2, %v2942_v0 }
  0x71   : > { %2721 = vmatmul.mubr.msk.bf16.gmra.mrb[48].mxu0 %vm586_vm3, %v2906_v30  ;;  %2821 = vmatmul.mubr.msk.bf16.gmra.mrb[48].mxu1 %vm586_vm3, %v2907_v31 }
  0x72   : > { %2724 = vmatprep.mubr.msk.bf16.mxu0 %vm2944_vm2, %v2942_v0  ;;  %2824 = vmatprep.mubr.msk.bf16.mxu1 %vm2944_vm2, %v2942_v0 }
  0x79   : > { %2725 = vmatmul.mubr.msk.bf16.gmra.mrb[52].mxu0 %vm586_vm3, %v2908_v32  ;;  %2825 = vmatmul.mubr.msk.bf16.gmra.mrb[52].mxu1 %vm586_vm3, %v2909_v33 }
  0x7a   : > { %2728 = vmatprep.mubr.msk.bf16.mxu0 %vm2944_vm2, %v2942_v0  ;;  %2828 = vmatprep.mubr.msk.bf16.mxu1 %vm2944_vm2, %v2942_v0 }
  0x81   : > { %2729 = vmatmul.mubr.msk.bf16.gmra.mrb[56].mxu0 %vm586_vm3, %v2910_v34  ;;  %2829 = vmatmul.mubr.msk.bf16.gmra.mrb[56].mxu1 %vm586_vm3, %v2911_v35 }
  0x82   : > { %2732 = vmatprep.mubr.msk.bf16.mxu0 %vm2944_vm2, %v2942_v0  ;;  %2832 = vmatprep.mubr.msk.bf16.mxu1 %vm2944_vm2, %v2942_v0 }
  0x89   : > { %2733 = vmatmul.mubr.msk.bf16.gmra.mrb[60].mxu0 %vm586_vm3, %v2912_v36  ;;  %2833 = vmatmul.mubr.msk.bf16.gmra.mrb[60].mxu1 %vm586_vm3, %v2913_v37 }
  0x8a   : > { %2736 = vmatprep.mubr.msk.bf16.mxu0 %vm2944_vm2, %v2942_v0  ;;  %2836 = vmatprep.mubr.msk.bf16.mxu1 %vm2944_vm2, %v2942_v0 }
  0x91   : > { %2737 = vmatmul.mubr.msk.bf16.gmra.mrb[64].mxu0 %vm586_vm3, %v2914_v38  ;;  %2837 = vmatmul.mubr.msk.bf16.gmra.mrb[64].mxu1 %vm586_vm3, %v2915_v39 }
  0x92   : > { %2740 = vmatprep.mubr.msk.bf16.mxu0 %vm2944_vm2, %v2942_v0  ;;  %2840 = vmatprep.mubr.msk.bf16.mxu1 %vm2944_vm2, %v2942_v0 }
  0x99   : > { %2741 = vmatmul.mubr.msk.bf16.gmra.mrb[68].mxu0 %vm586_vm3, %v2916_v40  ;;  %2841 = vmatmul.mubr.msk.bf16.gmra.mrb[68].mxu1 %vm586_vm3, %v2917_v41 }
  0x9a   : > { %2744 = vmatprep.mubr.msk.bf16.mxu0 %vm2944_vm2, %v2942_v0  ;;  %2844 = vmatprep.mubr.msk.bf16.mxu1 %vm2944_vm2, %v2942_v0 }
  0xa1   : > { %2745 = vmatmul.mubr.msk.bf16.gmra.mrb[72].mxu0 %vm586_vm3, %v2918_v42  ;;  %2845 = vmatmul.mubr.msk.bf16.gmra.mrb[72].mxu1 %vm586_vm3, %v2919_v43 }
  0xa2   : > { %2748 = vmatprep.mubr.msk.bf16.mxu0 %vm2944_vm2, %v2942_v0  ;;  %2848 = vmatprep.mubr.msk.bf16.mxu1 %vm2944_vm2, %v2942_v0 }
  0xa9   : > { %2749 = vmatmul.mubr.msk.bf16.gmra.mrb[76].mxu0 %vm586_vm3, %v2920_v44  ;;  %2849 = vmatmul.mubr.msk.bf16.gmra.mrb[76].mxu1 %vm586_vm3, %v2921_v45 }
  0xaa   : > { %2752 = vmatprep.mubr.msk.bf16.mxu0 %vm2944_vm2, %v2942_v0  ;;  %2852 = vmatprep.mubr.msk.bf16.mxu1 %vm2944_vm2, %v2942_v0 }
  0xb1   : > { %2753 = vmatmul.mubr.msk.bf16.gmra.mrb[80].mxu0 %vm586_vm3, %v2922_v46  ;;  %2853 = vmatmul.mubr.msk.bf16.gmra.mrb[80].mxu1 %vm586_vm3, %v2923_v47 }
  0xb2   : > { %2756 = vmatprep.mubr.msk.bf16.mxu0 %vm2944_vm2, %v2942_v0  ;;  %2856 = vmatprep.mubr.msk.bf16.mxu1 %vm2944_vm2, %v2942_v0 }
  0xb9   : > { %2757 = vmatmul.mubr.msk.bf16.gmra.mrb[84].mxu0 %vm586_vm3, %v2924_v48  ;;  %2857 = vmatmul.mubr.msk.bf16.gmra.mrb[84].mxu1 %vm586_vm3, %v2925_v49 }
  0xba   : > { %2760 = vmatprep.mubr.msk.bf16.mxu0 %vm2944_vm2, %v2942_v0  ;;  %2860 = vmatprep.mubr.msk.bf16.mxu1 %vm2944_vm2, %v2942_v0 }
  0xc1   : > { %2761 = vmatmul.mubr.msk.bf16.gmra.mrb[88].mxu0 %vm586_vm3, %v2926_v50  ;;  %2861 = vmatmul.mubr.msk.bf16.gmra.mrb[88].mxu1 %vm586_vm3, %v2927_v51 }
  0xc2   : > { %2764 = vmatprep.mubr.msk.bf16.mxu0 %vm2944_vm2, %v2942_v0  ;;  %2864 = vmatprep.mubr.msk.bf16.mxu1 %vm2944_vm2, %v2942_v0 }
  0xc9   : > { %2765 = vmatmul.mubr.msk.bf16.gmra.mrb[92].mxu0 %vm586_vm3, %v2928_v52  ;;  %2865 = vmatmul.mubr.msk.bf16.gmra.mrb[92].mxu1 %vm586_vm3, %v2929_v53 }
  0xca   : > { %2768 = vmatprep.mubr.msk.bf16.mxu0 %vm2944_vm2, %v2942_v0 }
  0xd1   : > { %2769 = vmatmul.mubr.msk.bf16.gmra.mrb[96].mxu0 %vm586_vm3, %v2930_v54 }
  0xe4   : > { %v775_v56 = vpop.f32.mrb[0].mxu0  ;;  %v975_v59 = vpop.f32.mrb[0].mxu1 }
  0xe5   : > { %v776_v57 = vadd.f32 %v3197_v55, %v775_v56  ;;  %v2674_v58 = vpop.f32.mrb[1].mxu0  ;;  %v976_v62 = vadd.f32 %v3197_v55, %v975_v59  ;;  %v2774_v63 = vpop.f32.mrb[1].mxu1 }
  0xe6   : > { %v778_v61 = vpop.f32.mrb[2].mxu0  ;;  %v978_v3 = vpop.f32.mrb[2].mxu1 }
  0xe7   : > { %v1166_v0 = vmax.f32 %v776_v57, 0.0  ;;  %v779_v1 = vadd.f32 %v3197_v55, %v778_v61  ;;  %v2675_v2 = vpop.f32.mrb[3].mxu0  ;;  %v1216_v4 = vmax.f32 %v976_v62, 0.0  ;;  %v979_v5 = vadd.f32 %v3197_v55, %v978_v3  ;;  %v2775_v6 = vpop.f32.mrb[3].mxu1 }
  0xe9   : > { %v1271_v7 = vmul.f32 %v3203_v60, %v1166_v0  ;;  %v1167_v8 = vmax.f32 %v779_v1, 0.0  ;;  %v1321_v10 = vmul.f32 %v3203_v60, %v1216_v4  ;;  %v1217_v11 = vmax.f32 %v979_v5, 0.0 }
  0xeb   : > { %v1272_v12 = vmul.f32 %v3203_v60, %v1167_v8  ;;  %v1426_v13 = vadd.f32 %v3212_v9, %v1321_v10  ;;  %v1322_v14 = vmul.f32 %v3203_v60, %v1217_v11  ;;  %v1376_v16 = vadd.f32 %v3212_v9, %v1271_v7 }
  0xec   : > { %v783_v15 = vpop.f32.mrb[4].mxu0  ;;  %v983_v20 = vpop.f32.mrb[4].mxu1 }
  0xed   : > { %v1377_v17 = vadd.f32 %v3212_v9, %v1272_v12  ;;  %v784_v18 = vadd.f32 %v3197_v55, %v783_v15  ;;  %v2678_v19 = vpop.f32.mrb[5].mxu0  ;;  %v1427_v21 = vadd.f32 %v3212_v9, %v1322_v14  ;;  %v984_v23 = vadd.f32 %v3197_v55, %v983_v20  ;;  %v2778_v24 = vpop.f32.mrb[5].mxu1 }
  0xee   : > { %v786_v22 = vpop.f32.mrb[6].mxu0  ;;  %v986_v29 = vpop.f32.mrb[6].mxu1 }
  0xef   : > { %v2330_v25 = vpack.c.bf16 %v1377_v17, %v1376_v16  ;;  %v1168_v26 = vmax.f32 %v784_v18, 0.0  ;;  %v787_v27 = vadd.f32 %v3197_v55, %v786_v22  ;;  %v2679_v28 = vpop.f32.mrb[7].mxu0  ;;  %v2455_v30 = vpack.c.bf16 %v1427_v21, %v1426_v13  ;;  %v2779_v33 = vpop.f32.mrb[7].mxu1 }
  0xf0   : > { %v1218_v31 = vmax.f32 %v984_v23, 0.0  ;;  %v987_v32 = vadd.f32 %v3197_v55, %v986_v29 }
  0xf1   : > { %2331 = vst [vmem:[%s3226_s10] sm:$0xff] %v2330_v25   ;;  %v1273_v34 = vmul.f32 %v3203_v60, %v1168_v26  ;;  %v1169_v35 = vmax.f32 %v787_v27, 0.0  ;;  %2596 = vst [vmem:[%s3226_s10 + $0xc8] sm:$0xff] %v2455_v30  }
  0xf2   : > { %v1323_v36 = vmul.f32 %v3203_v60, %v1218_v31  ;;  %v1219_v37 = vmax.f32 %v987_v32, 0.0 }
  0xf3   : > { %v1274_v38 = vmul.f32 %v3203_v60, %v1169_v35  ;;  %v1378_v42 = vadd.f32 %v3212_v9, %v1273_v34 }
  0xf4   : > { %v1428_v39 = vadd.f32 %v3212_v9, %v1323_v36  ;;  %v1324_v40 = vmul.f32 %v3203_v60, %v1219_v37  ;;  %v791_v41 = vpop.f32.mrb[8].mxu0  ;;  %v991_v46 = vpop.f32.mrb[8].mxu1 }
  0xf5   : > { %v1379_v43 = vadd.f32 %v3212_v9, %v1274_v38  ;;  %v792_v44 = vadd.f32 %v3197_v55, %v791_v41  ;;  %v2682_v45 = vpop.f32.mrb[9].mxu0  ;;  %v992_v49 = vadd.f32 %v3197_v55, %v991_v46  ;;  %v2782_v50 = vpop.f32.mrb[9].mxu1 }
  0xf6   : > { %v1429_v47 = vadd.f32 %v3212_v9, %v1324_v40  ;;  %v794_v48 = vpop.f32.mrb[10].mxu0  ;;  %v994_v56 = vpop.f32.mrb[10].mxu1 }
  0xf7   : > { %v2335_v51 = vpack.c.bf16 %v1379_v43, %v1378_v42  ;;  %v1170_v52 = vmax.f32 %v792_v44, 0.0  ;;  %v795_v53 = vadd.f32 %v3197_v55, %v794_v48  ;;  %v2683_v54 = vpop.f32.mrb[11].mxu0  ;;  %v1220_v58 = vmax.f32 %v992_v49, 0.0  ;;  %v2783_v61 = vpop.f32.mrb[11].mxu1 }
  0xf8   : > { %v2460_v57 = vpack.c.bf16 %v1429_v47, %v1428_v39  ;;  %v995_v59 = vadd.f32 %v3197_v55, %v994_v56 }
  0xf9   : > { %2572 = vst [vmem:[%s3226_s10 + $0x8] sm:$0xff] %v2335_v51   ;;  %v1275_v62 = vmul.f32 %v3203_v60, %v1170_v52  ;;  %v1171_v63 = vmax.f32 %v795_v53, 0.0  ;;  %v1325_v0 = vmul.f32 %v3203_v60, %v1220_v58 }
  0xfa   : > { %2597 = vst [vmem:[%s3226_s10 + $0xd0] sm:$0xff] %v2460_v57   ;;  %v1221_v1 = vmax.f32 %v995_v59, 0.0 }
  0xfb   : > { %v1276_v2 = vmul.f32 %v3203_v60, %v1171_v63  ;;  %v1430_v3 = vadd.f32 %v3212_v9, %v1325_v0  ;;  %v1380_v6 = vadd.f32 %v3212_v9, %v1275_v62 }
  0xfc   : > { %v1326_v4 = vmul.f32 %v3203_v60, %v1221_v1  ;;  %v799_v5 = vpop.f32.mrb[12].mxu0  ;;  %v999_v11 = vpop.f32.mrb[12].mxu1 }
  0xfd   : > { %v1381_v7 = vadd.f32 %v3212_v9, %v1276_v2  ;;  %v800_v8 = vadd.f32 %v3197_v55, %v799_v5  ;;  %v2686_v10 = vpop.f32.mrb[13].mxu0  ;;  %v1000_v14 = vadd.f32 %v3197_v55, %v999_v11  ;;  %v2786_v15 = vpop.f32.mrb[13].mxu1 }
  0xfe   : > { %v1431_v12 = vadd.f32 %v3212_v9, %v1326_v4  ;;  %v802_v13 = vpop.f32.mrb[14].mxu0  ;;  %v1002_v20 = vpop.f32.mrb[14].mxu1 }
  0xff   : > { %v2340_v16 = vpack.c.bf16 %v1381_v7, %v1380_v6  ;;  %v1172_v17 = vmax.f32 %v800_v8, 0.0  ;;  %v803_v18 = vadd.f32 %v3197_v55, %v802_v13  ;;  %v2687_v19 = vpop.f32.mrb[15].mxu0  ;;  %v1222_v22 = vmax.f32 %v1000_v14, 0.0  ;;  %v2787_v24 = vpop.f32.mrb[15].mxu1 }
 0x100   : > { %v2465_v21 = vpack.c.bf16 %v1431_v12, %v1430_v3  ;;  %v1003_v23 = vadd.f32 %v3197_v55, %v1002_v20 }
 0x101   : > { %2573 = vst [vmem:[%s3226_s10 + $0x10] sm:$0xff] %v2340_v16   ;;  %v1277_v25 = vmul.f32 %v3203_v60, %v1172_v17  ;;  %v1173_v26 = vmax.f32 %v803_v18, 0.0  ;;  %v1327_v27 = vmul.f32 %v3203_v60, %v1222_v22 }
 0x102   : > { %2598 = vst [vmem:[%s3226_s10 + $0xd8] sm:$0xff] %v2465_v21   ;;  %v1223_v28 = vmax.f32 %v1003_v23, 0.0 }
 0x103   : > { %v1278_v29 = vmul.f32 %v3203_v60, %v1173_v26  ;;  %v1432_v30 = vadd.f32 %v3212_v9, %v1327_v27  ;;  %v1382_v33 = vadd.f32 %v3212_v9, %v1277_v25 }
 0x104   : > { %v1328_v31 = vmul.f32 %v3203_v60, %v1223_v28  ;;  %v807_v32 = vpop.f32.mrb[16].mxu0  ;;  %v1007_v37 = vpop.f32.mrb[16].mxu1 }
 0x105   : > { %v1383_v34 = vadd.f32 %v3212_v9, %v1278_v29  ;;  %v808_v35 = vadd.f32 %v3197_v55, %v807_v32  ;;  %v2690_v36 = vpop.f32.mrb[17].mxu0  ;;  %v1008_v40 = vadd.f32 %v3197_v55, %v1007_v37  ;;  %v2790_v41 = vpop.f32.mrb[17].mxu1 }
 0x106   : > { %v1433_v38 = vadd.f32 %v3212_v9, %v1328_v31  ;;  %v810_v39 = vpop.f32.mrb[18].mxu0  ;;  %v1010_v46 = vpop.f32.mrb[18].mxu1 }
 0x107   : > { %v2345_v42 = vpack.c.bf16 %v1383_v34, %v1382_v33  ;;  %v1174_v43 = vmax.f32 %v808_v35, 0.0  ;;  %v811_v44 = vadd.f32 %v3197_v55, %v810_v39  ;;  %v2691_v45 = vpop.f32.mrb[19].mxu0  ;;  %v1224_v48 = vmax.f32 %v1008_v40, 0.0  ;;  %v2791_v50 = vpop.f32.mrb[19].mxu1 }
 0x108   : > { %v2470_v47 = vpack.c.bf16 %v1433_v38, %v1432_v30  ;;  %v1011_v49 = vadd.f32 %v3197_v55, %v1010_v46 }
 0x109   : > { %2574 = vst [vmem:[%s3226_s10 + $0x18] sm:$0xff] %v2345_v42   ;;  %v1279_v51 = vmul.f32 %v3203_v60, %v1174_v43  ;;  %v1175_v52 = vmax.f32 %v811_v44, 0.0  ;;  %v1329_v53 = vmul.f32 %v3203_v60, %v1224_v48 }
 0x10a   : > { %2599 = vst [vmem:[%s3226_s10 + $0xe0] sm:$0xff] %v2470_v47   ;;  %v1225_v54 = vmax.f32 %v1011_v49, 0.0 }
 0x10b   : > { %v1280_v56 = vmul.f32 %v3203_v60, %v1175_v52  ;;  %v1434_v57 = vadd.f32 %v3212_v9, %v1329_v53  ;;  %v1384_v61 = vadd.f32 %v3212_v9, %v1279_v51 }
 0x10c   : > { %v1330_v58 = vmul.f32 %v3203_v60, %v1225_v54  ;;  %v815_v59 = vpop.f32.mrb[20].mxu0  ;;  %v1015_v1 = vpop.f32.mrb[20].mxu1 }
 0x10d   : > { %v1385_v62 = vadd.f32 %v3212_v9, %v1280_v56  ;;  %v816_v63 = vadd.f32 %v3197_v55, %v815_v59  ;;  %v2694_v0 = vpop.f32.mrb[21].mxu0  ;;  %v1016_v4 = vadd.f32 %v3197_v55, %v1015_v1  ;;  %v2794_v5 = vpop.f32.mrb[21].mxu1 }
 0x10e   : > { %v1435_v2 = vadd.f32 %v3212_v9, %v1330_v58  ;;  %v818_v3 = vpop.f32.mrb[22].mxu0  ;;  %v1018_v11 = vpop.f32.mrb[22].mxu1 }
 0x10f   : > { %v2350_v6 = vpack.c.bf16 %v1385_v62, %v1384_v61  ;;  %v1176_v7 = vmax.f32 %v816_v63, 0.0  ;;  %v819_v8 = vadd.f32 %v3197_v55, %v818_v3  ;;  %v2695_v10 = vpop.f32.mrb[23].mxu0  ;;  %v1226_v13 = vmax.f32 %v1016_v4, 0.0  ;;  %v2795_v15 = vpop.f32.mrb[23].mxu1 }
 0x110   : > { %v2475_v12 = vpack.c.bf16 %v1435_v2, %v1434_v57  ;;  %v1019_v14 = vadd.f32 %v3197_v55, %v1018_v11 }
 0x111   : > { %2575 = vst [vmem:[%s3226_s10 + $0x20] sm:$0xff] %v2350_v6   ;;  %v1281_v16 = vmul.f32 %v3203_v60, %v1176_v7  ;;  %v1177_v17 = vmax.f32 %v819_v8, 0.0  ;;  %v1331_v18 = vmul.f32 %v3203_v60, %v1226_v13 }
 0x112   : > { %2600 = vst [vmem:[%s3226_s10 + $0xe8] sm:$0xff] %v2475_v12   ;;  %v1227_v19 = vmax.f32 %v1019_v14, 0.0 }
 0x113   : > { %v1282_v20 = vmul.f32 %v3203_v60, %v1177_v17  ;;  %v1436_v21 = vadd.f32 %v3212_v9, %v1331_v18  ;;  %v1386_v24 = vadd.f32 %v3212_v9, %v1281_v16 }
 0x114   : > { %v1332_v22 = vmul.f32 %v3203_v60, %v1227_v19  ;;  %v823_v23 = vpop.f32.mrb[24].mxu0  ;;  %v1023_v28 = vpop.f32.mrb[24].mxu1 }
 0x115   : > { %v1387_v25 = vadd.f32 %v3212_v9, %v1282_v20  ;;  %v824_v26 = vadd.f32 %v3197_v55, %v823_v23  ;;  %v2698_v27 = vpop.f32.mrb[25].mxu0  ;;  %v1024_v31 = vadd.f32 %v3197_v55, %v1023_v28  ;;  %v2798_v32 = vpop.f32.mrb[25].mxu1 }
 0x116   : > { %v1437_v29 = vadd.f32 %v3212_v9, %v1332_v22  ;;  %v826_v30 = vpop.f32.mrb[26].mxu0  ;;  %v1026_v37 = vpop.f32.mrb[26].mxu1 }
 0x117   : > { %v2355_v33 = vpack.c.bf16 %v1387_v25, %v1386_v24  ;;  %v1178_v34 = vmax.f32 %v824_v26, 0.0  ;;  %v827_v35 = vadd.f32 %v3197_v55, %v826_v30  ;;  %v2699_v36 = vpop.f32.mrb[27].mxu0  ;;  %v1228_v39 = vmax.f32 %v1024_v31, 0.0  ;;  %v2799_v41 = vpop.f32.mrb[27].mxu1 }
 0x118   : > { %v2480_v38 = vpack.c.bf16 %v1437_v29, %v1436_v21  ;;  %v1027_v40 = vadd.f32 %v3197_v55, %v1026_v37 }
 0x119   : > { %2576 = vst [vmem:[%s3226_s10 + $0x28] sm:$0xff] %v2355_v33   ;;  %v1283_v42 = vmul.f32 %v3203_v60, %v1178_v34  ;;  %v1179_v43 = vmax.f32 %v827_v35, 0.0  ;;  %v1333_v44 = vmul.f32 %v3203_v60, %v1228_v39 }
 0x11a   : > { %2601 = vst [vmem:[%s3226_s10 + $0xf0] sm:$0xff] %v2480_v38   ;;  %v1229_v45 = vmax.f32 %v1027_v40, 0.0 }
 0x11b   : > { %v1284_v46 = vmul.f32 %v3203_v60, %v1179_v43  ;;  %v1438_v47 = vadd.f32 %v3212_v9, %v1333_v44  ;;  %v1388_v50 = vadd.f32 %v3212_v9, %v1283_v42 }
 0x11c   : > { %v1334_v48 = vmul.f32 %v3203_v60, %v1229_v45  ;;  %v831_v49 = vpop.f32.mrb[28].mxu0  ;;  %v1031_v54 = vpop.f32.mrb[28].mxu1 }
 0x11d   : > { %v1389_v51 = vadd.f32 %v3212_v9, %v1284_v46  ;;  %v832_v52 = vadd.f32 %v3197_v55, %v831_v49  ;;  %v2702_v53 = vpop.f32.mrb[29].mxu0  ;;  %v1032_v58 = vadd.f32 %v3197_v55, %v1031_v54  ;;  %v2802_v59 = vpop.f32.mrb[29].mxu1 }
 0x11e   : > { %v1439_v56 = vadd.f32 %v3212_v9, %v1334_v48  ;;  %v834_v57 = vpop.f32.mrb[30].mxu0  ;;  %v1034_v1 = vpop.f32.mrb[30].mxu1 }
 0x11f   : > { %v2360_v61 = vpack.c.bf16 %v1389_v51, %v1388_v50  ;;  %v1180_v62 = vmax.f32 %v832_v52, 0.0  ;;  %v835_v63 = vadd.f32 %v3197_v55, %v834_v57  ;;  %v2703_v0 = vpop.f32.mrb[31].mxu0  ;;  %v1230_v3 = vmax.f32 %v1032_v58, 0.0  ;;  %v2803_v5 = vpop.f32.mrb[31].mxu1 }
 0x120   : > { %v2485_v2 = vpack.c.bf16 %v1439_v56, %v1438_v47  ;;  %v1035_v4 = vadd.f32 %v3197_v55, %v1034_v1 }
 0x121   : > { %2577 = vst [vmem:[%s3226_s10 + $0x30] sm:$0xff] %v2360_v61   ;;  %v1285_v6 = vmul.f32 %v3203_v60, %v1180_v62  ;;  %v1181_v7 = vmax.f32 %v835_v63, 0.0  ;;  %v1335_v8 = vmul.f32 %v3203_v60, %v1230_v3 }
 0x122   : > { %2602 = vst [vmem:[%s3226_s10 + $0xf8] sm:$0xff] %v2485_v2   ;;  %v1231_v10 = vmax.f32 %v1035_v4, 0.0 }
 0x123   : > { %v1286_v11 = vmul.f32 %v3203_v60, %v1181_v7  ;;  %v1440_v12 = vadd.f32 %v3212_v9, %v1335_v8  ;;  %v1390_v15 = vadd.f32 %v3212_v9, %v1285_v6 }
 0x124   : > { %v1336_v13 = vmul.f32 %v3203_v60, %v1231_v10  ;;  %v839_v14 = vpop.f32.mrb[32].mxu0  ;;  %v1039_v19 = vpop.f32.mrb[32].mxu1 }
 0x125   : > { %v1391_v16 = vadd.f32 %v3212_v9, %v1286_v11  ;;  %v840_v17 = vadd.f32 %v3197_v55, %v839_v14  ;;  %v2706_v18 = vpop.f32.mrb[33].mxu0  ;;  %v1040_v22 = vadd.f32 %v3197_v55, %v1039_v19  ;;  %v2806_v23 = vpop.f32.mrb[33].mxu1 }
 0x126   : > { %v1441_v20 = vadd.f32 %v3212_v9, %v1336_v13  ;;  %v842_v21 = vpop.f32.mrb[34].mxu0  ;;  %v1042_v28 = vpop.f32.mrb[34].mxu1 }
 0x127   : > { %v2365_v24 = vpack.c.bf16 %v1391_v16, %v1390_v15  ;;  %v1182_v25 = vmax.f32 %v840_v17, 0.0  ;;  %v843_v26 = vadd.f32 %v3197_v55, %v842_v21  ;;  %v2707_v27 = vpop.f32.mrb[35].mxu0  ;;  %v1232_v30 = vmax.f32 %v1040_v22, 0.0  ;;  %v2807_v32 = vpop.f32.mrb[35].mxu1 }
 0x128   : > { %v2490_v29 = vpack.c.bf16 %v1441_v20, %v1440_v12  ;;  %v1043_v31 = vadd.f32 %v3197_v55, %v1042_v28 }
 0x129   : > { %2578 = vst [vmem:[%s3226_s10 + $0x38] sm:$0xff] %v2365_v24   ;;  %v1287_v33 = vmul.f32 %v3203_v60, %v1182_v25  ;;  %v1183_v34 = vmax.f32 %v843_v26, 0.0  ;;  %v1337_v35 = vmul.f32 %v3203_v60, %v1232_v30 }
 0x12a   : > { %2603 = vst [vmem:[%s3226_s10 + $0x100] sm:$0xff] %v2490_v29   ;;  %v1233_v36 = vmax.f32 %v1043_v31, 0.0 }
 0x12b   : > { %v1288_v37 = vmul.f32 %v3203_v60, %v1183_v34  ;;  %v1442_v38 = vadd.f32 %v3212_v9, %v1337_v35  ;;  %v1392_v41 = vadd.f32 %v3212_v9, %v1287_v33 }
 0x12c   : > { %v1338_v39 = vmul.f32 %v3203_v60, %v1233_v36  ;;  %v847_v40 = vpop.f32.mrb[36].mxu0  ;;  %v1047_v45 = vpop.f32.mrb[36].mxu1 }
 0x12d   : > { %v1393_v42 = vadd.f32 %v3212_v9, %v1288_v37  ;;  %v848_v43 = vadd.f32 %v3197_v55, %v847_v40  ;;  %v2710_v44 = vpop.f32.mrb[37].mxu0  ;;  %v1048_v48 = vadd.f32 %v3197_v55, %v1047_v45  ;;  %v2810_v49 = vpop.f32.mrb[37].mxu1 }
 0x12e   : > { %v1443_v46 = vadd.f32 %v3212_v9, %v1338_v39  ;;  %v850_v47 = vpop.f32.mrb[38].mxu0  ;;  %v1050_v54 = vpop.f32.mrb[38].mxu1 }
 0x12f   : > { %v2370_v50 = vpack.c.bf16 %v1393_v42, %v1392_v41  ;;  %v1184_v51 = vmax.f32 %v848_v43, 0.0  ;;  %v851_v52 = vadd.f32 %v3197_v55, %v850_v47  ;;  %v2711_v53 = vpop.f32.mrb[39].mxu0  ;;  %v1234_v57 = vmax.f32 %v1048_v48, 0.0  ;;  %v2811_v59 = vpop.f32.mrb[39].mxu1 }
 0x130   : > { %v2495_v56 = vpack.c.bf16 %v1443_v46, %v1442_v38  ;;  %v1051_v58 = vadd.f32 %v3197_v55, %v1050_v54 }
 0x131   : > { %2579 = vst [vmem:[%s3226_s10 + $0x40] sm:$0xff] %v2370_v50   ;;  %v1289_v61 = vmul.f32 %v3203_v60, %v1184_v51  ;;  %v1185_v62 = vmax.f32 %v851_v52, 0.0  ;;  %v1339_v63 = vmul.f32 %v3203_v60, %v1234_v57 }
 0x132   : > { %2604 = vst [vmem:[%s3226_s10 + $0x108] sm:$0xff] %v2495_v56   ;;  %v1235_v0 = vmax.f32 %v1051_v58, 0.0 }
 0x133   : > { %v1290_v1 = vmul.f32 %v3203_v60, %v1185_v62  ;;  %v1444_v2 = vadd.f32 %v3212_v9, %v1339_v63  ;;  %v1394_v5 = vadd.f32 %v3212_v9, %v1289_v61 }
 0x134   : > { %v1340_v3 = vmul.f32 %v3203_v60, %v1235_v0  ;;  %v855_v4 = vpop.f32.mrb[40].mxu0  ;;  %v1055_v10 = vpop.f32.mrb[40].mxu1 }
 0x135   : > { %v1395_v6 = vadd.f32 %v3212_v9, %v1290_v1  ;;  %v856_v7 = vadd.f32 %v3197_v55, %v855_v4  ;;  %v2714_v8 = vpop.f32.mrb[41].mxu0  ;;  %v1056_v13 = vadd.f32 %v3197_v55, %v1055_v10  ;;  %v2814_v14 = vpop.f32.mrb[41].mxu1 }
 0x136   : > { %v1445_v11 = vadd.f32 %v3212_v9, %v1340_v3  ;;  %v858_v12 = vpop.f32.mrb[42].mxu0  ;;  %v1058_v19 = vpop.f32.mrb[42].mxu1 }
 0x137   : > { %v2375_v15 = vpack.c.bf16 %v1395_v6, %v1394_v5  ;;  %v1186_v16 = vmax.f32 %v856_v7, 0.0  ;;  %v859_v17 = vadd.f32 %v3197_v55, %v858_v12  ;;  %v2715_v18 = vpop.f32.mrb[43].mxu0  ;;  %v1236_v21 = vmax.f32 %v1056_v13, 0.0  ;;  %v2815_v23 = vpop.f32.mrb[43].mxu1 }
 0x138   : > { %v2500_v20 = vpack.c.bf16 %v1445_v11, %v1444_v2  ;;  %v1059_v22 = vadd.f32 %v3197_v55, %v1058_v19 }
 0x139   : > { %2580 = vst [vmem:[%s3226_s10 + $0x48] sm:$0xff] %v2375_v15   ;;  %v1291_v24 = vmul.f32 %v3203_v60, %v1186_v16  ;;  %v1187_v25 = vmax.f32 %v859_v17, 0.0  ;;  %v1341_v26 = vmul.f32 %v3203_v60, %v1236_v21 }
 0x13a   : > { %2605 = vst [vmem:[%s3226_s10 + $0x110] sm:$0xff] %v2500_v20   ;;  %v1237_v27 = vmax.f32 %v1059_v22, 0.0 }
 0x13b   : > { %v1292_v28 = vmul.f32 %v3203_v60, %v1187_v25  ;;  %v1446_v29 = vadd.f32 %v3212_v9, %v1341_v26  ;;  %v1396_v32 = vadd.f32 %v3212_v9, %v1291_v24 }
 0x13c   : > { %v1342_v30 = vmul.f32 %v3203_v60, %v1237_v27  ;;  %v863_v31 = vpop.f32.mrb[44].mxu0  ;;  %v1063_v36 = vpop.f32.mrb[44].mxu1 }
 0x13d   : > { %v1397_v33 = vadd.f32 %v3212_v9, %v1292_v28  ;;  %v864_v34 = vadd.f32 %v3197_v55, %v863_v31  ;;  %v2718_v35 = vpop.f32.mrb[45].mxu0  ;;  %v1064_v39 = vadd.f32 %v3197_v55, %v1063_v36  ;;  %v2818_v40 = vpop.f32.mrb[45].mxu1 }
 0x13e   : > { %v1447_v37 = vadd.f32 %v3212_v9, %v1342_v30  ;;  %v866_v38 = vpop.f32.mrb[46].mxu0  ;;  %v1066_v45 = vpop.f32.mrb[46].mxu1 }
 0x13f   : > { %v2380_v41 = vpack.c.bf16 %v1397_v33, %v1396_v32  ;;  %v1188_v42 = vmax.f32 %v864_v34, 0.0  ;;  %v867_v43 = vadd.f32 %v3197_v55, %v866_v38  ;;  %v2719_v44 = vpop.f32.mrb[47].mxu0  ;;  %v1238_v47 = vmax.f32 %v1064_v39, 0.0  ;;  %v2819_v49 = vpop.f32.mrb[47].mxu1 }
 0x140   : > { %v2505_v46 = vpack.c.bf16 %v1447_v37, %v1446_v29  ;;  %v1067_v48 = vadd.f32 %v3197_v55, %v1066_v45 }
 0x141   : > { %2581 = vst [vmem:[%s3226_s10 + $0x50] sm:$0xff] %v2380_v41   ;;  %v1293_v50 = vmul.f32 %v3203_v60, %v1188_v42  ;;  %v1189_v51 = vmax.f32 %v867_v43, 0.0  ;;  %v1343_v52 = vmul.f32 %v3203_v60, %v1238_v47 }
 0x142   : > { %2606 = vst [vmem:[%s3226_s10 + $0x118] sm:$0xff] %v2505_v46   ;;  %v1239_v53 = vmax.f32 %v1067_v48, 0.0 }
 0x143   : > { %v1294_v54 = vmul.f32 %v3203_v60, %v1189_v51  ;;  %v1448_v56 = vadd.f32 %v3212_v9, %v1343_v52  ;;  %v1398_v59 = vadd.f32 %v3212_v9, %v1293_v50 }
 0x144   : > { %v1344_v57 = vmul.f32 %v3203_v60, %v1239_v53  ;;  %v871_v58 = vpop.f32.mrb[48].mxu0  ;;  %v1071_v0 = vpop.f32.mrb[48].mxu1 }
 0x145   : > { %v1399_v61 = vadd.f32 %v3212_v9, %v1294_v54  ;;  %v872_v62 = vadd.f32 %v3197_v55, %v871_v58  ;;  %v2722_v63 = vpop.f32.mrb[49].mxu0  ;;  %v1072_v3 = vadd.f32 %v3197_v55, %v1071_v0  ;;  %v2822_v4 = vpop.f32.mrb[49].mxu1 }
 0x146   : > { %v1449_v1 = vadd.f32 %v3212_v9, %v1344_v57  ;;  %v874_v2 = vpop.f32.mrb[50].mxu0  ;;  %v1074_v10 = vpop.f32.mrb[50].mxu1 }
 0x147   : > { %v2385_v5 = vpack.c.bf16 %v1399_v61, %v1398_v59  ;;  %v1190_v6 = vmax.f32 %v872_v62, 0.0  ;;  %v875_v7 = vadd.f32 %v3197_v55, %v874_v2  ;;  %v2723_v8 = vpop.f32.mrb[51].mxu0  ;;  %v1240_v12 = vmax.f32 %v1072_v3, 0.0  ;;  %v2823_v14 = vpop.f32.mrb[51].mxu1 }
 0x148   : > { %v2510_v11 = vpack.c.bf16 %v1449_v1, %v1448_v56  ;;  %v1075_v13 = vadd.f32 %v3197_v55, %v1074_v10 }
 0x149   : > { %2582 = vst [vmem:[%s3226_s10 + $0x58] sm:$0xff] %v2385_v5   ;;  %v1295_v15 = vmul.f32 %v3203_v60, %v1190_v6  ;;  %v1191_v16 = vmax.f32 %v875_v7, 0.0  ;;  %v1345_v17 = vmul.f32 %v3203_v60, %v1240_v12 }
 0x14a   : > { %2607 = vst [vmem:[%s3226_s10 + $0x120] sm:$0xff] %v2510_v11   ;;  %v1241_v18 = vmax.f32 %v1075_v13, 0.0 }
 0x14b   : > { %v1296_v19 = vmul.f32 %v3203_v60, %v1191_v16  ;;  %v1450_v20 = vadd.f32 %v3212_v9, %v1345_v17  ;;  %v1400_v23 = vadd.f32 %v3212_v9, %v1295_v15 }
 0x14c   : > { %v1346_v21 = vmul.f32 %v3203_v60, %v1241_v18  ;;  %v879_v22 = vpop.f32.mrb[52].mxu0  ;;  %v1079_v27 = vpop.f32.mrb[52].mxu1 }
 0x14d   : > { %v1401_v24 = vadd.f32 %v3212_v9, %v1296_v19  ;;  %v880_v25 = vadd.f32 %v3197_v55, %v879_v22  ;;  %v2726_v26 = vpop.f32.mrb[53].mxu0  ;;  %v1080_v30 = vadd.f32 %v3197_v55, %v1079_v27  ;;  %v2826_v31 = vpop.f32.mrb[53].mxu1 }
 0x14e   : > { %v1451_v28 = vadd.f32 %v3212_v9, %v1346_v21  ;;  %v882_v29 = vpop.f32.mrb[54].mxu0  ;;  %v1082_v36 = vpop.f32.mrb[54].mxu1 }
 0x14f   : > { %v2390_v32 = vpack.c.bf16 %v1401_v24, %v1400_v23  ;;  %v1192_v33 = vmax.f32 %v880_v25, 0.0  ;;  %v883_v34 = vadd.f32 %v3197_v55, %v882_v29  ;;  %v2727_v35 = vpop.f32.mrb[55].mxu0  ;;  %v1242_v38 = vmax.f32 %v1080_v30, 0.0  ;;  %v2827_v40 = vpop.f32.mrb[55].mxu1 }
 0x150   : > { %v2515_v37 = vpack.c.bf16 %v1451_v28, %v1450_v20  ;;  %v1083_v39 = vadd.f32 %v3197_v55, %v1082_v36 }
 0x151   : > { %2583 = vst [vmem:[%s3226_s10 + $0x60] sm:$0xff] %v2390_v32   ;;  %v1297_v41 = vmul.f32 %v3203_v60, %v1192_v33  ;;  %v1193_v42 = vmax.f32 %v883_v34, 0.0  ;;  %v1347_v43 = vmul.f32 %v3203_v60, %v1242_v38 }
 0x152   : > { %2608 = vst [vmem:[%s3226_s10 + $0x128] sm:$0xff] %v2515_v37   ;;  %v1243_v44 = vmax.f32 %v1083_v39, 0.0 }
 0x153   : > { %v1298_v45 = vmul.f32 %v3203_v60, %v1193_v42  ;;  %v1452_v46 = vadd.f32 %v3212_v9, %v1347_v43  ;;  %v1402_v49 = vadd.f32 %v3212_v9, %v1297_v41 }
 0x154   : > { %v1348_v47 = vmul.f32 %v3203_v60, %v1243_v44  ;;  %v887_v48 = vpop.f32.mrb[56].mxu0  ;;  %v1087_v53 = vpop.f32.mrb[56].mxu1 }
 0x155   : > { %v1403_v50 = vadd.f32 %v3212_v9, %v1298_v45  ;;  %v888_v51 = vadd.f32 %v3197_v55, %v887_v48  ;;  %v2730_v52 = vpop.f32.mrb[57].mxu0  ;;  %v1088_v57 = vadd.f32 %v3197_v55, %v1087_v53  ;;  %v2830_v58 = vpop.f32.mrb[57].mxu1 }
 0x156   : > { %v1453_v54 = vadd.f32 %v3212_v9, %v1348_v47  ;;  %v890_v56 = vpop.f32.mrb[58].mxu0  ;;  %v1090_v0 = vpop.f32.mrb[58].mxu1 }
 0x157   : > { %v2395_v59 = vpack.c.bf16 %v1403_v50, %v1402_v49  ;;  %v1194_v61 = vmax.f32 %v888_v51, 0.0  ;;  %v891_v62 = vadd.f32 %v3197_v55, %v890_v56  ;;  %v2731_v63 = vpop.f32.mrb[59].mxu0  ;;  %v1244_v2 = vmax.f32 %v1088_v57, 0.0  ;;  %v2831_v4 = vpop.f32.mrb[59].mxu1 }
 0x158   : > { %v2520_v1 = vpack.c.bf16 %v1453_v54, %v1452_v46  ;;  %v1091_v3 = vadd.f32 %v3197_v55, %v1090_v0 }
 0x159   : > { %2584 = vst [vmem:[%s3226_s10 + $0x68] sm:$0xff] %v2395_v59   ;;  %v1299_v5 = vmul.f32 %v3203_v60, %v1194_v61  ;;  %v1195_v6 = vmax.f32 %v891_v62, 0.0  ;;  %v1349_v7 = vmul.f32 %v3203_v60, %v1244_v2 }
 0x15a   : > { %2609 = vst [vmem:[%s3226_s10 + $0x130] sm:$0xff] %v2520_v1   ;;  %v1245_v8 = vmax.f32 %v1091_v3, 0.0 }
 0x15b   : > { %v1300_v10 = vmul.f32 %v3203_v60, %v1195_v6  ;;  %v1454_v11 = vadd.f32 %v3212_v9, %v1349_v7  ;;  %v1404_v14 = vadd.f32 %v3212_v9, %v1299_v5 }
 0x15c   : > { %v1350_v12 = vmul.f32 %v3203_v60, %v1245_v8  ;;  %v895_v13 = vpop.f32.mrb[60].mxu0  ;;  %v1095_v18 = vpop.f32.mrb[60].mxu1 }
 0x15d   : > { %v1405_v15 = vadd.f32 %v3212_v9, %v1300_v10  ;;  %v896_v16 = vadd.f32 %v3197_v55, %v895_v13  ;;  %v2734_v17 = vpop.f32.mrb[61].mxu0  ;;  %v1096_v21 = vadd.f32 %v3197_v55, %v1095_v18  ;;  %v2834_v22 = vpop.f32.mrb[61].mxu1 }
 0x15e   : > { %v1455_v19 = vadd.f32 %v3212_v9, %v1350_v12  ;;  %v898_v20 = vpop.f32.mrb[62].mxu0  ;;  %v1098_v27 = vpop.f32.mrb[62].mxu1 }
 0x15f   : > { %v2400_v23 = vpack.c.bf16 %v1405_v15, %v1404_v14  ;;  %v1196_v24 = vmax.f32 %v896_v16, 0.0  ;;  %v899_v25 = vadd.f32 %v3197_v55, %v898_v20  ;;  %v2735_v26 = vpop.f32.mrb[63].mxu0  ;;  %v1246_v29 = vmax.f32 %v1096_v21, 0.0  ;;  %v2835_v31 = vpop.f32.mrb[63].mxu1 }
 0x160   : > { %v2525_v28 = vpack.c.bf16 %v1455_v19, %v1454_v11  ;;  %v1099_v30 = vadd.f32 %v3197_v55, %v1098_v27 }
 0x161   : > { %2585 = vst [vmem:[%s3226_s10 + $0x70] sm:$0xff] %v2400_v23   ;;  %v1301_v32 = vmul.f32 %v3203_v60, %v1196_v24  ;;  %v1197_v33 = vmax.f32 %v899_v25, 0.0  ;;  %v1351_v34 = vmul.f32 %v3203_v60, %v1246_v29 }
 0x162   : > { %2610 = vst [vmem:[%s3226_s10 + $0x138] sm:$0xff] %v2525_v28   ;;  %v1247_v35 = vmax.f32 %v1099_v30, 0.0 }
 0x163   : > { %v1302_v36 = vmul.f32 %v3203_v60, %v1197_v33  ;;  %v1456_v37 = vadd.f32 %v3212_v9, %v1351_v34  ;;  %v1406_v40 = vadd.f32 %v3212_v9, %v1301_v32 }
 0x164   : > { %v1352_v38 = vmul.f32 %v3203_v60, %v1247_v35  ;;  %v903_v39 = vpop.f32.mrb[64].mxu0  ;;  %v1103_v44 = vpop.f32.mrb[64].mxu1 }
 0x165   : > { %v1407_v41 = vadd.f32 %v3212_v9, %v1302_v36  ;;  %v904_v42 = vadd.f32 %v3197_v55, %v903_v39  ;;  %v2738_v43 = vpop.f32.mrb[65].mxu0  ;;  %v1104_v47 = vadd.f32 %v3197_v55, %v1103_v44  ;;  %v2838_v48 = vpop.f32.mrb[65].mxu1 }
 0x166   : > { %v1457_v45 = vadd.f32 %v3212_v9, %v1352_v38  ;;  %v906_v46 = vpop.f32.mrb[66].mxu0  ;;  %v1106_v53 = vpop.f32.mrb[66].mxu1 }
 0x167   : > { %v2405_v49 = vpack.c.bf16 %v1407_v41, %v1406_v40  ;;  %v1198_v50 = vmax.f32 %v904_v42, 0.0  ;;  %v907_v51 = vadd.f32 %v3197_v55, %v906_v46  ;;  %v2739_v52 = vpop.f32.mrb[67].mxu0  ;;  %v1248_v56 = vmax.f32 %v1104_v47, 0.0  ;;  %v2839_v58 = vpop.f32.mrb[67].mxu1 }
 0x168   : > { %v2530_v54 = vpack.c.bf16 %v1457_v45, %v1456_v37  ;;  %v1107_v57 = vadd.f32 %v3197_v55, %v1106_v53  ;;  %v3490_v58 = vld [vmem:[%s3581_s4] ss:$0 sm:$0xff] }
 0x169   : > { %2586 = vst [vmem:[%s3226_s10 + $0x78] sm:$0xff] %v2405_v49   ;;  %v1303_v59 = vmul.f32 %v3203_v60, %v1198_v50  ;;  %v1199_v61 = vmax.f32 %v907_v51, 0.0  ;;  %v1353_v62 = vmul.f32 %v3203_v60, %v1248_v56 }
 0x16a   : > { %2611 = vst [vmem:[%s3226_s10 + $0x140] sm:$0xff] %v2530_v54   ;;  %v1249_v63 = vmax.f32 %v1107_v57, 0.0 }
 0x16b   : > { %v1304_v0 = vmul.f32 %v3203_v60, %v1199_v61  ;;  %v1458_v1 = vadd.f32 %v3212_v9, %v1353_v62  ;;  %v1408_v4 = vadd.f32 %v3212_v9, %v1303_v59 }
 0x16c   : > { %v1354_v2 = vmul.f32 %v3203_v60, %v1249_v63  ;;  %v911_v3 = vpop.f32.mrb[68].mxu0  ;;  %v1111_v8 = vpop.f32.mrb[68].mxu1 }
 0x16d   : > { %v1409_v5 = vadd.f32 %v3212_v9, %v1304_v0  ;;  %v912_v6 = vadd.f32 %v3197_v55, %v911_v3  ;;  %v2742_v7 = vpop.f32.mrb[69].mxu0  ;;  %v1112_v12 = vadd.f32 %v3197_v55, %v1111_v8  ;;  %v2842_v13 = vpop.f32.mrb[69].mxu1 }
 0x16e   : > { %v1459_v10 = vadd.f32 %v3212_v9, %v1354_v2  ;;  %v914_v11 = vpop.f32.mrb[70].mxu0  ;;  %v1114_v18 = vpop.f32.mrb[70].mxu1 }
 0x16f   : > { %v2410_v14 = vpack.c.bf16 %v1409_v5, %v1408_v4  ;;  %v1200_v15 = vmax.f32 %v912_v6, 0.0  ;;  %v915_v16 = vadd.f32 %v3197_v55, %v914_v11  ;;  %v2743_v17 = vpop.f32.mrb[71].mxu0  ;;  %v1250_v20 = vmax.f32 %v1112_v12, 0.0  ;;  %v2843_v22 = vpop.f32.mrb[71].mxu1 }
 0x170   : > { %v2535_v19 = vpack.c.bf16 %v1459_v10, %v1458_v1  ;;  %v1115_v21 = vadd.f32 %v3197_v55, %v1114_v18 }
 0x171   : > { %2587 = vst [vmem:[%s3226_s10 + $0x80] sm:$0xff] %v2410_v14   ;;  %v1305_v23 = vmul.f32 %v3203_v60, %v1200_v15  ;;  %v1201_v24 = vmax.f32 %v915_v16, 0.0  ;;  %v1355_v25 = vmul.f32 %v3203_v60, %v1250_v20 }
 0x172   : > { %2612 = vst [vmem:[%s3226_s10 + $0x148] sm:$0xff] %v2535_v19   ;;  %v1251_v26 = vmax.f32 %v1115_v21, 0.0 }
 0x173   : > { %v1306_v27 = vmul.f32 %v3203_v60, %v1201_v24  ;;  %v1460_v28 = vadd.f32 %v3212_v9, %v1355_v25  ;;  %v1410_v31 = vadd.f32 %v3212_v9, %v1305_v23 }
 0x174   : > { %v1356_v29 = vmul.f32 %v3203_v60, %v1251_v26  ;;  %v919_v30 = vpop.f32.mrb[72].mxu0  ;;  %v1119_v35 = vpop.f32.mrb[72].mxu1  ;;  %v3471_v60 = vld [vmem:[%s3579_s2] ss:$0 sm:$0xff] }
 0x175   : > { %v1411_v32 = vadd.f32 %v3212_v9, %v1306_v27  ;;  %v920_v33 = vadd.f32 %v3197_v55, %v919_v30  ;;  %v2746_v34 = vpop.f32.mrb[73].mxu0  ;;  %v1120_v38 = vadd.f32 %v3197_v55, %v1119_v35  ;;  %v2846_v39 = vpop.f32.mrb[73].mxu1  ;;  %v3479_v55 = vld [vmem:[%s3580_s3] ss:$0 sm:$0xff] }
 0x176   : > { %v1461_v36 = vadd.f32 %v3212_v9, %v1356_v29  ;;  %v922_v37 = vpop.f32.mrb[74].mxu0  ;;  %v1122_v44 = vpop.f32.mrb[74].mxu1 }
 0x177   : > { %v2415_v40 = vpack.c.bf16 %v1411_v32, %v1410_v31  ;;  %v1202_v41 = vmax.f32 %v920_v33, 0.0  ;;  %v923_v42 = vadd.f32 %v3471_v60, %v922_v37  ;;  %v2747_v43 = vpop.f32.mrb[75].mxu0  ;;  %v1252_v46 = vmax.f32 %v1120_v38, 0.0  ;;  %v2847_v48 = vpop.f32.mrb[75].mxu1 }
 0x178   : > { %v2540_v45 = vpack.c.bf16 %v1461_v36, %v1460_v28  ;;  %v1123_v47 = vadd.f32 %v3471_v60, %v1122_v44 }
 0x179   : > { %2588 = vst [vmem:[%s3226_s10 + $0x88] sm:$0xff] %v2415_v40   ;;  %v1307_v49 = vmul.f32 %v3479_v55, %v1202_v41  ;;  %v1203_v50 = vmax.f32 %v923_v42, 0.0  ;;  %v1357_v51 = vmul.f32 %v3479_v55, %v1252_v46 }
 0x17a   : > { %2613 = vst [vmem:[%s3226_s10 + $0x150] sm:$0xff] %v2540_v45   ;;  %v1253_v52 = vmax.f32 %v1123_v47, 0.0 }
 0x17b   : > { %v1308_v53 = vmul.f32 %v3479_v55, %v1203_v50  ;;  %v1462_v54 = vadd.f32 %v3212_v9, %v1357_v51  ;;  %v1412_v59 = vadd.f32 %v3490_v58, %v1307_v49 }
 0x17c   : > { %v1358_v56 = vmul.f32 %v3479_v55, %v1253_v52  ;;  %v927_v57 = vpop.f32.mrb[76].mxu0  ;;  %v1127_v0 = vpop.f32.mrb[76].mxu1 }
 0x17d   : > { %v1413_v61 = vadd.f32 %v3490_v58, %v1308_v53  ;;  %v928_v62 = vadd.f32 %v3471_v60, %v927_v57  ;;  %v2750_v63 = vpop.f32.mrb[77].mxu0  ;;  %v1128_v2 = vadd.f32 %v3471_v60, %v1127_v0  ;;  %v2850_v3 = vpop.f32.mrb[77].mxu1 }
 0x17e   : > { %v1463_v1 = vadd.f32 %v3490_v58, %v1358_v56  ;;  %v930_v9 = vpop.f32.mrb[78].mxu0  ;;  %v1130_v8 = vpop.f32.mrb[78].mxu1 }
 0x17f   : > { %v2420_v4 = vpack.c.bf16 %v1413_v61, %v1412_v59  ;;  %v1204_v5 = vmax.f32 %v928_v62, 0.0  ;;  %v931_v6 = vadd.f32 %v3471_v60, %v930_v9  ;;  %v2751_v7 = vpop.f32.mrb[79].mxu0  ;;  %v1254_v11 = vmax.f32 %v1128_v2, 0.0  ;;  %v2851_v13 = vpop.f32.mrb[79].mxu1 }
 0x180   : > { %v2545_v10 = vpack.c.bf16 %v1463_v1, %v1462_v54  ;;  %v1131_v12 = vadd.f32 %v3471_v60, %v1130_v8 }
 0x181   : > { %2589 = vst [vmem:[%s3226_s10 + $0x90] sm:$0xff] %v2420_v4   ;;  %v1309_v14 = vmul.f32 %v3479_v55, %v1204_v5  ;;  %v1205_v15 = vmax.f32 %v931_v6, 0.0  ;;  %v1359_v16 = vmul.f32 %v3479_v55, %v1254_v11 }
 0x182   : > { %2614 = vst [vmem:[%s3226_s10 + $0x158] sm:$0xff] %v2545_v10   ;;  %v1255_v17 = vmax.f32 %v1131_v12, 0.0 }
 0x183   : > { %v1310_v18 = vmul.f32 %v3479_v55, %v1205_v15  ;;  %v1464_v19 = vadd.f32 %v3490_v58, %v1359_v16  ;;  %v1414_v22 = vadd.f32 %v3490_v58, %v1309_v14 }
 0x184   : > { %v1360_v20 = vmul.f32 %v3479_v55, %v1255_v17  ;;  %v935_v21 = vpop.f32.mrb[80].mxu0  ;;  %v1135_v26 = vpop.f32.mrb[80].mxu1 }
 0x185   : > { %v1415_v23 = vadd.f32 %v3490_v58, %v1310_v18  ;;  %v936_v24 = vadd.f32 %v3471_v60, %v935_v21  ;;  %v2754_v25 = vpop.f32.mrb[81].mxu0  ;;  %v1136_v29 = vadd.f32 %v3471_v60, %v1135_v26  ;;  %v2854_v30 = vpop.f32.mrb[81].mxu1 }
 0x186   : > { %v1465_v27 = vadd.f32 %v3490_v58, %v1360_v20  ;;  %v938_v28 = vpop.f32.mrb[82].mxu0  ;;  %v1138_v35 = vpop.f32.mrb[82].mxu1 }
 0x187   : > { %v2425_v31 = vpack.c.bf16 %v1415_v23, %v1414_v22  ;;  %v1206_v32 = vmax.f32 %v936_v24, 0.0  ;;  %v939_v33 = vadd.f32 %v3471_v60, %v938_v28  ;;  %v2755_v34 = vpop.f32.mrb[83].mxu0  ;;  %v1256_v37 = vmax.f32 %v1136_v29, 0.0  ;;  %v2855_v39 = vpop.f32.mrb[83].mxu1 }
 0x188   : > { %v2550_v36 = vpack.c.bf16 %v1465_v27, %v1464_v19  ;;  %v1139_v38 = vadd.f32 %v3471_v60, %v1138_v35 }
 0x189   : > { %2590 = vst [vmem:[%s3226_s10 + $0x98] sm:$0xff] %v2425_v31   ;;  %v1311_v40 = vmul.f32 %v3479_v55, %v1206_v32  ;;  %v1207_v41 = vmax.f32 %v939_v33, 0.0  ;;  %v1361_v42 = vmul.f32 %v3479_v55, %v1256_v37 }
 0x18a   : > { %2615 = vst [vmem:[%s3226_s10 + $0x160] sm:$0xff] %v2550_v36   ;;  %v1257_v43 = vmax.f32 %v1139_v38, 0.0 }
 0x18b   : > { %v1312_v44 = vmul.f32 %v3479_v55, %v1207_v41  ;;  %v1466_v45 = vadd.f32 %v3490_v58, %v1361_v42  ;;  %v1416_v48 = vadd.f32 %v3490_v58, %v1311_v40 }
 0x18c   : > { %v1362_v46 = vmul.f32 %v3479_v55, %v1257_v43  ;;  %v943_v47 = vpop.f32.mrb[84].mxu0  ;;  %v1143_v52 = vpop.f32.mrb[84].mxu1 }
 0x18d   : > { %v1417_v49 = vadd.f32 %v3490_v58, %v1312_v44  ;;  %v944_v50 = vadd.f32 %v3471_v60, %v943_v47  ;;  %v2758_v51 = vpop.f32.mrb[85].mxu0  ;;  %v1144_v56 = vadd.f32 %v3471_v60, %v1143_v52  ;;  %v2858_v57 = vpop.f32.mrb[85].mxu1 }
 0x18e   : > { %v1467_v53 = vadd.f32 %v3490_v58, %v1362_v46  ;;  %v946_v54 = vpop.f32.mrb[86].mxu0  ;;  %v1146_v0 = vpop.f32.mrb[86].mxu1 }
 0x18f   : > { %v2430_v59 = vpack.c.bf16 %v1417_v49, %v1416_v48  ;;  %v1208_v61 = vmax.f32 %v944_v50, 0.0  ;;  %v947_v62 = vadd.f32 %v3471_v60, %v946_v54  ;;  %v2759_v63 = vpop.f32.mrb[87].mxu0  ;;  %v1258_v9 = vmax.f32 %v1144_v56, 0.0  ;;  %v2859_v3 = vpop.f32.mrb[87].mxu1 }
 0x190   : > { %v2555_v1 = vpack.c.bf16 %v1467_v53, %v1466_v45  ;;  %v1147_v2 = vadd.f32 %v3471_v60, %v1146_v0 }
 0x191   : > { %2591 = vst [vmem:[%s3226_s10 + $0xa0] sm:$0xff] %v2430_v59   ;;  %v1313_v4 = vmul.f32 %v3479_v55, %v1208_v61  ;;  %v1209_v5 = vmax.f32 %v947_v62, 0.0  ;;  %v1363_v6 = vmul.f32 %v3479_v55, %v1258_v9 }
 0x192   : > { %2616 = vst [vmem:[%s3226_s10 + $0x168] sm:$0xff] %v2555_v1   ;;  %v1259_v7 = vmax.f32 %v1147_v2, 0.0 }
 0x193   : > { %v1314_v8 = vmul.f32 %v3479_v55, %v1209_v5  ;;  %v1468_v10 = vadd.f32 %v3490_v58, %v1363_v6  ;;  %v1418_v13 = vadd.f32 %v3490_v58, %v1313_v4 }
 0x194   : > { %v1364_v11 = vmul.f32 %v3479_v55, %v1259_v7  ;;  %v951_v12 = vpop.f32.mrb[88].mxu0  ;;  %v1151_v17 = vpop.f32.mrb[88].mxu1 }
 0x195   : > { %v1419_v14 = vadd.f32 %v3490_v58, %v1314_v8  ;;  %v952_v15 = vadd.f32 %v3471_v60, %v951_v12  ;;  %v2762_v16 = vpop.f32.mrb[89].mxu0  ;;  %v1152_v20 = vadd.f32 %v3471_v60, %v1151_v17  ;;  %v2862_v21 = vpop.f32.mrb[89].mxu1 }
 0x196   : > { %v1469_v18 = vadd.f32 %v3490_v58, %v1364_v11  ;;  %v954_v19 = vpop.f32.mrb[90].mxu0  ;;  %v1154_v26 = vpop.f32.mrb[90].mxu1 }
 0x197   : > { %v2435_v22 = vpack.c.bf16 %v1419_v14, %v1418_v13  ;;  %v1210_v23 = vmax.f32 %v952_v15, 0.0  ;;  %v955_v24 = vadd.f32 %v3471_v60, %v954_v19  ;;  %v2763_v25 = vpop.f32.mrb[91].mxu0  ;;  %v1260_v28 = vmax.f32 %v1152_v20, 0.0  ;;  %v2863_v30 = vpop.f32.mrb[91].mxu1 }
 0x198   : > { %v2560_v27 = vpack.c.bf16 %v1469_v18, %v1468_v10  ;;  %v1155_v29 = vadd.f32 %v3471_v60, %v1154_v26 }
 0x199   : > { %2592 = vst [vmem:[%s3226_s10 + $0xa8] sm:$0xff] %v2435_v22   ;;  %v1315_v31 = vmul.f32 %v3479_v55, %v1210_v23  ;;  %v1211_v32 = vmax.f32 %v955_v24, 0.0  ;;  %v1365_v33 = vmul.f32 %v3479_v55, %v1260_v28 }
 0x19a   : > { %2617 = vst [vmem:[%s3226_s10 + $0x170] sm:$0xff] %v2560_v27   ;;  %v1261_v34 = vmax.f32 %v1155_v29, 0.0 }
 0x19b   : > { %v1316_v35 = vmul.f32 %v3479_v55, %v1211_v32  ;;  %v1470_v36 = vadd.f32 %v3490_v58, %v1365_v33  ;;  %v1420_v39 = vadd.f32 %v3490_v58, %v1315_v31 }
 0x19c   : > { %v1366_v37 = vmul.f32 %v3479_v55, %v1261_v34  ;;  %v959_v38 = vpop.f32.mrb[92].mxu0  ;;  %v1159_v43 = vpop.f32.mrb[92].mxu1 }
 0x19d   : > { %v1421_v40 = vadd.f32 %v3490_v58, %v1316_v35  ;;  %v960_v41 = vadd.f32 %v3471_v60, %v959_v38  ;;  %v2766_v42 = vpop.f32.mrb[93].mxu0  ;;  %v1160_v46 = vadd.f32 %v3471_v60, %v1159_v43  ;;  %v2866_v47 = vpop.f32.mrb[93].mxu1 }
 0x19e   : > { %v1471_v44 = vadd.f32 %v3490_v58, %v1366_v37  ;;  %v962_v45 = vpop.f32.mrb[94].mxu0  ;;  %v1162_v52 = vpop.f32.mrb[94].mxu1 }
 0x19f   : > { %v2440_v48 = vpack.c.bf16 %v1421_v40, %v1420_v39  ;;  %v1212_v49 = vmax.f32 %v960_v41, 0.0  ;;  %v963_v50 = vadd.f32 %v3471_v60, %v962_v45  ;;  %v2767_v51 = vpop.f32.mrb[95].mxu0  ;;  %v1262_v54 = vmax.f32 %v1160_v46, 0.0  ;;  %v2867_v57 = vpop.f32.mrb[95].mxu1 }
 0x1a0   : > { %v2565_v53 = vpack.c.bf16 %v1471_v44, %v1470_v36  ;;  %v1163_v56 = vadd.f32 %v3471_v60, %v1162_v52 }
 0x1a1   : > { %2593 = vst [vmem:[%s3226_s10 + $0xb0] sm:$0xff] %v2440_v48   ;;  %v1317_v59 = vmul.f32 %v3479_v55, %v1212_v49  ;;  %v1213_v61 = vmax.f32 %v963_v50, 0.0  ;;  %v1367_v62 = vmul.f32 %v3479_v55, %v1262_v54 }
 0x1a2   : > { %2618 = vst [vmem:[%s3226_s10 + $0x178] sm:$0xff] %v2565_v53   ;;  %v1263_v63 = vmax.f32 %v1163_v56, 0.0 }
 0x1a3   : > { %v1318_v0 = vmul.f32 %v3479_v55, %v1213_v61  ;;  %v1472_v1 = vadd.f32 %v3490_v58, %v1367_v62  ;;  %v1422_v3 = vadd.f32 %v3490_v58, %v1317_v59 }
 0x1a4   : > { %v1368_v9 = vmul.f32 %v3479_v55, %v1263_v63  ;;  %v967_v2 = vpop.f32.mrb[96].mxu0 }
 0x1a5   : > { %v1423_v4 = vadd.f32 %v3490_v58, %v1318_v0  ;;  %v968_v5 = vadd.f32 %v3471_v60, %v967_v2  ;;  %v2770_v6 = vpop.f32.mrb[97].mxu0 }
 0x1a6   : > { %v1473_v7 = vadd.f32 %v3490_v58, %v1368_v9  ;;  %v970_v8 = vpop.f32.mrb[98].mxu0 }
 0x1a7   : > { %v2445_v10 = vpack.c.bf16 %v1423_v4, %v1422_v3  ;;  %v1214_v11 = vmax.f32 %v968_v5, 0.0  ;;  %v971_v12 = vadd.f32 %v3471_v60, %v970_v8  ;;  %v2771_v13 = vpop.f32.mrb[99].mxu0 }
 0x1a8   : > { %v2570_v14 = vpack.c.bf16 %v1473_v7, %v1472_v1 }
 0x1a9   : > { %2594 = vst [vmem:[%s3226_s10 + $0xb8] sm:$0xff] %v2445_v10   ;;  %v1319_v15 = vmul.f32 %v3479_v55, %v1214_v11  ;;  %v1215_v16 = vmax.f32 %v971_v12, 0.0 }
 0x1aa   : > { %2619 = vst [vmem:[%s3226_s10 + $0x180] sm:$0xff] %v2570_v14  }
 0x1ab   : > { %v1320_v17 = vmul.f32 %v3479_v55, %v1215_v16  ;;  %v1424_v18 = vadd.f32 %v3490_v58, %v1319_v15 }
 0x1ad   : > { %v1425_v19 = vadd.f32 %v3490_v58, %v1320_v17 }
 0x1af   : > { %v2450_v20 = vpack.c.bf16 %v1425_v19, %v1424_v18 }
 0x1b1   : > { %2595 = vst [vmem:[%s3226_s10 + $0xc0] sm:$0xff] %v2450_v20  }
 0x1b2 PF: > { %s15_s18 = sadd.s32 1, %s2940_s18  }
 0x1b3   : > { %p12_p4 = scmp.ge.s32.totalorder %s15_s18, 4  }
 0x1b5   :  { %14 = sbr.rel (!%p12_p4) target bundleno = 1 (0x1), region = 70 }

// kernel: model3_forward.6
= control target key start
LH: loop header
LB: loop body
LE: loop exit
PB: predicated region body
PF: predicated region fallthrough
CT: control target
= control target key end

     0   :  { %s3027_s18 = smov 0   ;;  %s3649_s0 = inlined_call_operand.vmem [shape: bf16[1568,72], index: 0, kind: input, shape index: {}]   ;;  %s3650_s1 = inlined_call_operand.vmem [shape: bf16[72,128], index: 1, kind: input, shape index: {}]   ;;  %s3651_s2 = inlined_call_operand.vmem [shape: f32[1,128], index: 2, kind: input, shape index: {}]   ;;  %s3652_s3 = inlined_call_operand.vmem [shape: f32[1,128], index: 3, kind: input, shape index: {}]   ;;  %s3653_s4 = inlined_call_operand.vmem [shape: f32[1,128], index: 4, kind: input, shape index: {}]   ;;  %s3654_s5 = inlined_call_operand.vmem [shape: bf16[1568,128], index: 5, kind: output, shape index: {}]  }
   0x1 LB: > { %s2046_s19 = sadd.s32 4294967295, %s2993_s18   ;;  %p2050_p0 = scmp.ge.s32.totalorder %s2993_s18, 1  ;;  %s2993_s18 = sphi %s3027_s18, %s15_s18  }
   0x2   : > { %p188_p1 = scmp.lt.s32.totalorder %s2993_s18, 3 }
   0x4   : > { %p189_p2 = pnand %p2050_p0, %p188_p1 }
   0x5   : > { %v2930_v0 = vld [vmem:[%s3650_s1] sm:$0xff] (!%p189_p2)   ;;  %v2995_v1 = vmov (!%p189_p2), 0.0   ;;  %v2931_v2 = vld [vmem:[%s3650_s1 + $0x8] sm:$0xff] (!%p189_p2)   ;;  %s216_s24 = smul.u32 (!%p189_p2), 98, %s2046_s19  ;;  %vm2996_vm0 = vmmov (!%p189_p2), 0   ;;  %v2932_v3 = vld [vmem:[%s3650_s1 + $0x10] sm:$0xff] (!%p189_p2)  }
   0x6   : > { %192 = sbr.rel (%p189_p2) target bundleno = 443 (0x1bb), region = 40  ;;  %2704 = vmatprep.subr.bf16.mxu0 (!%p189_p2), %v2995_v1  ;;  %2910 = vmatprep.subr.bf16.mxu1 (!%p189_p2), %v2995_v1  ;;  %v2933_v4 = vld [vmem:[%s3650_s1 + $0x18] sm:$0xff] (!%p189_p2)   ;;  %v2934_v5 = vld [vmem:[%s3650_s1 + $0x20] ss:$0 sps:$4 sm:$0xff] (!%p189_p2)   ;;  %vm763_vm1 = vcmask (!%p189_p2), 1043456   ;;  %vm615_vm2 = vcmask (!%p189_p2), 588800  }
   0x7   : > { %2705 = vmatpush3.bf16.msra.mxu0 (!%p189_p2), %v2930_v0  ;;  %2915 = vmatpush3.bf16.msra.mxu1 (!%p189_p2), %v2930_v0  ;;  %p217_p3 = scmp.lt.s32.totalorder (!%p189_p2), %s216_s24, 195  ;;  %v765_v6 = vsel (!%p189_p2), %vm763_vm1, %v2934_v5, 0  ;;  %v3269_v56 = vld [vmem:[%s3651_s2] ss:$0 sm:$0xff] (!%p189_p2) }
   0x8   : > { %2706 = vmatprep.subr.bf16.mxu0 (!%p189_p2), %v2995_v1  ;;  %2911 = vmatprep.subr.bf16.mxu1 (!%p189_p2), %v2995_v1  ;;  %v3276_v63 = vld [vmem:[%s3652_s3] ss:$0 sm:$0xff] (!%p189_p2) }
   0x9   : > { %2714 = vmatprep.mubr.msk.bf16.mxu0 (!%p189_p2), %vm2996_vm0, %v2995_v1  ;;  %2814 = vmatprep.mubr.msk.bf16.mxu1 (!%p189_p2), %vm2996_vm0, %v2995_v1 }
   0xb   : > { %2707 = vmatpush3.bf16.msra.mxu0 (!%p189_p2), %v2931_v2  ;;  %2916 = vmatpush3.bf16.msra.mxu1 (!%p189_p2), %v2931_v2 }
   0xc   : > { %2708 = vmatprep.subr.bf16.mxu0 (!%p189_p2), %v2995_v1  ;;  %2912 = vmatprep.subr.bf16.mxu1 (!%p189_p2), %v2995_v1 }
   0xd   : > { %s3656_s24 = smov (!%p217_p3, %s216_s24), 195 }
   0xe   : > { %s2051_s27 = sshll.u32 %s3656_s24, 2 }
   0xf   : > { %2709 = vmatpush3.bf16.msra.mxu0 %v2932_v3  ;;  %2917 = vmatpush3.bf16.msra.mxu1 %v2932_v3  ;;  %s3065_s7 = scalar_lea.vmem %s3649_s0, %s2051_s27  ;;  %s3300_s19 = scalar_lea.vmem %s3654_s5, %s2051_s27 }
  0x10   : > { %2710 = vmatprep.subr.bf16.mxu0 %v2995_v1  ;;  %2913 = vmatprep.subr.bf16.mxu1 %v2995_v1  ;;  %v2935_v7 = vld [vmem:[%s3065_s7] sm:$0xff]   ;;  %v2936_v8 = vld [vmem:[%s3065_s7 + $0xc8] sm:$0xff]   ;;  %v2938_v10 = vld [vmem:[%s3065_s7 + $0xd0] sm:$0xff]  }
  0x11   : > { %v2937_v9 = vld [vmem:[%s3065_s7 + $0x8] sm:$0xff]   ;;  %v2939_v11 = vld [vmem:[%s3065_s7 + $0x10] sm:$0xff]   ;;  %v2940_v12 = vld [vmem:[%s3065_s7 + $0xd8] sm:$0xff]  }
  0x12   : > { %v2941_v13 = vld [vmem:[%s3065_s7 + $0x18] sm:$0xff]   ;;  %v2942_v14 = vld [vmem:[%s3065_s7 + $0xe0] sm:$0xff]   ;;  %v2944_v16 = vld [vmem:[%s3065_s7 + $0xe8] sm:$0xff]  }
  0x13   : > { %2711 = vmatpush3.bf16.msra.mxu0 %v2933_v4  ;;  %2918 = vmatpush3.bf16.msra.mxu1 %v2933_v4  ;;  %v2943_v15 = vld [vmem:[%s3065_s7 + $0x20] sm:$0xff]   ;;  %v2945_v17 = vld [vmem:[%s3065_s7 + $0x28] sm:$0xff]   ;;  %v2946_v18 = vld [vmem:[%s3065_s7 + $0xf0] sm:$0xff]  }
  0x14   : > { %2712 = vmatprep.subr.bf16.mxu0 %v2995_v1  ;;  %2914 = vmatprep.subr.bf16.mxu1 %v2995_v1  ;;  %v2947_v19 = vld [vmem:[%s3065_s7 + $0x30] sm:$0xff]   ;;  %v2948_v20 = vld [vmem:[%s3065_s7 + $0xf8] sm:$0xff]   ;;  %v2950_v22 = vld [vmem:[%s3065_s7 + $0x100] sm:$0xff]  }
  0x15   : > { %v2949_v21 = vld [vmem:[%s3065_s7 + $0x38] sm:$0xff]   ;;  %v2951_v23 = vld [vmem:[%s3065_s7 + $0x40] sm:$0xff]   ;;  %v2952_v24 = vld [vmem:[%s3065_s7 + $0x108] sm:$0xff]  }
  0x16   : > { %v2953_v25 = vld [vmem:[%s3065_s7 + $0x48] sm:$0xff]   ;;  %v2954_v26 = vld [vmem:[%s3065_s7 + $0x110] sm:$0xff]   ;;  %v2956_v28 = vld [vmem:[%s3065_s7 + $0x118] sm:$0xff]  }
  0x17   : > { %2713 = vmatpush3.bf16.msra.mxu0 %v765_v6  ;;  %2919 = vmatpush3.bf16.msra.mxu1 %v765_v6  ;;  %v2955_v27 = vld [vmem:[%s3065_s7 + $0x50] sm:$0xff]   ;;  %v2957_v29 = vld [vmem:[%s3065_s7 + $0x58] sm:$0xff]   ;;  %v2958_v30 = vld [vmem:[%s3065_s7 + $0x120] sm:$0xff]  }
  0x18   : > { %v2959_v31 = vld [vmem:[%s3065_s7 + $0x60] sm:$0xff]   ;;  %v2960_v32 = vld [vmem:[%s3065_s7 + $0x128] sm:$0xff]   ;;  %v2962_v34 = vld [vmem:[%s3065_s7 + $0x130] sm:$0xff]  }
  0x19   : > { %v2961_v33 = vld [vmem:[%s3065_s7 + $0x68] sm:$0xff]   ;;  %v2963_v35 = vld [vmem:[%s3065_s7 + $0x70] sm:$0xff]   ;;  %v2964_v36 = vld [vmem:[%s3065_s7 + $0x138] sm:$0xff]  }
  0x1a   : > { %2715 = vmatmul.mubr.msk.bf16.vlgmr.msra.gmra.mrb[0].mxu0 %vm615_vm2, %v2935_v7  ;;  %2815 = vmatmul.mubr.msk.bf16.vlgmr.msra.gmra.mrb[0].mxu1 %vm615_vm2, %v2936_v8  ;;  %v2965_v37 = vld [vmem:[%s3065_s7 + $0x78] sm:$0xff]   ;;  %v2966_v38 = vld [vmem:[%s3065_s7 + $0x140] sm:$0xff]   ;;  %v2968_v40 = vld [vmem:[%s3065_s7 + $0x148] sm:$0xff]  }
  0x1b   : > { %2718 = vmatprep.mubr.msk.bf16.mxu0 %vm2996_vm0, %v2995_v1  ;;  %2818 = vmatprep.mubr.msk.bf16.mxu1 %vm2996_vm0, %v2995_v1  ;;  %v2967_v39 = vld [vmem:[%s3065_s7 + $0x80] sm:$0xff]   ;;  %v2969_v41 = vld [vmem:[%s3065_s7 + $0x88] sm:$0xff]   ;;  %v2970_v42 = vld [vmem:[%s3065_s7 + $0x150] sm:$0xff]  }
  0x1c   : > { %v2971_v43 = vld [vmem:[%s3065_s7 + $0x90] sm:$0xff]   ;;  %v2972_v44 = vld [vmem:[%s3065_s7 + $0x158] sm:$0xff]   ;;  %v2974_v46 = vld [vmem:[%s3065_s7 + $0x160] sm:$0xff]  }
  0x1d   : > { %v2973_v45 = vld [vmem:[%s3065_s7 + $0x98] sm:$0xff]   ;;  %v2975_v47 = vld [vmem:[%s3065_s7 + $0xa0] sm:$0xff]   ;;  %v2976_v48 = vld [vmem:[%s3065_s7 + $0x168] sm:$0xff]  }
  0x1e   : > { %v2977_v49 = vld [vmem:[%s3065_s7 + $0xa8] sm:$0xff]   ;;  %v2978_v50 = vld [vmem:[%s3065_s7 + $0x170] sm:$0xff]   ;;  %v2980_v52 = vld [vmem:[%s3065_s7 + $0x178] sm:$0xff]  }
  0x1f   : > { %v2979_v51 = vld [vmem:[%s3065_s7 + $0xb0] sm:$0xff]   ;;  %v2981_v53 = vld [vmem:[%s3065_s7 + $0xb8] sm:$0xff]   ;;  %v2982_v54 = vld [vmem:[%s3065_s7 + $0x180] sm:$0xff]  }
  0x20   : > { %v2983_v55 = vld [vmem:[%s3065_s7 + $0xc0] sm:$0xff]  }
  0x22   : > { %2719 = vmatmul.mubr.msk.bf16.gmra.mrb[4].mxu0 %vm615_vm2, %v2937_v9  ;;  %2819 = vmatmul.mubr.msk.bf16.gmra.mrb[4].mxu1 %vm615_vm2, %v2938_v10  ;;  %v3284_v9 = vld [vmem:[%s3653_s4] ss:$0 sm:$0xff] }
  0x23   : > { %2722 = vmatprep.mubr.msk.bf16.mxu0 %vm2996_vm0, %v2995_v1  ;;  %2822 = vmatprep.mubr.msk.bf16.mxu1 %vm2996_vm0, %v2995_v1 }
  0x2a   : > { %2723 = vmatmul.mubr.msk.bf16.gmra.mrb[8].mxu0 %vm615_vm2, %v2939_v11  ;;  %2823 = vmatmul.mubr.msk.bf16.gmra.mrb[8].mxu1 %vm615_vm2, %v2940_v12 }
  0x2b   : > { %2726 = vmatprep.mubr.msk.bf16.mxu0 %vm2996_vm0, %v2995_v1  ;;  %2826 = vmatprep.mubr.msk.bf16.mxu1 %vm2996_vm0, %v2995_v1 }
  0x32   : > { %2727 = vmatmul.mubr.msk.bf16.gmra.mrb[12].mxu0 %vm615_vm2, %v2941_v13  ;;  %2827 = vmatmul.mubr.msk.bf16.gmra.mrb[12].mxu1 %vm615_vm2, %v2942_v14 }
  0x33   : > { %2730 = vmatprep.mubr.msk.bf16.mxu0 %vm2996_vm0, %v2995_v1  ;;  %2830 = vmatprep.mubr.msk.bf16.mxu1 %vm2996_vm0, %v2995_v1 }
  0x3a   : > { %2731 = vmatmul.mubr.msk.bf16.gmra.mrb[16].mxu0 %vm615_vm2, %v2943_v15  ;;  %2831 = vmatmul.mubr.msk.bf16.gmra.mrb[16].mxu1 %vm615_vm2, %v2944_v16 }
  0x3b   : > { %2734 = vmatprep.mubr.msk.bf16.mxu0 %vm2996_vm0, %v2995_v1  ;;  %2834 = vmatprep.mubr.msk.bf16.mxu1 %vm2996_vm0, %v2995_v1 }
  0x42   : > { %2735 = vmatmul.mubr.msk.bf16.gmra.mrb[20].mxu0 %vm615_vm2, %v2945_v17  ;;  %2835 = vmatmul.mubr.msk.bf16.gmra.mrb[20].mxu1 %vm615_vm2, %v2946_v18 }
  0x43   : > { %2738 = vmatprep.mubr.msk.bf16.mxu0 %vm2996_vm0, %v2995_v1  ;;  %2838 = vmatprep.mubr.msk.bf16.mxu1 %vm2996_vm0, %v2995_v1 }
  0x4a   : > { %2739 = vmatmul.mubr.msk.bf16.gmra.mrb[24].mxu0 %vm615_vm2, %v2947_v19  ;;  %2839 = vmatmul.mubr.msk.bf16.gmra.mrb[24].mxu1 %vm615_vm2, %v2948_v20 }
  0x4b   : > { %2742 = vmatprep.mubr.msk.bf16.mxu0 %vm2996_vm0, %v2995_v1  ;;  %2842 = vmatprep.mubr.msk.bf16.mxu1 %vm2996_vm0, %v2995_v1 }
  0x52   : > { %2743 = vmatmul.mubr.msk.bf16.gmra.mrb[28].mxu0 %vm615_vm2, %v2949_v21  ;;  %2843 = vmatmul.mubr.msk.bf16.gmra.mrb[28].mxu1 %vm615_vm2, %v2950_v22 }
  0x53   : > { %2746 = vmatprep.mubr.msk.bf16.mxu0 %vm2996_vm0, %v2995_v1  ;;  %2846 = vmatprep.mubr.msk.bf16.mxu1 %vm2996_vm0, %v2995_v1 }
  0x5a   : > { %2747 = vmatmul.mubr.msk.bf16.gmra.mrb[32].mxu0 %vm615_vm2, %v2951_v23  ;;  %2847 = vmatmul.mubr.msk.bf16.gmra.mrb[32].mxu1 %vm615_vm2, %v2952_v24 }
  0x5b   : > { %2750 = vmatprep.mubr.msk.bf16.mxu0 %vm2996_vm0, %v2995_v1  ;;  %2850 = vmatprep.mubr.msk.bf16.mxu1 %vm2996_vm0, %v2995_v1 }
  0x62   : > { %2751 = vmatmul.mubr.msk.bf16.gmra.mrb[36].mxu0 %vm615_vm2, %v2953_v25  ;;  %2851 = vmatmul.mubr.msk.bf16.gmra.mrb[36].mxu1 %vm615_vm2, %v2954_v26 }
  0x63   : > { %2754 = vmatprep.mubr.msk.bf16.mxu0 %vm2996_vm0, %v2995_v1  ;;  %2854 = vmatprep.mubr.msk.bf16.mxu1 %vm2996_vm0, %v2995_v1 }
  0x6a   : > { %2755 = vmatmul.mubr.msk.bf16.gmra.mrb[40].mxu0 %vm615_vm2, %v2955_v27  ;;  %2855 = vmatmul.mubr.msk.bf16.gmra.mrb[40].mxu1 %vm615_vm2, %v2956_v28 }
  0x6b   : > { %2758 = vmatprep.mubr.msk.bf16.mxu0 %vm2996_vm0, %v2995_v1  ;;  %2858 = vmatprep.mubr.msk.bf16.mxu1 %vm2996_vm0, %v2995_v1 }
  0x72   : > { %2759 = vmatmul.mubr.msk.bf16.gmra.mrb[44].mxu0 %vm615_vm2, %v2957_v29  ;;  %2859 = vmatmul.mubr.msk.bf16.gmra.mrb[44].mxu1 %vm615_vm2, %v2958_v30 }
  0x73   : > { %2762 = vmatprep.mubr.msk.bf16.mxu0 %vm2996_vm0, %v2995_v1  ;;  %2862 = vmatprep.mubr.msk.bf16.mxu1 %vm2996_vm0, %v2995_v1 }
  0x7a   : > { %2763 = vmatmul.mubr.msk.bf16.gmra.mrb[48].mxu0 %vm615_vm2, %v2959_v31  ;;  %2863 = vmatmul.mubr.msk.bf16.gmra.mrb[48].mxu1 %vm615_vm2, %v2960_v32 }
  0x7b   : > { %2766 = vmatprep.mubr.msk.bf16.mxu0 %vm2996_vm0, %v2995_v1  ;;  %2866 = vmatprep.mubr.msk.bf16.mxu1 %vm2996_vm0, %v2995_v1 }
  0x82   : > { %2767 = vmatmul.mubr.msk.bf16.gmra.mrb[52].mxu0 %vm615_vm2, %v2961_v33  ;;  %2867 = vmatmul.mubr.msk.bf16.gmra.mrb[52].mxu1 %vm615_vm2, %v2962_v34 }
  0x83   : > { %2770 = vmatprep.mubr.msk.bf16.mxu0 %vm2996_vm0, %v2995_v1  ;;  %2870 = vmatprep.mubr.msk.bf16.mxu1 %vm2996_vm0, %v2995_v1 }
  0x8a   : > { %2771 = vmatmul.mubr.msk.bf16.gmra.mrb[56].mxu0 %vm615_vm2, %v2963_v35  ;;  %2871 = vmatmul.mubr.msk.bf16.gmra.mrb[56].mxu1 %vm615_vm2, %v2964_v36 }
  0x8b   : > { %2774 = vmatprep.mubr.msk.bf16.mxu0 %vm2996_vm0, %v2995_v1  ;;  %2874 = vmatprep.mubr.msk.bf16.mxu1 %vm2996_vm0, %v2995_v1 }
  0x92   : > { %2775 = vmatmul.mubr.msk.bf16.gmra.mrb[60].mxu0 %vm615_vm2, %v2965_v37  ;;  %2875 = vmatmul.mubr.msk.bf16.gmra.mrb[60].mxu1 %vm615_vm2, %v2966_v38 }
  0x93   : > { %2778 = vmatprep.mubr.msk.bf16.mxu0 %vm2996_vm0, %v2995_v1  ;;  %2878 = vmatprep.mubr.msk.bf16.mxu1 %vm2996_vm0, %v2995_v1 }
  0x9a   : > { %2779 = vmatmul.mubr.msk.bf16.gmra.mrb[64].mxu0 %vm615_vm2, %v2967_v39  ;;  %2879 = vmatmul.mubr.msk.bf16.gmra.mrb[64].mxu1 %vm615_vm2, %v2968_v40 }
  0x9b   : > { %2782 = vmatprep.mubr.msk.bf16.mxu0 %vm2996_vm0, %v2995_v1  ;;  %2882 = vmatprep.mubr.msk.bf16.mxu1 %vm2996_vm0, %v2995_v1 }
  0xa2   : > { %2783 = vmatmul.mubr.msk.bf16.gmra.mrb[68].mxu0 %vm615_vm2, %v2969_v41  ;;  %2883 = vmatmul.mubr.msk.bf16.gmra.mrb[68].mxu1 %vm615_vm2, %v2970_v42 }
  0xa3   : > { %2786 = vmatprep.mubr.msk.bf16.mxu0 %vm2996_vm0, %v2995_v1  ;;  %2886 = vmatprep.mubr.msk.bf16.mxu1 %vm2996_vm0, %v2995_v1 }
  0xaa   : > { %2787 = vmatmul.mubr.msk.bf16.gmra.mrb[72].mxu0 %vm615_vm2, %v2971_v43  ;;  %2887 = vmatmul.mubr.msk.bf16.gmra.mrb[72].mxu1 %vm615_vm2, %v2972_v44 }
  0xab   : > { %2790 = vmatprep.mubr.msk.bf16.mxu0 %vm2996_vm0, %v2995_v1  ;;  %2890 = vmatprep.mubr.msk.bf16.mxu1 %vm2996_vm0, %v2995_v1 }
  0xb2   : > { %2791 = vmatmul.mubr.msk.bf16.gmra.mrb[76].mxu0 %vm615_vm2, %v2973_v45  ;;  %2891 = vmatmul.mubr.msk.bf16.gmra.mrb[76].mxu1 %vm615_vm2, %v2974_v46 }
  0xb3   : > { %2794 = vmatprep.mubr.msk.bf16.mxu0 %vm2996_vm0, %v2995_v1  ;;  %2894 = vmatprep.mubr.msk.bf16.mxu1 %vm2996_vm0, %v2995_v1 }
  0xba   : > { %2795 = vmatmul.mubr.msk.bf16.gmra.mrb[80].mxu0 %vm615_vm2, %v2975_v47  ;;  %2895 = vmatmul.mubr.msk.bf16.gmra.mrb[80].mxu1 %vm615_vm2, %v2976_v48 }
  0xbb   : > { %2798 = vmatprep.mubr.msk.bf16.mxu0 %vm2996_vm0, %v2995_v1  ;;  %2898 = vmatprep.mubr.msk.bf16.mxu1 %vm2996_vm0, %v2995_v1 }
  0xc2   : > { %2799 = vmatmul.mubr.msk.bf16.gmra.mrb[84].mxu0 %vm615_vm2, %v2977_v49  ;;  %2899 = vmatmul.mubr.msk.bf16.gmra.mrb[84].mxu1 %vm615_vm2, %v2978_v50 }
  0xc3   : > { %2802 = vmatprep.mubr.msk.bf16.mxu0 %vm2996_vm0, %v2995_v1  ;;  %2902 = vmatprep.mubr.msk.bf16.mxu1 %vm2996_vm0, %v2995_v1 }
  0xca   : > { %2803 = vmatmul.mubr.msk.bf16.gmra.mrb[88].mxu0 %vm615_vm2, %v2979_v51  ;;  %2903 = vmatmul.mubr.msk.bf16.gmra.mrb[88].mxu1 %vm615_vm2, %v2980_v52 }
  0xcb   : > { %2806 = vmatprep.mubr.msk.bf16.mxu0 %vm2996_vm0, %v2995_v1  ;;  %2906 = vmatprep.mubr.msk.bf16.mxu1 %vm2996_vm0, %v2995_v1 }
  0xd2   : > { %2807 = vmatmul.mubr.msk.bf16.gmra.mrb[92].mxu0 %vm615_vm2, %v2981_v53  ;;  %2907 = vmatmul.mubr.msk.bf16.gmra.mrb[92].mxu1 %vm615_vm2, %v2982_v54 }
  0xd3   : > { %2810 = vmatprep.mubr.msk.bf16.mxu0 %vm2996_vm0, %v2995_v1 }
  0xda   : > { %2811 = vmatmul.mubr.msk.bf16.gmra.mrb[96].mxu0 %vm615_vm2, %v2983_v55 }
  0xed   : > { %v801_v57 = vpop.f32.mrb[0].mxu0  ;;  %v1001_v58 = vpop.f32.mrb[0].mxu1 }
  0xee   : > { %v802_v59 = vadd.f32 %v3269_v56, %v801_v57  ;;  %v2716_v60 = vpop.f32.mrb[1].mxu0  ;;  %v1002_v61 = vadd.f32 %v3269_v56, %v1001_v58  ;;  %v2816_v62 = vpop.f32.mrb[1].mxu1 }
  0xef   : > { %v804_v0 = vpop.f32.mrb[2].mxu0  ;;  %v1004_v1 = vpop.f32.mrb[2].mxu1 }
  0xf0   : > { %v1192_v2 = vmax.f32 %v802_v59, 0.0  ;;  %v805_v3 = vadd.f32 %v3269_v56, %v804_v0  ;;  %v2717_v4 = vpop.f32.mrb[3].mxu0  ;;  %v1242_v5 = vmax.f32 %v1002_v61, 0.0  ;;  %v1005_v6 = vadd.f32 %v3269_v56, %v1004_v1  ;;  %v2817_v7 = vpop.f32.mrb[3].mxu1 }
  0xf2   : > { %v1297_v8 = vmul.f32 %v3276_v63, %v1192_v2  ;;  %v1193_v10 = vmax.f32 %v805_v3, 0.0  ;;  %v1347_v11 = vmul.f32 %v3276_v63, %v1242_v5  ;;  %v1243_v12 = vmax.f32 %v1005_v6, 0.0 }
  0xf4   : > { %v1298_v13 = vmul.f32 %v3276_v63, %v1193_v10  ;;  %v1452_v14 = vadd.f32 %v3284_v9, %v1347_v11  ;;  %v1348_v15 = vmul.f32 %v3276_v63, %v1243_v12  ;;  %v1402_v16 = vadd.f32 %v3284_v9, %v1297_v8 }
  0xf5   : > { %v809_v17 = vpop.f32.mrb[4].mxu0  ;;  %v1009_v18 = vpop.f32.mrb[4].mxu1 }
  0xf6   : > { %v1403_v19 = vadd.f32 %v3284_v9, %v1298_v13  ;;  %v1453_v20 = vadd.f32 %v3284_v9, %v1348_v15  ;;  %v810_v21 = vadd.f32 %v3269_v56, %v809_v17  ;;  %v2720_v22 = vpop.f32.mrb[5].mxu0  ;;  %v1010_v23 = vadd.f32 %v3269_v56, %v1009_v18  ;;  %v2820_v24 = vpop.f32.mrb[5].mxu1 }
  0xf7   : > { %v812_v25 = vpop.f32.mrb[6].mxu0  ;;  %v1012_v26 = vpop.f32.mrb[6].mxu1 }
  0xf8   : > { %v2360_v27 = vpack.c.bf16 %v1403_v19, %v1402_v16  ;;  %v2485_v28 = vpack.c.bf16 %v1453_v20, %v1452_v14  ;;  %v1194_v29 = vmax.f32 %v810_v21, 0.0  ;;  %v813_v30 = vadd.f32 %v3269_v56, %v812_v25  ;;  %v2721_v31 = vpop.f32.mrb[7].mxu0  ;;  %v2821_v32 = vpop.f32.mrb[7].mxu1 }
  0xf9   : > { %v1244_v33 = vmax.f32 %v1010_v23, 0.0  ;;  %v1013_v34 = vadd.f32 %v3269_v56, %v1012_v26 }
  0xfa   : > { %2361 = vst [vmem:[%s3300_s19] sm:$0xff] %v2360_v27   ;;  %2626 = vst [vmem:[%s3300_s19 + $0xc8] sm:$0xff] %v2485_v28   ;;  %v1299_v35 = vmul.f32 %v3276_v63, %v1194_v29  ;;  %v1195_v36 = vmax.f32 %v813_v30, 0.0 }
  0xfb   : > { %v1349_v37 = vmul.f32 %v3276_v63, %v1244_v33  ;;  %v1245_v38 = vmax.f32 %v1013_v34, 0.0 }
  0xfc   : > { %v1300_v39 = vmul.f32 %v3276_v63, %v1195_v36  ;;  %v1404_v44 = vadd.f32 %v3284_v9, %v1299_v35 }
  0xfd   : > { %v1454_v40 = vadd.f32 %v3284_v9, %v1349_v37  ;;  %v1350_v41 = vmul.f32 %v3276_v63, %v1245_v38  ;;  %v817_v42 = vpop.f32.mrb[8].mxu0  ;;  %v1017_v43 = vpop.f32.mrb[8].mxu1 }
  0xfe   : > { %v1405_v45 = vadd.f32 %v3284_v9, %v1300_v39  ;;  %v818_v46 = vadd.f32 %v3269_v56, %v817_v42  ;;  %v2724_v47 = vpop.f32.mrb[9].mxu0  ;;  %v1018_v48 = vadd.f32 %v3269_v56, %v1017_v43  ;;  %v2824_v49 = vpop.f32.mrb[9].mxu1 }
  0xff   : > { %v1455_v50 = vadd.f32 %v3284_v9, %v1350_v41  ;;  %v820_v51 = vpop.f32.mrb[10].mxu0  ;;  %v1020_v52 = vpop.f32.mrb[10].mxu1 }
 0x100   : > { %v2365_v53 = vpack.c.bf16 %v1405_v45, %v1404_v44  ;;  %v1196_v54 = vmax.f32 %v818_v46, 0.0  ;;  %v821_v55 = vadd.f32 %v3269_v56, %v820_v51  ;;  %v2725_v57 = vpop.f32.mrb[11].mxu0  ;;  %v1246_v58 = vmax.f32 %v1018_v48, 0.0  ;;  %v2825_v59 = vpop.f32.mrb[11].mxu1 }
 0x101   : > { %v2490_v60 = vpack.c.bf16 %v1455_v50, %v1454_v40  ;;  %v1021_v61 = vadd.f32 %v3269_v56, %v1020_v52 }
 0x102   : > { %2602 = vst [vmem:[%s3300_s19 + $0x8] sm:$0xff] %v2365_v53   ;;  %v1301_v62 = vmul.f32 %v3276_v63, %v1196_v54  ;;  %v1197_v0 = vmax.f32 %v821_v55, 0.0  ;;  %v1351_v1 = vmul.f32 %v3276_v63, %v1246_v58 }
 0x103   : > { %2627 = vst [vmem:[%s3300_s19 + $0xd0] sm:$0xff] %v2490_v60   ;;  %v1247_v2 = vmax.f32 %v1021_v61, 0.0 }
 0x104   : > { %v1302_v3 = vmul.f32 %v3276_v63, %v1197_v0  ;;  %v1456_v4 = vadd.f32 %v3284_v9, %v1351_v1  ;;  %v1406_v8 = vadd.f32 %v3284_v9, %v1301_v62 }
 0x105   : > { %v1352_v5 = vmul.f32 %v3276_v63, %v1247_v2  ;;  %v825_v6 = vpop.f32.mrb[12].mxu0  ;;  %v1025_v7 = vpop.f32.mrb[12].mxu1 }
 0x106   : > { %v1407_v10 = vadd.f32 %v3284_v9, %v1302_v3  ;;  %v826_v11 = vadd.f32 %v3269_v56, %v825_v6  ;;  %v2728_v12 = vpop.f32.mrb[13].mxu0  ;;  %v1026_v13 = vadd.f32 %v3269_v56, %v1025_v7  ;;  %v2828_v14 = vpop.f32.mrb[13].mxu1 }
 0x107   : > { %v1457_v15 = vadd.f32 %v3284_v9, %v1352_v5  ;;  %v828_v16 = vpop.f32.mrb[14].mxu0  ;;  %v1028_v17 = vpop.f32.mrb[14].mxu1 }
 0x108   : > { %v2370_v18 = vpack.c.bf16 %v1407_v10, %v1406_v8  ;;  %v1198_v19 = vmax.f32 %v826_v11, 0.0  ;;  %v829_v20 = vadd.f32 %v3269_v56, %v828_v16  ;;  %v2729_v21 = vpop.f32.mrb[15].mxu0  ;;  %v1248_v22 = vmax.f32 %v1026_v13, 0.0  ;;  %v2829_v23 = vpop.f32.mrb[15].mxu1 }
 0x109   : > { %v2495_v24 = vpack.c.bf16 %v1457_v15, %v1456_v4  ;;  %v1029_v25 = vadd.f32 %v3269_v56, %v1028_v17 }
 0x10a   : > { %2603 = vst [vmem:[%s3300_s19 + $0x10] sm:$0xff] %v2370_v18   ;;  %v1303_v26 = vmul.f32 %v3276_v63, %v1198_v19  ;;  %v1199_v27 = vmax.f32 %v829_v20, 0.0  ;;  %v1353_v28 = vmul.f32 %v3276_v63, %v1248_v22 }
 0x10b   : > { %2628 = vst [vmem:[%s3300_s19 + $0xd8] sm:$0xff] %v2495_v24   ;;  %v1249_v29 = vmax.f32 %v1029_v25, 0.0 }
 0x10c   : > { %v1304_v30 = vmul.f32 %v3276_v63, %v1199_v27  ;;  %v1458_v31 = vadd.f32 %v3284_v9, %v1353_v28  ;;  %v1408_v35 = vadd.f32 %v3284_v9, %v1303_v26 }
 0x10d   : > { %v1354_v32 = vmul.f32 %v3276_v63, %v1249_v29  ;;  %v833_v33 = vpop.f32.mrb[16].mxu0  ;;  %v1033_v34 = vpop.f32.mrb[16].mxu1 }
 0x10e   : > { %v1409_v36 = vadd.f32 %v3284_v9, %v1304_v30  ;;  %v834_v37 = vadd.f32 %v3269_v56, %v833_v33  ;;  %v2732_v38 = vpop.f32.mrb[17].mxu0  ;;  %v1034_v39 = vadd.f32 %v3269_v56, %v1033_v34  ;;  %v2832_v40 = vpop.f32.mrb[17].mxu1 }
 0x10f   : > { %v1459_v41 = vadd.f32 %v3284_v9, %v1354_v32  ;;  %v836_v42 = vpop.f32.mrb[18].mxu0  ;;  %v1036_v43 = vpop.f32.mrb[18].mxu1 }
 0x110   : > { %v2375_v44 = vpack.c.bf16 %v1409_v36, %v1408_v35  ;;  %v1200_v45 = vmax.f32 %v834_v37, 0.0  ;;  %v837_v46 = vadd.f32 %v3269_v56, %v836_v42  ;;  %v2733_v47 = vpop.f32.mrb[19].mxu0  ;;  %v1250_v48 = vmax.f32 %v1034_v39, 0.0  ;;  %v2833_v49 = vpop.f32.mrb[19].mxu1 }
 0x111   : > { %v2500_v50 = vpack.c.bf16 %v1459_v41, %v1458_v31  ;;  %v1037_v51 = vadd.f32 %v3269_v56, %v1036_v43 }
 0x112   : > { %2604 = vst [vmem:[%s3300_s19 + $0x18] sm:$0xff] %v2375_v44   ;;  %v1305_v52 = vmul.f32 %v3276_v63, %v1200_v45  ;;  %v1201_v53 = vmax.f32 %v837_v46, 0.0  ;;  %v1355_v54 = vmul.f32 %v3276_v63, %v1250_v48 }
 0x113   : > { %2629 = vst [vmem:[%s3300_s19 + $0xe0] sm:$0xff] %v2500_v50   ;;  %v1251_v55 = vmax.f32 %v1037_v51, 0.0 }
 0x114   : > { %v1306_v57 = vmul.f32 %v3276_v63, %v1201_v53  ;;  %v1460_v58 = vadd.f32 %v3284_v9, %v1355_v54  ;;  %v1410_v62 = vadd.f32 %v3284_v9, %v1305_v52 }
 0x115   : > { %v1356_v59 = vmul.f32 %v3276_v63, %v1251_v55  ;;  %v841_v60 = vpop.f32.mrb[20].mxu0  ;;  %v1041_v61 = vpop.f32.mrb[20].mxu1 }
 0x116   : > { %v1411_v0 = vadd.f32 %v3284_v9, %v1306_v57  ;;  %v842_v1 = vadd.f32 %v3269_v56, %v841_v60  ;;  %v2736_v2 = vpop.f32.mrb[21].mxu0  ;;  %v1042_v3 = vadd.f32 %v3269_v56, %v1041_v61  ;;  %v2836_v4 = vpop.f32.mrb[21].mxu1 }
 0x117   : > { %v1461_v5 = vadd.f32 %v3284_v9, %v1356_v59  ;;  %v844_v6 = vpop.f32.mrb[22].mxu0  ;;  %v1044_v7 = vpop.f32.mrb[22].mxu1 }
 0x118   : > { %v2380_v8 = vpack.c.bf16 %v1411_v0, %v1410_v62  ;;  %v1202_v10 = vmax.f32 %v842_v1, 0.0  ;;  %v845_v11 = vadd.f32 %v3269_v56, %v844_v6  ;;  %v2737_v12 = vpop.f32.mrb[23].mxu0  ;;  %v1252_v13 = vmax.f32 %v1042_v3, 0.0  ;;  %v2837_v14 = vpop.f32.mrb[23].mxu1 }
 0x119   : > { %v2505_v15 = vpack.c.bf16 %v1461_v5, %v1460_v58  ;;  %v1045_v16 = vadd.f32 %v3269_v56, %v1044_v7 }
 0x11a   : > { %2605 = vst [vmem:[%s3300_s19 + $0x20] sm:$0xff] %v2380_v8   ;;  %v1307_v17 = vmul.f32 %v3276_v63, %v1202_v10  ;;  %v1203_v18 = vmax.f32 %v845_v11, 0.0  ;;  %v1357_v19 = vmul.f32 %v3276_v63, %v1252_v13 }
 0x11b   : > { %2630 = vst [vmem:[%s3300_s19 + $0xe8] sm:$0xff] %v2505_v15   ;;  %v1253_v20 = vmax.f32 %v1045_v16, 0.0 }
 0x11c   : > { %v1308_v21 = vmul.f32 %v3276_v63, %v1203_v18  ;;  %v1462_v22 = vadd.f32 %v3284_v9, %v1357_v19  ;;  %v1412_v26 = vadd.f32 %v3284_v9, %v1307_v17 }
 0x11d   : > { %v1358_v23 = vmul.f32 %v3276_v63, %v1253_v20  ;;  %v849_v24 = vpop.f32.mrb[24].mxu0  ;;  %v1049_v25 = vpop.f32.mrb[24].mxu1 }
 0x11e   : > { %v1413_v27 = vadd.f32 %v3284_v9, %v1308_v21  ;;  %v850_v28 = vadd.f32 %v3269_v56, %v849_v24  ;;  %v2740_v29 = vpop.f32.mrb[25].mxu0  ;;  %v1050_v30 = vadd.f32 %v3269_v56, %v1049_v25  ;;  %v2840_v31 = vpop.f32.mrb[25].mxu1 }
 0x11f   : > { %v1463_v32 = vadd.f32 %v3284_v9, %v1358_v23  ;;  %v852_v33 = vpop.f32.mrb[26].mxu0  ;;  %v1052_v34 = vpop.f32.mrb[26].mxu1 }
 0x120   : > { %v2385_v35 = vpack.c.bf16 %v1413_v27, %v1412_v26  ;;  %v1204_v36 = vmax.f32 %v850_v28, 0.0  ;;  %v853_v37 = vadd.f32 %v3269_v56, %v852_v33  ;;  %v2741_v38 = vpop.f32.mrb[27].mxu0  ;;  %v1254_v39 = vmax.f32 %v1050_v30, 0.0  ;;  %v2841_v40 = vpop.f32.mrb[27].mxu1 }
 0x121   : > { %v2510_v41 = vpack.c.bf16 %v1463_v32, %v1462_v22  ;;  %v1053_v42 = vadd.f32 %v3269_v56, %v1052_v34 }
 0x122   : > { %2606 = vst [vmem:[%s3300_s19 + $0x28] sm:$0xff] %v2385_v35   ;;  %v1309_v43 = vmul.f32 %v3276_v63, %v1204_v36  ;;  %v1205_v44 = vmax.f32 %v853_v37, 0.0  ;;  %v1359_v45 = vmul.f32 %v3276_v63, %v1254_v39 }
 0x123   : > { %2631 = vst [vmem:[%s3300_s19 + $0xf0] sm:$0xff] %v2510_v41   ;;  %v1255_v46 = vmax.f32 %v1053_v42, 0.0 }
 0x124   : > { %v1310_v47 = vmul.f32 %v3276_v63, %v1205_v44  ;;  %v1464_v48 = vadd.f32 %v3284_v9, %v1359_v45  ;;  %v1414_v52 = vadd.f32 %v3284_v9, %v1309_v43 }
 0x125   : > { %v1360_v49 = vmul.f32 %v3276_v63, %v1255_v46  ;;  %v857_v50 = vpop.f32.mrb[28].mxu0  ;;  %v1057_v51 = vpop.f32.mrb[28].mxu1 }
 0x126   : > { %v1415_v53 = vadd.f32 %v3284_v9, %v1310_v47  ;;  %v858_v54 = vadd.f32 %v3269_v56, %v857_v50  ;;  %v2744_v55 = vpop.f32.mrb[29].mxu0  ;;  %v1058_v57 = vadd.f32 %v3269_v56, %v1057_v51  ;;  %v2844_v58 = vpop.f32.mrb[29].mxu1 }
 0x127   : > { %v1465_v59 = vadd.f32 %v3284_v9, %v1360_v49  ;;  %v860_v60 = vpop.f32.mrb[30].mxu0  ;;  %v1060_v61 = vpop.f32.mrb[30].mxu1 }
 0x128   : > { %v2390_v62 = vpack.c.bf16 %v1415_v53, %v1414_v52  ;;  %v1206_v0 = vmax.f32 %v858_v54, 0.0  ;;  %v861_v1 = vadd.f32 %v3269_v56, %v860_v60  ;;  %v2745_v2 = vpop.f32.mrb[31].mxu0  ;;  %v1256_v3 = vmax.f32 %v1058_v57, 0.0  ;;  %v2845_v4 = vpop.f32.mrb[31].mxu1 }
 0x129   : > { %v2515_v5 = vpack.c.bf16 %v1465_v59, %v1464_v48  ;;  %v1061_v6 = vadd.f32 %v3269_v56, %v1060_v61 }
 0x12a   : > { %2607 = vst [vmem:[%s3300_s19 + $0x30] sm:$0xff] %v2390_v62   ;;  %v1311_v7 = vmul.f32 %v3276_v63, %v1206_v0  ;;  %v1207_v8 = vmax.f32 %v861_v1, 0.0  ;;  %v1361_v10 = vmul.f32 %v3276_v63, %v1256_v3 }
 0x12b   : > { %2632 = vst [vmem:[%s3300_s19 + $0xf8] sm:$0xff] %v2515_v5   ;;  %v1257_v11 = vmax.f32 %v1061_v6, 0.0 }
 0x12c   : > { %v1312_v12 = vmul.f32 %v3276_v63, %v1207_v8  ;;  %v1466_v13 = vadd.f32 %v3284_v9, %v1361_v10  ;;  %v1416_v17 = vadd.f32 %v3284_v9, %v1311_v7 }
 0x12d   : > { %v1362_v14 = vmul.f32 %v3276_v63, %v1257_v11  ;;  %v865_v15 = vpop.f32.mrb[32].mxu0  ;;  %v1065_v16 = vpop.f32.mrb[32].mxu1 }
 0x12e   : > { %v1417_v18 = vadd.f32 %v3284_v9, %v1312_v12  ;;  %v866_v19 = vadd.f32 %v3269_v56, %v865_v15  ;;  %v2748_v20 = vpop.f32.mrb[33].mxu0  ;;  %v1066_v21 = vadd.f32 %v3269_v56, %v1065_v16  ;;  %v2848_v22 = vpop.f32.mrb[33].mxu1 }
 0x12f   : > { %v1467_v23 = vadd.f32 %v3284_v9, %v1362_v14  ;;  %v868_v24 = vpop.f32.mrb[34].mxu0  ;;  %v1068_v25 = vpop.f32.mrb[34].mxu1 }
 0x130   : > { %v2395_v26 = vpack.c.bf16 %v1417_v18, %v1416_v17  ;;  %v1208_v27 = vmax.f32 %v866_v19, 0.0  ;;  %v869_v28 = vadd.f32 %v3269_v56, %v868_v24  ;;  %v2749_v29 = vpop.f32.mrb[35].mxu0  ;;  %v1258_v30 = vmax.f32 %v1066_v21, 0.0  ;;  %v2849_v31 = vpop.f32.mrb[35].mxu1 }
 0x131   : > { %v2520_v32 = vpack.c.bf16 %v1467_v23, %v1466_v13  ;;  %v1069_v33 = vadd.f32 %v3269_v56, %v1068_v25 }
 0x132   : > { %2608 = vst [vmem:[%s3300_s19 + $0x38] sm:$0xff] %v2395_v26   ;;  %v1313_v34 = vmul.f32 %v3276_v63, %v1208_v27  ;;  %v1209_v35 = vmax.f32 %v869_v28, 0.0  ;;  %v1363_v36 = vmul.f32 %v3276_v63, %v1258_v30 }
 0x133   : > { %2633 = vst [vmem:[%s3300_s19 + $0x100] sm:$0xff] %v2520_v32   ;;  %v1259_v37 = vmax.f32 %v1069_v33, 0.0 }
 0x134   : > { %v1314_v38 = vmul.f32 %v3276_v63, %v1209_v35  ;;  %v1468_v39 = vadd.f32 %v3284_v9, %v1363_v36  ;;  %v1418_v43 = vadd.f32 %v3284_v9, %v1313_v34 }
 0x135   : > { %v1364_v40 = vmul.f32 %v3276_v63, %v1259_v37  ;;  %v873_v41 = vpop.f32.mrb[36].mxu0  ;;  %v1073_v42 = vpop.f32.mrb[36].mxu1 }
 0x136   : > { %v1419_v44 = vadd.f32 %v3284_v9, %v1314_v38  ;;  %v874_v45 = vadd.f32 %v3269_v56, %v873_v41  ;;  %v2752_v46 = vpop.f32.mrb[37].mxu0  ;;  %v1074_v47 = vadd.f32 %v3269_v56, %v1073_v42  ;;  %v2852_v48 = vpop.f32.mrb[37].mxu1 }
 0x137   : > { %v1469_v49 = vadd.f32 %v3284_v9, %v1364_v40  ;;  %v876_v50 = vpop.f32.mrb[38].mxu0  ;;  %v1076_v51 = vpop.f32.mrb[38].mxu1 }
 0x138   : > { %v2400_v52 = vpack.c.bf16 %v1419_v44, %v1418_v43  ;;  %v1210_v53 = vmax.f32 %v874_v45, 0.0  ;;  %v877_v54 = vadd.f32 %v3269_v56, %v876_v50  ;;  %v2753_v55 = vpop.f32.mrb[39].mxu0  ;;  %v1260_v57 = vmax.f32 %v1074_v47, 0.0  ;;  %v2853_v58 = vpop.f32.mrb[39].mxu1 }
 0x139   : > { %v2525_v59 = vpack.c.bf16 %v1469_v49, %v1468_v39  ;;  %v1077_v60 = vadd.f32 %v3269_v56, %v1076_v51 }
 0x13a   : > { %2609 = vst [vmem:[%s3300_s19 + $0x40] sm:$0xff] %v2400_v52   ;;  %v1315_v61 = vmul.f32 %v3276_v63, %v1210_v53  ;;  %v1211_v62 = vmax.f32 %v877_v54, 0.0  ;;  %v1365_v0 = vmul.f32 %v3276_v63, %v1260_v57 }
 0x13b   : > { %2634 = vst [vmem:[%s3300_s19 + $0x108] sm:$0xff] %v2525_v59   ;;  %v1261_v1 = vmax.f32 %v1077_v60, 0.0 }
 0x13c   : > { %v1316_v2 = vmul.f32 %v3276_v63, %v1211_v62  ;;  %v1470_v3 = vadd.f32 %v3284_v9, %v1365_v0  ;;  %v1420_v7 = vadd.f32 %v3284_v9, %v1315_v61 }
 0x13d   : > { %v1366_v4 = vmul.f32 %v3276_v63, %v1261_v1  ;;  %v881_v5 = vpop.f32.mrb[40].mxu0  ;;  %v1081_v6 = vpop.f32.mrb[40].mxu1 }
 0x13e   : > { %v1421_v8 = vadd.f32 %v3284_v9, %v1316_v2  ;;  %v882_v10 = vadd.f32 %v3269_v56, %v881_v5  ;;  %v2756_v11 = vpop.f32.mrb[41].mxu0  ;;  %v1082_v12 = vadd.f32 %v3269_v56, %v1081_v6  ;;  %v2856_v13 = vpop.f32.mrb[41].mxu1 }
 0x13f   : > { %v1471_v14 = vadd.f32 %v3284_v9, %v1366_v4  ;;  %v884_v15 = vpop.f32.mrb[42].mxu0  ;;  %v1084_v16 = vpop.f32.mrb[42].mxu1 }
 0x140   : > { %v2405_v17 = vpack.c.bf16 %v1421_v8, %v1420_v7  ;;  %v1212_v18 = vmax.f32 %v882_v10, 0.0  ;;  %v885_v19 = vadd.f32 %v3269_v56, %v884_v15  ;;  %v2757_v20 = vpop.f32.mrb[43].mxu0  ;;  %v1262_v21 = vmax.f32 %v1082_v12, 0.0  ;;  %v2857_v22 = vpop.f32.mrb[43].mxu1 }
 0x141   : > { %v2530_v23 = vpack.c.bf16 %v1471_v14, %v1470_v3  ;;  %v1085_v24 = vadd.f32 %v3269_v56, %v1084_v16 }
 0x142   : > { %2610 = vst [vmem:[%s3300_s19 + $0x48] sm:$0xff] %v2405_v17   ;;  %v1317_v25 = vmul.f32 %v3276_v63, %v1212_v18  ;;  %v1213_v26 = vmax.f32 %v885_v19, 0.0  ;;  %v1367_v27 = vmul.f32 %v3276_v63, %v1262_v21 }
 0x143   : > { %2635 = vst [vmem:[%s3300_s19 + $0x110] sm:$0xff] %v2530_v23   ;;  %v1263_v28 = vmax.f32 %v1085_v24, 0.0 }
 0x144   : > { %v1318_v29 = vmul.f32 %v3276_v63, %v1213_v26  ;;  %v1472_v30 = vadd.f32 %v3284_v9, %v1367_v27  ;;  %v1422_v34 = vadd.f32 %v3284_v9, %v1317_v25 }
 0x145   : > { %v1368_v31 = vmul.f32 %v3276_v63, %v1263_v28  ;;  %v889_v32 = vpop.f32.mrb[44].mxu0  ;;  %v1089_v33 = vpop.f32.mrb[44].mxu1 }
 0x146   : > { %v1423_v35 = vadd.f32 %v3284_v9, %v1318_v29  ;;  %v890_v36 = vadd.f32 %v3269_v56, %v889_v32  ;;  %v2760_v37 = vpop.f32.mrb[45].mxu0  ;;  %v1090_v38 = vadd.f32 %v3269_v56, %v1089_v33  ;;  %v2860_v39 = vpop.f32.mrb[45].mxu1 }
 0x147   : > { %v1473_v40 = vadd.f32 %v3284_v9, %v1368_v31  ;;  %v892_v41 = vpop.f32.mrb[46].mxu0  ;;  %v1092_v42 = vpop.f32.mrb[46].mxu1 }
 0x148   : > { %v2410_v43 = vpack.c.bf16 %v1423_v35, %v1422_v34  ;;  %v1214_v44 = vmax.f32 %v890_v36, 0.0  ;;  %v893_v45 = vadd.f32 %v3269_v56, %v892_v41  ;;  %v2761_v46 = vpop.f32.mrb[47].mxu0  ;;  %v1264_v47 = vmax.f32 %v1090_v38, 0.0  ;;  %v2861_v48 = vpop.f32.mrb[47].mxu1 }
 0x149   : > { %v2535_v49 = vpack.c.bf16 %v1473_v40, %v1472_v30  ;;  %v1093_v50 = vadd.f32 %v3269_v56, %v1092_v42 }
 0x14a   : > { %2611 = vst [vmem:[%s3300_s19 + $0x50] sm:$0xff] %v2410_v43   ;;  %v1319_v51 = vmul.f32 %v3276_v63, %v1214_v44  ;;  %v1215_v52 = vmax.f32 %v893_v45, 0.0  ;;  %v1369_v53 = vmul.f32 %v3276_v63, %v1264_v47 }
 0x14b   : > { %2636 = vst [vmem:[%s3300_s19 + $0x118] sm:$0xff] %v2535_v49   ;;  %v1265_v54 = vmax.f32 %v1093_v50, 0.0 }
 0x14c   : > { %v1320_v55 = vmul.f32 %v3276_v63, %v1215_v52  ;;  %v1474_v57 = vadd.f32 %v3284_v9, %v1369_v53  ;;  %v1424_v61 = vadd.f32 %v3284_v9, %v1319_v51 }
 0x14d   : > { %v1370_v58 = vmul.f32 %v3276_v63, %v1265_v54  ;;  %v897_v59 = vpop.f32.mrb[48].mxu0  ;;  %v1097_v60 = vpop.f32.mrb[48].mxu1 }
 0x14e   : > { %v1425_v62 = vadd.f32 %v3284_v9, %v1320_v55  ;;  %v898_v0 = vadd.f32 %v3269_v56, %v897_v59  ;;  %v2764_v1 = vpop.f32.mrb[49].mxu0  ;;  %v1098_v2 = vadd.f32 %v3269_v56, %v1097_v60  ;;  %v2864_v3 = vpop.f32.mrb[49].mxu1 }
 0x14f   : > { %v1475_v4 = vadd.f32 %v3284_v9, %v1370_v58  ;;  %v900_v5 = vpop.f32.mrb[50].mxu0  ;;  %v1100_v6 = vpop.f32.mrb[50].mxu1 }
 0x150   : > { %v2415_v7 = vpack.c.bf16 %v1425_v62, %v1424_v61  ;;  %v1216_v8 = vmax.f32 %v898_v0, 0.0  ;;  %v901_v10 = vadd.f32 %v3269_v56, %v900_v5  ;;  %v2765_v11 = vpop.f32.mrb[51].mxu0  ;;  %v1266_v12 = vmax.f32 %v1098_v2, 0.0  ;;  %v2865_v13 = vpop.f32.mrb[51].mxu1 }
 0x151   : > { %v2540_v14 = vpack.c.bf16 %v1475_v4, %v1474_v57  ;;  %v1101_v15 = vadd.f32 %v3269_v56, %v1100_v6 }
 0x152   : > { %2612 = vst [vmem:[%s3300_s19 + $0x58] sm:$0xff] %v2415_v7   ;;  %v1321_v16 = vmul.f32 %v3276_v63, %v1216_v8  ;;  %v1217_v17 = vmax.f32 %v901_v10, 0.0  ;;  %v1371_v18 = vmul.f32 %v3276_v63, %v1266_v12 }
 0x153   : > { %2637 = vst [vmem:[%s3300_s19 + $0x120] sm:$0xff] %v2540_v14   ;;  %v1267_v19 = vmax.f32 %v1101_v15, 0.0 }
 0x154   : > { %v1322_v20 = vmul.f32 %v3276_v63, %v1217_v17  ;;  %v1476_v21 = vadd.f32 %v3284_v9, %v1371_v18  ;;  %v1426_v25 = vadd.f32 %v3284_v9, %v1321_v16 }
 0x155   : > { %v1372_v22 = vmul.f32 %v3276_v63, %v1267_v19  ;;  %v905_v23 = vpop.f32.mrb[52].mxu0  ;;  %v1105_v24 = vpop.f32.mrb[52].mxu1 }
 0x156   : > { %v1427_v26 = vadd.f32 %v3284_v9, %v1322_v20  ;;  %v906_v27 = vadd.f32 %v3269_v56, %v905_v23  ;;  %v2768_v28 = vpop.f32.mrb[53].mxu0  ;;  %v1106_v29 = vadd.f32 %v3269_v56, %v1105_v24  ;;  %v2868_v30 = vpop.f32.mrb[53].mxu1 }
 0x157   : > { %v1477_v31 = vadd.f32 %v3284_v9, %v1372_v22  ;;  %v908_v32 = vpop.f32.mrb[54].mxu0  ;;  %v1108_v33 = vpop.f32.mrb[54].mxu1 }
 0x158   : > { %v2420_v34 = vpack.c.bf16 %v1427_v26, %v1426_v25  ;;  %v1218_v35 = vmax.f32 %v906_v27, 0.0  ;;  %v909_v36 = vadd.f32 %v3269_v56, %v908_v32  ;;  %v2769_v37 = vpop.f32.mrb[55].mxu0  ;;  %v1268_v38 = vmax.f32 %v1106_v29, 0.0  ;;  %v2869_v39 = vpop.f32.mrb[55].mxu1 }
 0x159   : > { %v2545_v40 = vpack.c.bf16 %v1477_v31, %v1476_v21  ;;  %v1109_v41 = vadd.f32 %v3269_v56, %v1108_v33 }
 0x15a   : > { %2613 = vst [vmem:[%s3300_s19 + $0x60] sm:$0xff] %v2420_v34   ;;  %v1323_v42 = vmul.f32 %v3276_v63, %v1218_v35  ;;  %v1219_v43 = vmax.f32 %v909_v36, 0.0  ;;  %v1373_v44 = vmul.f32 %v3276_v63, %v1268_v38 }
 0x15b   : > { %2638 = vst [vmem:[%s3300_s19 + $0x128] sm:$0xff] %v2545_v40   ;;  %v1269_v45 = vmax.f32 %v1109_v41, 0.0 }
 0x15c   : > { %v1324_v46 = vmul.f32 %v3276_v63, %v1219_v43  ;;  %v1478_v47 = vadd.f32 %v3284_v9, %v1373_v44  ;;  %v1428_v51 = vadd.f32 %v3284_v9, %v1323_v42 }
 0x15d   : > { %v1374_v48 = vmul.f32 %v3276_v63, %v1269_v45  ;;  %v913_v49 = vpop.f32.mrb[56].mxu0  ;;  %v1113_v50 = vpop.f32.mrb[56].mxu1 }
 0x15e   : > { %v1429_v52 = vadd.f32 %v3284_v9, %v1324_v46  ;;  %v914_v53 = vadd.f32 %v3269_v56, %v913_v49  ;;  %v2772_v54 = vpop.f32.mrb[57].mxu0  ;;  %v1114_v55 = vadd.f32 %v3269_v56, %v1113_v50  ;;  %v2872_v57 = vpop.f32.mrb[57].mxu1 }
 0x15f   : > { %v1479_v58 = vadd.f32 %v3284_v9, %v1374_v48  ;;  %v916_v59 = vpop.f32.mrb[58].mxu0  ;;  %v1116_v60 = vpop.f32.mrb[58].mxu1 }
 0x160   : > { %v2425_v61 = vpack.c.bf16 %v1429_v52, %v1428_v51  ;;  %v1220_v62 = vmax.f32 %v914_v53, 0.0  ;;  %v917_v0 = vadd.f32 %v3269_v56, %v916_v59  ;;  %v2773_v1 = vpop.f32.mrb[59].mxu0  ;;  %v1270_v2 = vmax.f32 %v1114_v55, 0.0  ;;  %v2873_v3 = vpop.f32.mrb[59].mxu1 }
 0x161   : > { %v2550_v4 = vpack.c.bf16 %v1479_v58, %v1478_v47  ;;  %v1117_v5 = vadd.f32 %v3269_v56, %v1116_v60 }
 0x162   : > { %2614 = vst [vmem:[%s3300_s19 + $0x68] sm:$0xff] %v2425_v61   ;;  %v1325_v6 = vmul.f32 %v3276_v63, %v1220_v62  ;;  %v1221_v7 = vmax.f32 %v917_v0, 0.0  ;;  %v1375_v8 = vmul.f32 %v3276_v63, %v1270_v2 }
 0x163   : > { %2639 = vst [vmem:[%s3300_s19 + $0x130] sm:$0xff] %v2550_v4   ;;  %v1271_v10 = vmax.f32 %v1117_v5, 0.0 }
 0x164   : > { %v1326_v11 = vmul.f32 %v3276_v63, %v1221_v7  ;;  %v1480_v12 = vadd.f32 %v3284_v9, %v1375_v8  ;;  %v1430_v16 = vadd.f32 %v3284_v9, %v1325_v6 }
 0x165   : > { %v1376_v13 = vmul.f32 %v3276_v63, %v1271_v10  ;;  %v921_v14 = vpop.f32.mrb[60].mxu0  ;;  %v1121_v15 = vpop.f32.mrb[60].mxu1 }
 0x166   : > { %v1431_v17 = vadd.f32 %v3284_v9, %v1326_v11  ;;  %v922_v18 = vadd.f32 %v3269_v56, %v921_v14  ;;  %v2776_v19 = vpop.f32.mrb[61].mxu0  ;;  %v1122_v20 = vadd.f32 %v3269_v56, %v1121_v15  ;;  %v2876_v21 = vpop.f32.mrb[61].mxu1 }
 0x167   : > { %v1481_v22 = vadd.f32 %v3284_v9, %v1376_v13  ;;  %v924_v23 = vpop.f32.mrb[62].mxu0  ;;  %v1124_v24 = vpop.f32.mrb[62].mxu1 }
 0x168   : > { %v2430_v25 = vpack.c.bf16 %v1431_v17, %v1430_v16  ;;  %v1222_v26 = vmax.f32 %v922_v18, 0.0  ;;  %v925_v27 = vadd.f32 %v3269_v56, %v924_v23  ;;  %v2777_v28 = vpop.f32.mrb[63].mxu0  ;;  %v1272_v29 = vmax.f32 %v1122_v20, 0.0  ;;  %v2877_v30 = vpop.f32.mrb[63].mxu1 }
 0x169   : > { %v2555_v31 = vpack.c.bf16 %v1481_v22, %v1480_v12  ;;  %v1125_v32 = vadd.f32 %v3269_v56, %v1124_v24 }
 0x16a   : > { %2615 = vst [vmem:[%s3300_s19 + $0x70] sm:$0xff] %v2430_v25   ;;  %v1327_v33 = vmul.f32 %v3276_v63, %v1222_v26  ;;  %v1223_v34 = vmax.f32 %v925_v27, 0.0  ;;  %v1377_v35 = vmul.f32 %v3276_v63, %v1272_v29 }
 0x16b   : > { %2640 = vst [vmem:[%s3300_s19 + $0x138] sm:$0xff] %v2555_v31   ;;  %v1273_v36 = vmax.f32 %v1125_v32, 0.0 }
 0x16c   : > { %v1328_v37 = vmul.f32 %v3276_v63, %v1223_v34  ;;  %v1482_v38 = vadd.f32 %v3284_v9, %v1377_v35  ;;  %v1432_v42 = vadd.f32 %v3284_v9, %v1327_v33 }
 0x16d   : > { %v1378_v39 = vmul.f32 %v3276_v63, %v1273_v36  ;;  %v929_v40 = vpop.f32.mrb[64].mxu0  ;;  %v1129_v41 = vpop.f32.mrb[64].mxu1 }
 0x16e   : > { %v1433_v43 = vadd.f32 %v3284_v9, %v1328_v37  ;;  %v930_v44 = vadd.f32 %v3269_v56, %v929_v40  ;;  %v2780_v45 = vpop.f32.mrb[65].mxu0  ;;  %v1130_v46 = vadd.f32 %v3269_v56, %v1129_v41  ;;  %v2880_v47 = vpop.f32.mrb[65].mxu1 }
 0x16f   : > { %v1483_v48 = vadd.f32 %v3284_v9, %v1378_v39  ;;  %v932_v49 = vpop.f32.mrb[66].mxu0  ;;  %v1132_v50 = vpop.f32.mrb[66].mxu1 }
 0x170   : > { %v2435_v51 = vpack.c.bf16 %v1433_v43, %v1432_v42  ;;  %v1224_v52 = vmax.f32 %v930_v44, 0.0  ;;  %v933_v53 = vadd.f32 %v3269_v56, %v932_v49  ;;  %v2781_v54 = vpop.f32.mrb[67].mxu0  ;;  %v1274_v55 = vmax.f32 %v1130_v46, 0.0  ;;  %v2881_v57 = vpop.f32.mrb[67].mxu1  ;;  %v3543_v43 = vld [vmem:[%s3651_s2] ss:$0 sm:$0xff] }
 0x171   : > { %v2560_v58 = vpack.c.bf16 %v1483_v48, %v1482_v38  ;;  %v1133_v59 = vadd.f32 %v3269_v56, %v1132_v50  ;;  %v3551_v49 = vld [vmem:[%s3652_s3] ss:$0 sm:$0xff] }
 0x172   : > { %2616 = vst [vmem:[%s3300_s19 + $0x78] sm:$0xff] %v2435_v51   ;;  %v1329_v60 = vmul.f32 %v3276_v63, %v1224_v52  ;;  %v1225_v61 = vmax.f32 %v933_v53, 0.0  ;;  %v1379_v62 = vmul.f32 %v3276_v63, %v1274_v55 }
 0x173   : > { %2641 = vst [vmem:[%s3300_s19 + $0x140] sm:$0xff] %v2560_v58   ;;  %v1275_v0 = vmax.f32 %v1133_v59, 0.0 }
 0x174   : > { %v1330_v1 = vmul.f32 %v3276_v63, %v1225_v61  ;;  %v1484_v2 = vadd.f32 %v3284_v9, %v1379_v62  ;;  %v1434_v6 = vadd.f32 %v3284_v9, %v1329_v60  ;;  %v3562_v60 = vld [vmem:[%s3653_s4] ss:$0 sm:$0xff] }
 0x175   : > { %v1380_v3 = vmul.f32 %v3276_v63, %v1275_v0  ;;  %v937_v4 = vpop.f32.mrb[68].mxu0  ;;  %v1137_v5 = vpop.f32.mrb[68].mxu1 }
 0x176   : > { %v1435_v7 = vadd.f32 %v3284_v9, %v1330_v1  ;;  %v938_v8 = vadd.f32 %v3269_v56, %v937_v4  ;;  %v2784_v10 = vpop.f32.mrb[69].mxu0  ;;  %v1138_v11 = vadd.f32 %v3269_v56, %v1137_v5  ;;  %v2884_v12 = vpop.f32.mrb[69].mxu1 }
 0x177   : > { %v1485_v13 = vadd.f32 %v3284_v9, %v1380_v3  ;;  %v940_v14 = vpop.f32.mrb[70].mxu0  ;;  %v1140_v15 = vpop.f32.mrb[70].mxu1 }
 0x178   : > { %v2440_v16 = vpack.c.bf16 %v1435_v7, %v1434_v6  ;;  %v1226_v17 = vmax.f32 %v938_v8, 0.0  ;;  %v941_v18 = vadd.f32 %v3269_v56, %v940_v14  ;;  %v2785_v19 = vpop.f32.mrb[71].mxu0  ;;  %v1276_v20 = vmax.f32 %v1138_v11, 0.0  ;;  %v2885_v21 = vpop.f32.mrb[71].mxu1 }
 0x179   : > { %v2565_v22 = vpack.c.bf16 %v1485_v13, %v1484_v2  ;;  %v1141_v23 = vadd.f32 %v3269_v56, %v1140_v15 }
 0x17a   : > { %2617 = vst [vmem:[%s3300_s19 + $0x80] sm:$0xff] %v2440_v16   ;;  %v1331_v24 = vmul.f32 %v3276_v63, %v1226_v17  ;;  %v1227_v25 = vmax.f32 %v941_v18, 0.0  ;;  %v1381_v26 = vmul.f32 %v3276_v63, %v1276_v20 }
 0x17b   : > { %2642 = vst [vmem:[%s3300_s19 + $0x148] sm:$0xff] %v2565_v22   ;;  %v1277_v27 = vmax.f32 %v1141_v23, 0.0 }
 0x17c   : > { %v1332_v28 = vmul.f32 %v3276_v63, %v1227_v25  ;;  %v1486_v29 = vadd.f32 %v3284_v9, %v1381_v26  ;;  %v1436_v33 = vadd.f32 %v3284_v9, %v1331_v24 }
 0x17d   : > { %v1382_v30 = vmul.f32 %v3276_v63, %v1277_v27  ;;  %v945_v31 = vpop.f32.mrb[72].mxu0  ;;  %v1145_v32 = vpop.f32.mrb[72].mxu1 }
 0x17e   : > { %v1437_v34 = vadd.f32 %v3284_v9, %v1332_v28  ;;  %v946_v35 = vadd.f32 %v3269_v56, %v945_v31  ;;  %v2788_v36 = vpop.f32.mrb[73].mxu0  ;;  %v1146_v37 = vadd.f32 %v3269_v56, %v1145_v32  ;;  %v2888_v38 = vpop.f32.mrb[73].mxu1 }
 0x17f   : > { %v1487_v39 = vadd.f32 %v3284_v9, %v1382_v30  ;;  %v948_v40 = vpop.f32.mrb[74].mxu0  ;;  %v1148_v41 = vpop.f32.mrb[74].mxu1 }
 0x180   : > { %v2445_v42 = vpack.c.bf16 %v1437_v34, %v1436_v33  ;;  %v1228_v63 = vmax.f32 %v946_v35, 0.0  ;;  %v949_v44 = vadd.f32 %v3543_v43, %v948_v40  ;;  %v2789_v45 = vpop.f32.mrb[75].mxu0  ;;  %v1278_v46 = vmax.f32 %v1146_v37, 0.0  ;;  %v2889_v47 = vpop.f32.mrb[75].mxu1 }
 0x181   : > { %v2570_v48 = vpack.c.bf16 %v1487_v39, %v1486_v29  ;;  %v1149_v56 = vadd.f32 %v3543_v43, %v1148_v41 }
 0x182   : > { %2618 = vst [vmem:[%s3300_s19 + $0x88] sm:$0xff] %v2445_v42   ;;  %v1333_v50 = vmul.f32 %v3551_v49, %v1228_v63  ;;  %v1229_v51 = vmax.f32 %v949_v44, 0.0  ;;  %v1383_v52 = vmul.f32 %v3551_v49, %v1278_v46 }
 0x183   : > { %2643 = vst [vmem:[%s3300_s19 + $0x150] sm:$0xff] %v2570_v48   ;;  %v1279_v53 = vmax.f32 %v1149_v56, 0.0 }
 0x184   : > { %v1334_v54 = vmul.f32 %v3551_v49, %v1229_v51  ;;  %v1488_v55 = vadd.f32 %v3284_v9, %v1383_v52  ;;  %v1438_v61 = vadd.f32 %v3562_v60, %v1333_v50 }
 0x185   : > { %v1384_v57 = vmul.f32 %v3551_v49, %v1279_v53  ;;  %v953_v58 = vpop.f32.mrb[76].mxu0  ;;  %v1153_v59 = vpop.f32.mrb[76].mxu1 }
 0x186   : > { %v1439_v62 = vadd.f32 %v3562_v60, %v1334_v54  ;;  %v954_v0 = vadd.f32 %v3543_v43, %v953_v58  ;;  %v2792_v1 = vpop.f32.mrb[77].mxu0  ;;  %v1154_v2 = vadd.f32 %v3543_v43, %v1153_v59  ;;  %v2892_v9 = vpop.f32.mrb[77].mxu1 }
 0x187   : > { %v1489_v3 = vadd.f32 %v3562_v60, %v1384_v57  ;;  %v956_v4 = vpop.f32.mrb[78].mxu0  ;;  %v1156_v5 = vpop.f32.mrb[78].mxu1 }
 0x188   : > { %v2450_v6 = vpack.c.bf16 %v1439_v62, %v1438_v61  ;;  %v1230_v7 = vmax.f32 %v954_v0, 0.0  ;;  %v957_v8 = vadd.f32 %v3543_v43, %v956_v4  ;;  %v2793_v10 = vpop.f32.mrb[79].mxu0  ;;  %v1280_v11 = vmax.f32 %v1154_v2, 0.0  ;;  %v2893_v12 = vpop.f32.mrb[79].mxu1 }
 0x189   : > { %v2575_v13 = vpack.c.bf16 %v1489_v3, %v1488_v55  ;;  %v1157_v14 = vadd.f32 %v3543_v43, %v1156_v5 }
 0x18a   : > { %2619 = vst [vmem:[%s3300_s19 + $0x90] sm:$0xff] %v2450_v6   ;;  %v1335_v15 = vmul.f32 %v3551_v49, %v1230_v7  ;;  %v1231_v16 = vmax.f32 %v957_v8, 0.0  ;;  %v1385_v17 = vmul.f32 %v3551_v49, %v1280_v11 }
 0x18b   : > { %2644 = vst [vmem:[%s3300_s19 + $0x158] sm:$0xff] %v2575_v13   ;;  %v1281_v18 = vmax.f32 %v1157_v14, 0.0 }
 0x18c   : > { %v1336_v19 = vmul.f32 %v3551_v49, %v1231_v16  ;;  %v1490_v20 = vadd.f32 %v3562_v60, %v1385_v17  ;;  %v1440_v24 = vadd.f32 %v3562_v60, %v1335_v15 }
 0x18d   : > { %v1386_v21 = vmul.f32 %v3551_v49, %v1281_v18  ;;  %v961_v22 = vpop.f32.mrb[80].mxu0  ;;  %v1161_v23 = vpop.f32.mrb[80].mxu1 }
 0x18e   : > { %v1441_v25 = vadd.f32 %v3562_v60, %v1336_v19  ;;  %v962_v26 = vadd.f32 %v3543_v43, %v961_v22  ;;  %v2796_v27 = vpop.f32.mrb[81].mxu0  ;;  %v1162_v28 = vadd.f32 %v3543_v43, %v1161_v23  ;;  %v2896_v29 = vpop.f32.mrb[81].mxu1 }
 0x18f   : > { %v1491_v30 = vadd.f32 %v3562_v60, %v1386_v21  ;;  %v964_v31 = vpop.f32.mrb[82].mxu0  ;;  %v1164_v32 = vpop.f32.mrb[82].mxu1 }
 0x190   : > { %v2455_v33 = vpack.c.bf16 %v1441_v25, %v1440_v24  ;;  %v1232_v34 = vmax.f32 %v962_v26, 0.0  ;;  %v965_v35 = vadd.f32 %v3543_v43, %v964_v31  ;;  %v2797_v36 = vpop.f32.mrb[83].mxu0  ;;  %v1282_v37 = vmax.f32 %v1162_v28, 0.0  ;;  %v2897_v38 = vpop.f32.mrb[83].mxu1 }
 0x191   : > { %v2580_v39 = vpack.c.bf16 %v1491_v30, %v1490_v20  ;;  %v1165_v40 = vadd.f32 %v3543_v43, %v1164_v32 }
 0x192   : > { %2620 = vst [vmem:[%s3300_s19 + $0x98] sm:$0xff] %v2455_v33   ;;  %v1337_v41 = vmul.f32 %v3551_v49, %v1232_v34  ;;  %v1233_v42 = vmax.f32 %v965_v35, 0.0  ;;  %v1387_v63 = vmul.f32 %v3551_v49, %v1282_v37 }
 0x193   : > { %2645 = vst [vmem:[%s3300_s19 + $0x160] sm:$0xff] %v2580_v39   ;;  %v1283_v44 = vmax.f32 %v1165_v40, 0.0 }
 0x194   : > { %v1338_v45 = vmul.f32 %v3551_v49, %v1233_v42  ;;  %v1492_v46 = vadd.f32 %v3562_v60, %v1387_v63  ;;  %v1442_v50 = vadd.f32 %v3562_v60, %v1337_v41 }
 0x195   : > { %v1388_v47 = vmul.f32 %v3551_v49, %v1283_v44  ;;  %v969_v48 = vpop.f32.mrb[84].mxu0  ;;  %v1169_v56 = vpop.f32.mrb[84].mxu1 }
 0x196   : > { %v1443_v51 = vadd.f32 %v3562_v60, %v1338_v45  ;;  %v970_v52 = vadd.f32 %v3543_v43, %v969_v48  ;;  %v2800_v53 = vpop.f32.mrb[85].mxu0  ;;  %v1170_v54 = vadd.f32 %v3543_v43, %v1169_v56  ;;  %v2900_v55 = vpop.f32.mrb[85].mxu1 }
 0x197   : > { %v1493_v57 = vadd.f32 %v3562_v60, %v1388_v47  ;;  %v972_v58 = vpop.f32.mrb[86].mxu0  ;;  %v1172_v59 = vpop.f32.mrb[86].mxu1 }
 0x198   : > { %v2460_v61 = vpack.c.bf16 %v1443_v51, %v1442_v50  ;;  %v1234_v62 = vmax.f32 %v970_v52, 0.0  ;;  %v973_v0 = vadd.f32 %v3543_v43, %v972_v58  ;;  %v2801_v1 = vpop.f32.mrb[87].mxu0  ;;  %v1284_v2 = vmax.f32 %v1170_v54, 0.0  ;;  %v2901_v9 = vpop.f32.mrb[87].mxu1 }
 0x199   : > { %v2585_v3 = vpack.c.bf16 %v1493_v57, %v1492_v46  ;;  %v1173_v4 = vadd.f32 %v3543_v43, %v1172_v59 }
 0x19a   : > { %2621 = vst [vmem:[%s3300_s19 + $0xa0] sm:$0xff] %v2460_v61   ;;  %v1339_v5 = vmul.f32 %v3551_v49, %v1234_v62  ;;  %v1235_v6 = vmax.f32 %v973_v0, 0.0  ;;  %v1389_v7 = vmul.f32 %v3551_v49, %v1284_v2 }
 0x19b   : > { %2646 = vst [vmem:[%s3300_s19 + $0x168] sm:$0xff] %v2585_v3   ;;  %v1285_v8 = vmax.f32 %v1173_v4, 0.0 }
 0x19c   : > { %v1340_v10 = vmul.f32 %v3551_v49, %v1235_v6  ;;  %v1494_v11 = vadd.f32 %v3562_v60, %v1389_v7  ;;  %v1444_v15 = vadd.f32 %v3562_v60, %v1339_v5 }
 0x19d   : > { %v1390_v12 = vmul.f32 %v3551_v49, %v1285_v8  ;;  %v977_v13 = vpop.f32.mrb[88].mxu0  ;;  %v1177_v14 = vpop.f32.mrb[88].mxu1 }
 0x19e   : > { %v1445_v16 = vadd.f32 %v3562_v60, %v1340_v10  ;;  %v978_v17 = vadd.f32 %v3543_v43, %v977_v13  ;;  %v2804_v18 = vpop.f32.mrb[89].mxu0  ;;  %v1178_v19 = vadd.f32 %v3543_v43, %v1177_v14  ;;  %v2904_v20 = vpop.f32.mrb[89].mxu1 }
 0x19f   : > { %v1495_v21 = vadd.f32 %v3562_v60, %v1390_v12  ;;  %v980_v22 = vpop.f32.mrb[90].mxu0  ;;  %v1180_v23 = vpop.f32.mrb[90].mxu1 }
 0x1a0   : > { %v2465_v24 = vpack.c.bf16 %v1445_v16, %v1444_v15  ;;  %v1236_v25 = vmax.f32 %v978_v17, 0.0  ;;  %v981_v26 = vadd.f32 %v3543_v43, %v980_v22  ;;  %v2805_v27 = vpop.f32.mrb[91].mxu0  ;;  %v1286_v28 = vmax.f32 %v1178_v19, 0.0  ;;  %v2905_v29 = vpop.f32.mrb[91].mxu1 }
 0x1a1   : > { %v2590_v30 = vpack.c.bf16 %v1495_v21, %v1494_v11  ;;  %v1181_v31 = vadd.f32 %v3543_v43, %v1180_v23 }
 0x1a2   : > { %2622 = vst [vmem:[%s3300_s19 + $0xa8] sm:$0xff] %v2465_v24   ;;  %v1341_v32 = vmul.f32 %v3551_v49, %v1236_v25  ;;  %v1237_v33 = vmax.f32 %v981_v26, 0.0  ;;  %v1391_v34 = vmul.f32 %v3551_v49, %v1286_v28 }
 0x1a3   : > { %2647 = vst [vmem:[%s3300_s19 + $0x170] sm:$0xff] %v2590_v30   ;;  %v1287_v35 = vmax.f32 %v1181_v31, 0.0 }
 0x1a4   : > { %v1342_v36 = vmul.f32 %v3551_v49, %v1237_v33  ;;  %v1496_v37 = vadd.f32 %v3562_v60, %v1391_v34  ;;  %v1446_v41 = vadd.f32 %v3562_v60, %v1341_v32 }
 0x1a5   : > { %v1392_v38 = vmul.f32 %v3551_v49, %v1287_v35  ;;  %v985_v39 = vpop.f32.mrb[92].mxu0  ;;  %v1185_v40 = vpop.f32.mrb[92].mxu1 }
 0x1a6   : > { %v1447_v42 = vadd.f32 %v3562_v60, %v1342_v36  ;;  %v986_v63 = vadd.f32 %v3543_v43, %v985_v39  ;;  %v2808_v44 = vpop.f32.mrb[93].mxu0  ;;  %v1186_v45 = vadd.f32 %v3543_v43, %v1185_v40  ;;  %v2908_v46 = vpop.f32.mrb[93].mxu1 }
 0x1a7   : > { %v1497_v47 = vadd.f32 %v3562_v60, %v1392_v38  ;;  %v988_v48 = vpop.f32.mrb[94].mxu0  ;;  %v1188_v56 = vpop.f32.mrb[94].mxu1 }
 0x1a8   : > { %v2470_v50 = vpack.c.bf16 %v1447_v42, %v1446_v41  ;;  %v1238_v51 = vmax.f32 %v986_v63, 0.0  ;;  %v989_v52 = vadd.f32 %v3543_v43, %v988_v48  ;;  %v2809_v53 = vpop.f32.mrb[95].mxu0  ;;  %v1288_v54 = vmax.f32 %v1186_v45, 0.0  ;;  %v2909_v55 = vpop.f32.mrb[95].mxu1 }
 0x1a9   : > { %v2595_v57 = vpack.c.bf16 %v1497_v47, %v1496_v37  ;;  %v1189_v58 = vadd.f32 %v3543_v43, %v1188_v56 }
 0x1aa   : > { %2623 = vst [vmem:[%s3300_s19 + $0xb0] sm:$0xff] %v2470_v50   ;;  %v1343_v59 = vmul.f32 %v3551_v49, %v1238_v51  ;;  %v1239_v61 = vmax.f32 %v989_v52, 0.0  ;;  %v1393_v62 = vmul.f32 %v3551_v49, %v1288_v54 }
 0x1ab   : > { %2648 = vst [vmem:[%s3300_s19 + $0x178] sm:$0xff] %v2595_v57   ;;  %v1289_v0 = vmax.f32 %v1189_v58, 0.0 }
 0x1ac   : > { %v1344_v1 = vmul.f32 %v3551_v49, %v1239_v61  ;;  %v1498_v2 = vadd.f32 %v3562_v60, %v1393_v62  ;;  %v1448_v4 = vadd.f32 %v3562_v60, %v1343_v59 }
 0x1ad   : > { %v1394_v9 = vmul.f32 %v3551_v49, %v1289_v0  ;;  %v993_v3 = vpop.f32.mrb[96].mxu0 }
 0x1ae   : > { %v1449_v5 = vadd.f32 %v3562_v60, %v1344_v1  ;;  %v994_v6 = vadd.f32 %v3543_v43, %v993_v3  ;;  %v2812_v7 = vpop.f32.mrb[97].mxu0 }
 0x1af   : > { %v1499_v8 = vadd.f32 %v3562_v60, %v1394_v9  ;;  %v996_v10 = vpop.f32.mrb[98].mxu0 }
 0x1b0   : > { %v2475_v11 = vpack.c.bf16 %v1449_v5, %v1448_v4  ;;  %v1240_v12 = vmax.f32 %v994_v6, 0.0  ;;  %v997_v13 = vadd.f32 %v3543_v43, %v996_v10  ;;  %v2813_v14 = vpop.f32.mrb[99].mxu0 }
 0x1b1   : > { %v2600_v15 = vpack.c.bf16 %v1499_v8, %v1498_v2 }
 0x1b2   : > { %2624 = vst [vmem:[%s3300_s19 + $0xb8] sm:$0xff] %v2475_v11   ;;  %v1345_v16 = vmul.f32 %v3551_v49, %v1240_v12  ;;  %v1241_v17 = vmax.f32 %v997_v13, 0.0 }
 0x1b3   : > { %2649 = vst [vmem:[%s3300_s19 + $0x180] sm:$0xff] %v2600_v15  }
 0x1b4   : > { %v1346_v18 = vmul.f32 %v3551_v49, %v1241_v17  ;;  %v1450_v19 = vadd.f32 %v3562_v60, %v1345_v16 }
 0x1b6   : > { %v1451_v20 = vadd.f32 %v3562_v60, %v1346_v18 }
 0x1b8   : > { %v2480_v21 = vpack.c.bf16 %v1451_v20, %v1450_v19 }
 0x1ba   : > { %2625 = vst [vmem:[%s3300_s19 + $0xc0] sm:$0xff] %v2480_v21  }
 0x1bb PF: > { %s15_s18 = sadd.s32 1, %s2993_s18  }
 0x1bc   : > { %p12_p4 = scmp.ge.s32.totalorder %s15_s18, 4  }
 0x1be   :  { %14 = sbr.rel (!%p12_p4) target bundleno = 1 (0x1), region = 70 }

// kernel: model3_forward.7
= control target key start
LH: loop header
LB: loop body
LE: loop exit
PB: predicated region body
PF: predicated region fallthrough
CT: control target
= control target key end

     0   :  { %vm190_vm0 = vcmask 588800   ;;  %vm245_vm1 = vcmask 1043456   ;;  %s1353_s1 = inlined_call_operand.vmem [shape: bf16[72,128], index: 1, kind: input, shape index: {}]   ;;  %s1354_s0 = inlined_call_operand.vmem [shape: bf16[288,72], index: 0, kind: input, shape index: {}]   ;;  %s1355_s2 = inlined_call_operand.vmem [shape: f32[1,128], index: 2, kind: input, shape index: {}]   ;;  %s1356_s3 = inlined_call_operand.vmem [shape: f32[1,128], index: 3, kind: input, shape index: {}]   ;;  %s1357_s4 = inlined_call_operand.vmem [shape: f32[1,128], index: 4, kind: input, shape index: {}]   ;;  %s1358_s5 = inlined_call_operand.vmem [shape: bf16[288,128], index: 5, kind: output, shape index: {}]  }
   0x1   :  { %v1036_v0 = vld [vmem:[%s1353_s1] sm:$0xff]   ;;  %v1037_v1 = vld [vmem:[%s1353_s1 + $0x8] sm:$0xff]   ;;  %v1038_v2 = vld [vmem:[%s1353_s1 + $0x10] sm:$0xff]  }
   0x2   :  { %978 = vmatprep.subr.bf16.mxu0 %v1036_v0  ;;  %1024 = vmatprep.subr.bf16.mxu1 %v1036_v0  ;;  %v1041_v3 = vld [vmem:[%s1354_s0] sm:$0xff]   ;;  %v1043_v4 = vld [vmem:[%s1354_s0 + $0x50] sm:$0xff]   ;;  %v1039_v5 = vld [vmem:[%s1353_s1 + $0x18] sm:$0xff]  }
   0x3   :  { %979 = vmatpush3.bf16.msra.mxu0 %v1036_v0  ;;  %1029 = vmatpush3.bf16.msra.mxu1 %v1036_v0  ;;  %v1040_v6 = vld [vmem:[%s1353_s1 + $0x20] ss:$0 sps:$4 sm:$0xff]   ;;  %v1042_v8 = vld [vmem:[%s1354_s0 + $0x8] sm:$0xff]   ;;  %v1044_v9 = vld [vmem:[%s1354_s0 + $0x58] sm:$0xff]  }
   0x4   :  { %980 = vmatprep.subr.bf16.mxu0 %v1037_v1  ;;  %1025 = vmatprep.subr.bf16.mxu1 %v1037_v1  ;;  %v247_v7 = vsel %vm245_vm1, %v1040_v6, 0  ;;  %v1045_v10 = vld [vmem:[%s1354_s0 + $0x10] sm:$0xff]   ;;  %v1047_v11 = vld [vmem:[%s1354_s0 + $0x60] sm:$0xff]   ;;  %v1046_v12 = vld [vmem:[%s1354_s0 + $0x18] sm:$0xff]  }
   0x5   :  { %988 = vmatprep.mubr.msk.bf16.mxu0 %vm190_vm0, %v1041_v3  ;;  %1008 = vmatprep.mubr.msk.bf16.mxu1 %vm190_vm0, %v1043_v4  ;;  %v1048_v13 = vld [vmem:[%s1354_s0 + $0x68] sm:$0xff]   ;;  %v1049_v14 = vld [vmem:[%s1354_s0 + $0x20] sm:$0xff]   ;;  %v1051_v15 = vld [vmem:[%s1354_s0 + $0x70] sm:$0xff]  }
   0x6   :  { %v1050_v16 = vld [vmem:[%s1354_s0 + $0x28] sm:$0xff]   ;;  %v1052_v17 = vld [vmem:[%s1354_s0 + $0x78] sm:$0xff]   ;;  %v1053_v18 = vld [vmem:[%s1354_s0 + $0x30] sm:$0xff]  }
   0x7   :  { %981 = vmatpush3.bf16.msra.mxu0 %v1037_v1  ;;  %1030 = vmatpush3.bf16.msra.mxu1 %v1037_v1  ;;  %v1055_v19 = vld [vmem:[%s1354_s0 + $0x80] sm:$0xff]   ;;  %v1054_v20 = vld [vmem:[%s1354_s0 + $0x38] sm:$0xff]   ;;  %v1056_v21 = vld [vmem:[%s1354_s0 + $0x88] sm:$0xff]  }
   0x8   :  { %982 = vmatprep.subr.bf16.mxu0 %v1038_v2  ;;  %1026 = vmatprep.subr.bf16.mxu1 %v1038_v2  ;;  %v1057_v22 = vld [vmem:[%s1354_s0 + $0x40] sm:$0xff]   ;;  %v1058_v23 = vld [vmem:[%s1354_s0 + $0x48] sm:$0xff]  }
   0x9   :  { %v1179_v24 = vld [vmem:[%s1355_s2] ss:$0 sm:$0xff] }
   0xa   :  { %v1186_v31 = vld [vmem:[%s1356_s3] ss:$0 sm:$0xff] }
   0xb   :  { %983 = vmatpush3.bf16.msra.mxu0 %v1038_v2  ;;  %1031 = vmatpush3.bf16.msra.mxu1 %v1038_v2  ;;  %v1195_v42 = vld [vmem:[%s1357_s4] ss:$0 sm:$0xff] }
   0xc   :  { %984 = vmatprep.subr.bf16.mxu0 %v1039_v5  ;;  %1027 = vmatprep.subr.bf16.mxu1 %v1039_v5 }
   0xf   :  { %985 = vmatpush3.bf16.msra.mxu0 %v1039_v5  ;;  %1032 = vmatpush3.bf16.msra.mxu1 %v1039_v5 }
  0x10   :  { %1034 = vmatprep.subr.msk.bf16.mxu0 %vm245_vm1, %v1040_v6  ;;  %1035 = vmatprep.subr.msk.bf16.mxu1 %vm245_vm1, %v1040_v6 }
  0x13   :  { %987 = vmatpush3.bf16.msra.mxu0 %v247_v7  ;;  %1033 = vmatpush3.bf16.msra.mxu1 %v247_v7 }
  0x16   :  { %989 = vmatmul.mubr.msk.bf16.vlgmr.msra.gmra.mrb[0].mxu0 %vm190_vm0, %v1042_v8  ;;  %1009 = vmatmul.mubr.msk.bf16.vlgmr.msra.gmra.mrb[0].mxu1 %vm190_vm0, %v1044_v9 }
  0x17   :  { %992 = vmatprep.mubr.msk.bf16.mxu0 %vm190_vm0, %v1045_v10  ;;  %1012 = vmatprep.mubr.msk.bf16.mxu1 %vm190_vm0, %v1047_v11 }
  0x1e   :  { %993 = vmatmul.mubr.msk.bf16.gmra.mrb[4].mxu0 %vm190_vm0, %v1046_v12  ;;  %1013 = vmatmul.mubr.msk.bf16.gmra.mrb[4].mxu1 %vm190_vm0, %v1048_v13 }
  0x1f   :  { %996 = vmatprep.mubr.msk.bf16.mxu0 %vm190_vm0, %v1049_v14  ;;  %1016 = vmatprep.mubr.msk.bf16.mxu1 %vm190_vm0, %v1051_v15 }
  0x26   :  { %997 = vmatmul.mubr.msk.bf16.gmra.mrb[8].mxu0 %vm190_vm0, %v1050_v16  ;;  %1017 = vmatmul.mubr.msk.bf16.gmra.mrb[8].mxu1 %vm190_vm0, %v1052_v17 }
  0x27   :  { %1000 = vmatprep.mubr.msk.bf16.mxu0 %vm190_vm0, %v1053_v18  ;;  %1020 = vmatprep.mubr.msk.bf16.mxu1 %vm190_vm0, %v1055_v19 }
  0x2e   :  { %1001 = vmatmul.mubr.msk.bf16.gmra.mrb[12].mxu0 %vm190_vm0, %v1054_v20  ;;  %1021 = vmatmul.mubr.msk.bf16.gmra.mrb[12].mxu1 %vm190_vm0, %v1056_v21 }
  0x2f   :  { %1004 = vmatprep.mubr.msk.bf16.mxu0 %vm190_vm0, %v1057_v22 }
  0x36   :  { %1005 = vmatmul.mubr.msk.bf16.gmra.mrb[16].mxu0 %vm190_vm0, %v1058_v23 }
  0xe9   :  { %v990_v25 = vpop.f32.mrb[0].mxu0  ;;  %v1010_v26 = vpop.f32.mrb[0].mxu1 }
  0xea   :  { %v292_v27 = vadd.f32 %v990_v25, %v1179_v24  ;;  %v283_v28 = vpop.f32.mrb[1].mxu0  ;;  %v372_v29 = vadd.f32 %v1010_v26, %v1179_v24  ;;  %v363_v30 = vpop.f32.mrb[1].mxu1 }
  0xeb   :  { %v284_v32 = vadd.f32 %v1179_v24, %v283_v28  ;;  %v991_v33 = vpop.f32.mrb[2].mxu0  ;;  %v364_v34 = vadd.f32 %v1179_v24, %v363_v30  ;;  %v1011_v35 = vpop.f32.mrb[2].mxu1 }
  0xec   :  { %v428_v36 = vmax.f32 %v292_v27, 0.0  ;;  %v295_v37 = vadd.f32 %v991_v33, %v1179_v24  ;;  %v286_v38 = vpop.f32.mrb[3].mxu0  ;;  %v448_v39 = vmax.f32 %v372_v29, 0.0  ;;  %v375_v40 = vadd.f32 %v1011_v35, %v1179_v24  ;;  %v366_v41 = vpop.f32.mrb[3].mxu1 }
  0xed   :  { %v426_v43 = vmax.f32 %v284_v32, 0.0  ;;  %v287_v44 = vadd.f32 %v1179_v24, %v286_v38  ;;  %v446_v45 = vmax.f32 %v364_v34, 0.0  ;;  %v367_v46 = vadd.f32 %v1179_v24, %v366_v41 }
  0xee   :  { %v471_v47 = vmul.f32 %v1186_v31, %v428_v36  ;;  %v429_v48 = vmax.f32 %v295_v37, 0.0  ;;  %v491_v49 = vmul.f32 %v1186_v31, %v448_v39  ;;  %v449_v50 = vmax.f32 %v375_v40, 0.0 }
  0xef   :  { %v469_v51 = vmul.f32 %v1186_v31, %v426_v43  ;;  %v427_v52 = vmax.f32 %v287_v44, 0.0  ;;  %v489_v53 = vmul.f32 %v1186_v31, %v446_v45  ;;  %v447_v54 = vmax.f32 %v367_v46, 0.0 }
  0xf0   :  { %v514_v55 = vadd.f32 %v1195_v42, %v471_v47  ;;  %v472_v56 = vmul.f32 %v1186_v31, %v429_v48  ;;  %v534_v57 = vadd.f32 %v1195_v42, %v491_v49  ;;  %v492_v58 = vmul.f32 %v1186_v31, %v449_v50 }
  0xf1   :  { %v512_v59 = vadd.f32 %v1195_v42, %v469_v51  ;;  %v470_v60 = vmul.f32 %v1186_v31, %v427_v52  ;;  %v532_v61 = vadd.f32 %v1195_v42, %v489_v53  ;;  %v994_v62 = vpop.f32.mrb[4].mxu0  ;;  %v490_v63 = vmul.f32 %v1186_v31, %v447_v54  ;;  %v1014_v0 = vpop.f32.mrb[4].mxu1 }
  0xf2   :  { %v515_v1 = vadd.f32 %v1195_v42, %v472_v56  ;;  %v535_v2 = vadd.f32 %v1195_v42, %v492_v58  ;;  %v308_v3 = vadd.f32 %v994_v62, %v1179_v24  ;;  %v299_v4 = vpop.f32.mrb[5].mxu0  ;;  %v388_v5 = vadd.f32 %v1014_v0, %v1179_v24  ;;  %v379_v6 = vpop.f32.mrb[5].mxu1 }
  0xf3   :  { %v513_v7 = vadd.f32 %v1195_v42, %v470_v60  ;;  %v533_v8 = vadd.f32 %v1195_v42, %v490_v63  ;;  %v300_v9 = vadd.f32 %v1179_v24, %v299_v4  ;;  %v995_v10 = vpop.f32.mrb[6].mxu0  ;;  %v380_v11 = vadd.f32 %v1179_v24, %v379_v6  ;;  %v1015_v12 = vpop.f32.mrb[6].mxu1 }
  0xf4   :  { %v856_v13 = vpack.c.bf16 %v515_v1, %v514_v55  ;;  %v906_v14 = vpack.c.bf16 %v535_v2, %v534_v57  ;;  %v432_v15 = vmax.f32 %v308_v3, 0.0  ;;  %v311_v16 = vadd.f32 %v995_v10, %v1179_v24  ;;  %v302_v17 = vpop.f32.mrb[7].mxu0  ;;  %v382_v18 = vpop.f32.mrb[7].mxu1 }
  0xf5   :  { %v851_v19 = vpack.c.bf16 %v513_v7, %v512_v59  ;;  %v901_v20 = vpack.c.bf16 %v533_v8, %v532_v61  ;;  %v430_v21 = vmax.f32 %v300_v9, 0.0  ;;  %v303_v22 = vadd.f32 %v1179_v24, %v302_v17 }
  0xf6   :  { %938 = vst [vmem:[%s1358_s5 + $0x8] sm:$0xff] %v856_v13   ;;  %948 = vst [vmem:[%s1358_s5 + $0x58] sm:$0xff] %v906_v14   ;;  %v475_v23 = vmul.f32 %v1186_v31, %v432_v15  ;;  %v433_v25 = vmax.f32 %v311_v16, 0.0  ;;  %v452_v26 = vmax.f32 %v388_v5, 0.0  ;;  %v450_v27 = vmax.f32 %v380_v11, 0.0 }
  0xf7   :  { %852 = vst [vmem:[%s1358_s5] sm:$0xff] %v851_v19   ;;  %947 = vst [vmem:[%s1358_s5 + $0x50] sm:$0xff] %v901_v20   ;;  %v473_v28 = vmul.f32 %v1186_v31, %v430_v21  ;;  %v431_v29 = vmax.f32 %v303_v22, 0.0  ;;  %v391_v30 = vadd.f32 %v1015_v12, %v1179_v24  ;;  %v383_v32 = vadd.f32 %v1179_v24, %v382_v18 }
  0xf8   :  { %v518_v33 = vadd.f32 %v1195_v42, %v475_v23  ;;  %v476_v34 = vmul.f32 %v1186_v31, %v433_v25  ;;  %v495_v35 = vmul.f32 %v1186_v31, %v452_v26  ;;  %v493_v36 = vmul.f32 %v1186_v31, %v450_v27 }
  0xf9   :  { %v516_v37 = vadd.f32 %v1195_v42, %v473_v28  ;;  %v474_v38 = vmul.f32 %v1186_v31, %v431_v29  ;;  %v453_v39 = vmax.f32 %v391_v30, 0.0  ;;  %v998_v40 = vpop.f32.mrb[8].mxu0  ;;  %v451_v41 = vmax.f32 %v383_v32, 0.0  ;;  %v1018_v43 = vpop.f32.mrb[8].mxu1 }
  0xfa   :  { %v519_v44 = vadd.f32 %v1195_v42, %v476_v34  ;;  %v538_v45 = vadd.f32 %v1195_v42, %v495_v35  ;;  %v536_v46 = vadd.f32 %v1195_v42, %v493_v36  ;;  %v324_v47 = vadd.f32 %v998_v40, %v1179_v24  ;;  %v315_v48 = vpop.f32.mrb[9].mxu0  ;;  %v395_v49 = vpop.f32.mrb[9].mxu1 }
  0xfb   :  { %v517_v50 = vadd.f32 %v1195_v42, %v474_v38  ;;  %v496_v51 = vmul.f32 %v1186_v31, %v453_v39  ;;  %v494_v52 = vmul.f32 %v1186_v31, %v451_v41  ;;  %v316_v53 = vadd.f32 %v1179_v24, %v315_v48  ;;  %v999_v54 = vpop.f32.mrb[10].mxu0  ;;  %v1019_v55 = vpop.f32.mrb[10].mxu1 }
  0xfc   :  { %v866_v56 = vpack.c.bf16 %v519_v44, %v518_v33  ;;  %v436_v57 = vmax.f32 %v324_v47, 0.0  ;;  %v327_v58 = vadd.f32 %v999_v54, %v1179_v24  ;;  %v318_v59 = vpop.f32.mrb[11].mxu0  ;;  %v404_v60 = vadd.f32 %v1018_v43, %v1179_v24  ;;  %v398_v61 = vpop.f32.mrb[11].mxu1 }
  0xfd   :  { %v861_v62 = vpack.c.bf16 %v517_v50, %v516_v37  ;;  %v539_v63 = vadd.f32 %v1195_v42, %v496_v51  ;;  %v537_v0 = vadd.f32 %v1195_v42, %v494_v52  ;;  %v434_v1 = vmax.f32 %v316_v53, 0.0 }
  0xfe   :  { %940 = vst [vmem:[%s1358_s5 + $0x18] sm:$0xff] %v866_v56   ;;  %v479_v2 = vmul.f32 %v1186_v31, %v436_v57  ;;  %v437_v3 = vmax.f32 %v327_v58, 0.0  ;;  %v319_v4 = vadd.f32 %v1179_v24, %v318_v59  ;;  %v456_v5 = vmax.f32 %v404_v60, 0.0 }
  0xff   :  { %939 = vst [vmem:[%s1358_s5 + $0x10] sm:$0xff] %v861_v62   ;;  %v916_v6 = vpack.c.bf16 %v539_v63, %v538_v45  ;;  %v911_v7 = vpack.c.bf16 %v537_v0, %v536_v46  ;;  %v477_v8 = vmul.f32 %v1186_v31, %v434_v1  ;;  %v396_v9 = vadd.f32 %v1179_v24, %v395_v49 }
 0x100   :  { %v522_v10 = vadd.f32 %v1195_v42, %v479_v2  ;;  %v480_v11 = vmul.f32 %v1186_v31, %v437_v3  ;;  %v435_v12 = vmax.f32 %v319_v4, 0.0  ;;  %v499_v13 = vmul.f32 %v1186_v31, %v456_v5 }
 0x101   :  { %950 = vst [vmem:[%s1358_s5 + $0x68] sm:$0xff] %v916_v6   ;;  %949 = vst [vmem:[%s1358_s5 + $0x60] sm:$0xff] %v911_v7   ;;  %v520_v14 = vadd.f32 %v1195_v42, %v477_v8  ;;  %v454_v15 = vmax.f32 %v396_v9, 0.0  ;;  %v407_v16 = vadd.f32 %v1019_v55, %v1179_v24  ;;  %v1002_v17 = vpop.f32.mrb[12].mxu0  ;;  %v399_v18 = vadd.f32 %v1179_v24, %v398_v61  ;;  %v1022_v19 = vpop.f32.mrb[12].mxu1 }
 0x102   :  { %v523_v20 = vadd.f32 %v1195_v42, %v480_v11  ;;  %v478_v21 = vmul.f32 %v1186_v31, %v435_v12  ;;  %v542_v22 = vadd.f32 %v1195_v42, %v499_v13  ;;  %v340_v23 = vadd.f32 %v1002_v17, %v1179_v24  ;;  %v331_v25 = vpop.f32.mrb[13].mxu0  ;;  %v411_v26 = vpop.f32.mrb[13].mxu1 }
 0x103   :  { %v497_v27 = vmul.f32 %v1186_v31, %v454_v15  ;;  %v457_v28 = vmax.f32 %v407_v16, 0.0  ;;  %v455_v29 = vmax.f32 %v399_v18, 0.0  ;;  %v332_v30 = vadd.f32 %v1179_v24, %v331_v25  ;;  %v1003_v32 = vpop.f32.mrb[14].mxu0  ;;  %v1023_v33 = vpop.f32.mrb[14].mxu1 }
 0x104   :  { %v876_v34 = vpack.c.bf16 %v523_v20, %v522_v10  ;;  %v521_v35 = vadd.f32 %v1195_v42, %v478_v21  ;;  %v440_v36 = vmax.f32 %v340_v23, 0.0  ;;  %v343_v37 = vadd.f32 %v1003_v32, %v1179_v24  ;;  %v334_v38 = vpop.f32.mrb[15].mxu0  ;;  %v414_v39 = vpop.f32.mrb[15].mxu1 }
 0x105   :  { %v540_v40 = vadd.f32 %v1195_v42, %v497_v27  ;;  %v500_v41 = vmul.f32 %v1186_v31, %v457_v28  ;;  %v498_v43 = vmul.f32 %v1186_v31, %v455_v29  ;;  %v438_v44 = vmax.f32 %v332_v30, 0.0 }
 0x106   :  { %942 = vst [vmem:[%s1358_s5 + $0x28] sm:$0xff] %v876_v34   ;;  %v871_v45 = vpack.c.bf16 %v521_v35, %v520_v14  ;;  %v483_v46 = vmul.f32 %v1186_v31, %v440_v36  ;;  %v441_v47 = vmax.f32 %v343_v37, 0.0  ;;  %v335_v48 = vadd.f32 %v1179_v24, %v334_v38 }
 0x107   :  { %v543_v49 = vadd.f32 %v1195_v42, %v500_v41  ;;  %v541_v50 = vadd.f32 %v1195_v42, %v498_v43  ;;  %v481_v51 = vmul.f32 %v1186_v31, %v438_v44  ;;  %v420_v52 = vadd.f32 %v1022_v19, %v1179_v24 }
 0x108   :  { %941 = vst [vmem:[%s1358_s5 + $0x20] sm:$0xff] %v871_v45   ;;  %v526_v53 = vadd.f32 %v1195_v42, %v483_v46  ;;  %v484_v54 = vmul.f32 %v1186_v31, %v441_v47  ;;  %v439_v55 = vmax.f32 %v335_v48, 0.0  ;;  %v412_v56 = vadd.f32 %v1179_v24, %v411_v26 }
 0x109   :  { %v926_v57 = vpack.c.bf16 %v543_v49, %v542_v22  ;;  %v921_v58 = vpack.c.bf16 %v541_v50, %v540_v40  ;;  %v524_v59 = vadd.f32 %v1195_v42, %v481_v51  ;;  %v460_v60 = vmax.f32 %v420_v52, 0.0  ;;  %v1006_v61 = vpop.f32.mrb[16].mxu0 }
 0x10a   :  { %v527_v62 = vadd.f32 %v1195_v42, %v484_v54  ;;  %v482_v63 = vmul.f32 %v1186_v31, %v439_v55  ;;  %v458_v0 = vmax.f32 %v412_v56, 0.0  ;;  %v423_v1 = vadd.f32 %v1023_v33, %v1179_v24  ;;  %v347_v2 = vpop.f32.mrb[17].mxu0 }
 0x10b   :  { %952 = vst [vmem:[%s1358_s5 + $0x78] sm:$0xff] %v926_v57   ;;  %951 = vst [vmem:[%s1358_s5 + $0x70] sm:$0xff] %v921_v58   ;;  %v503_v3 = vmul.f32 %v1186_v31, %v460_v60  ;;  %v356_v4 = vadd.f32 %v1006_v61, %v1179_v24  ;;  %v415_v5 = vadd.f32 %v1179_v24, %v414_v39  ;;  %v1007_v7 = vpop.f32.mrb[18].mxu0 }
 0x10c   :  { %v348_v6 = vadd.f32 %v1179_v24, %v347_v2  ;;  %v886_v8 = vpack.c.bf16 %v527_v62, %v526_v53  ;;  %v525_v9 = vadd.f32 %v1195_v42, %v482_v63  ;;  %v501_v10 = vmul.f32 %v1186_v31, %v458_v0  ;;  %v350_v12 = vpop.f32.mrb[19].mxu0 }
 0x10d   :  { %v461_v11 = vmax.f32 %v423_v1, 0.0  ;;  %v444_v13 = vmax.f32 %v356_v4, 0.0  ;;  %v459_v14 = vmax.f32 %v415_v5, 0.0  ;;  %v546_v17 = vadd.f32 %v1195_v42, %v503_v3 }
 0x10e   :  { %v442_v15 = vmax.f32 %v348_v6, 0.0  ;;  %944 = vst [vmem:[%s1358_s5 + $0x38] sm:$0xff] %v886_v8   ;;  %v881_v16 = vpack.c.bf16 %v525_v9, %v524_v59  ;;  %v359_v19 = vadd.f32 %v1007_v7, %v1179_v24  ;;  %v544_v20 = vadd.f32 %v1195_v42, %v501_v10 }
 0x10f   :  { %v504_v18 = vmul.f32 %v1186_v31, %v461_v11  ;;  %v502_v21 = vmul.f32 %v1186_v31, %v459_v14  ;;  %v351_v22 = vadd.f32 %v1179_v24, %v350_v12  ;;  %v487_v25 = vmul.f32 %v1186_v31, %v444_v13 }
 0x110   :  { %943 = vst [vmem:[%s1358_s5 + $0x30] sm:$0xff] %v881_v16   ;;  %v445_v26 = vmax.f32 %v359_v19, 0.0  ;;  %v485_v28 = vmul.f32 %v1186_v31, %v442_v15 }
 0x111   :  { %v547_v23 = vadd.f32 %v1195_v42, %v504_v18  ;;  %v545_v27 = vadd.f32 %v1195_v42, %v502_v21  ;;  %v443_v29 = vmax.f32 %v351_v22, 0.0  ;;  %v530_v34 = vadd.f32 %v1195_v42, %v487_v25 }
 0x112   :  { %v488_v32 = vmul.f32 %v1186_v31, %v445_v26  ;;  %v528_v36 = vadd.f32 %v1195_v42, %v485_v28 }
 0x113   :  { %v936_v30 = vpack.c.bf16 %v547_v23, %v546_v17  ;;  %v931_v33 = vpack.c.bf16 %v545_v27, %v544_v20  ;;  %v486_v24 = vmul.f32 %v1186_v31, %v443_v29 }
 0x114   :  { %v531_v35 = vadd.f32 %v1195_v42, %v488_v32 }
 0x115   :  { %954 = vst [vmem:[%s1358_s5 + $0x88] sm:$0xff] %v936_v30   ;;  %953 = vst [vmem:[%s1358_s5 + $0x80] sm:$0xff] %v931_v33   ;;  %v529_v37 = vadd.f32 %v1195_v42, %v486_v24 }
 0x116   :  { %v896_v38 = vpack.c.bf16 %v531_v35, %v530_v34 }
 0x117   :  { %v891_v39 = vpack.c.bf16 %v529_v37, %v528_v36 }
 0x118   :  { %946 = vst [vmem:[%s1358_s5 + $0x48] sm:$0xff] %v896_v38  }
 0x119   :  { %945 = vst [vmem:[%s1358_s5 + $0x40] sm:$0xff] %v891_v39  }

// kernel: model3_forward.8
= control target key start
LH: loop header
LB: loop body
LE: loop exit
PB: predicated region body
PF: predicated region fallthrough
CT: control target
= control target key end

     0   :  { %v868_v0 = vmov 0.0   ;;  %vm869_vm0 = vmmov 0   ;;  %vm214_vm1 = vcmask 1045504   ;;  %vm174_vm2 = vcmask 883712   ;;  %s1145_s1 = inlined_call_operand.vmem [shape: bf16[108,128], index: 1, kind: input, shape index: {}]   ;;  %s1146_s0 = inlined_call_operand.vmem [shape: bf16[208,108], index: 0, kind: input, shape index: {}]   ;;  %s1147_s2 = inlined_call_operand.vmem [shape: f32[1,128], index: 2, kind: input, shape index: {}]   ;;  %s1148_s3 = inlined_call_operand.vmem [shape: f32[1,128], index: 3, kind: input, shape index: {}]   ;;  %s1149_s4 = inlined_call_operand.vmem [shape: f32[1,128], index: 4, kind: input, shape index: {}]   ;;  %s1150_s5 = inlined_call_operand.vmem [shape: bf16[208,128], index: 5, kind: output, shape index: {}]  }
   0x1   :  { %766 = vmatprep.subr.bf16.mxu0 %v868_v0  ;;  %v848_v1 = vld [vmem:[%s1145_s1] sm:$0xff]   ;;  %832 = vmatprep.subr.bf16.mxu1 %v868_v0  ;;  %v849_v2 = vld [vmem:[%s1145_s1 + $0x8] sm:$0xff]   ;;  %v850_v3 = vld [vmem:[%s1145_s1 + $0x10] sm:$0xff]  }
   0x2   :  { %780 = vmatprep.mubr.msk.bf16.mxu0 %vm869_vm0, %v868_v0  ;;  %808 = vmatprep.mubr.msk.bf16.mxu1 %vm869_vm0, %v868_v0  ;;  %v851_v4 = vld [vmem:[%s1145_s1 + $0x18] sm:$0xff]   ;;  %v852_v5 = vld [vmem:[%s1145_s1 + $0x20] sm:$0xff]   ;;  %v853_v6 = vld [vmem:[%s1145_s1 + $0x28] sm:$0xff]  }
   0x3   :  { %767 = vmatpush3.bf16.msra.mxu0 %v848_v1  ;;  %839 = vmatpush3.bf16.msra.mxu1 %v848_v1  ;;  %v854_v7 = vld [vmem:[%s1145_s1 + $0x30] sm:$0x3f]   ;;  %v855_v9 = vld [vmem:[%s1146_s0] sm:$0xff]   ;;  %v856_v10 = vld [vmem:[%s1146_s0 + $0x38] sm:$0xff]  }
   0x4   :  { %768 = vmatprep.subr.bf16.mxu0 %v868_v0  ;;  %833 = vmatprep.subr.bf16.mxu1 %v868_v0  ;;  %v216_v8 = vsel %vm214_vm1, %v854_v7, 0  ;;  %v857_v11 = vld [vmem:[%s1146_s0 + $0x8] sm:$0xff]   ;;  %v858_v12 = vld [vmem:[%s1146_s0 + $0x40] sm:$0xff]   ;;  %v859_v13 = vld [vmem:[%s1146_s0 + $0x10] sm:$0xff]  }
   0x5   :  { %v860_v14 = vld [vmem:[%s1146_s0 + $0x48] sm:$0xff]   ;;  %v861_v15 = vld [vmem:[%s1146_s0 + $0x18] sm:$0xff]   ;;  %v862_v16 = vld [vmem:[%s1146_s0 + $0x50] sm:$0xff]  }
   0x6   :  { %v863_v17 = vld [vmem:[%s1146_s0 + $0x20] sm:$0xff]   ;;  %v864_v18 = vld [vmem:[%s1146_s0 + $0x58] sm:$0xff]   ;;  %v865_v19 = vld [vmem:[%s1146_s0 + $0x28] sm:$0xff]  }
   0x7   :  { %769 = vmatpush3.bf16.msra.mxu0 %v849_v2  ;;  %840 = vmatpush3.bf16.msra.mxu1 %v849_v2  ;;  %v866_v20 = vld [vmem:[%s1146_s0 + $0x60] sm:$0xff]   ;;  %v867_v21 = vld [vmem:[%s1146_s0 + $0x30] sm:$0xff]  }
   0x8   :  { %770 = vmatprep.subr.bf16.mxu0 %v868_v0  ;;  %834 = vmatprep.subr.bf16.mxu1 %v868_v0  ;;  %v1016_v22 = vld [vmem:[%s1147_s2] ss:$0 sm:$0xff] }
   0x9   :  { %v1023_v29 = vld [vmem:[%s1148_s3] ss:$0 sm:$0xff] }
   0xa   :  { %v1031_v39 = vld [vmem:[%s1149_s4] ss:$0 sm:$0xff] }
   0xb   :  { %771 = vmatpush3.bf16.msra.mxu0 %v850_v3  ;;  %841 = vmatpush3.bf16.msra.mxu1 %v850_v3 }
   0xc   :  { %772 = vmatprep.subr.bf16.mxu0 %v868_v0  ;;  %835 = vmatprep.subr.bf16.mxu1 %v868_v0 }
   0xf   :  { %773 = vmatpush3.bf16.msra.mxu0 %v851_v4  ;;  %842 = vmatpush3.bf16.msra.mxu1 %v851_v4 }
  0x10   :  { %774 = vmatprep.subr.bf16.mxu0 %v868_v0  ;;  %836 = vmatprep.subr.bf16.mxu1 %v868_v0 }
  0x13   :  { %775 = vmatpush3.bf16.msra.mxu0 %v852_v5  ;;  %843 = vmatpush3.bf16.msra.mxu1 %v852_v5 }
  0x14   :  { %776 = vmatprep.subr.bf16.mxu0 %v868_v0  ;;  %837 = vmatprep.subr.bf16.mxu1 %v868_v0 }
  0x17   :  { %777 = vmatpush3.bf16.msra.mxu0 %v853_v6  ;;  %844 = vmatpush3.bf16.msra.mxu1 %v853_v6 }
  0x18   :  { %778 = vmatprep.subr.bf16.mxu0 %v868_v0  ;;  %838 = vmatprep.subr.bf16.mxu1 %v868_v0 }
  0x1b   :  { %779 = vmatpush3.bf16.msra.mxu0 %v216_v8  ;;  %845 = vmatpush3.bf16.msra.mxu1 %v216_v8 }
  0x1e   :  { %781 = vmatmul.mubr.msk.bf16.vlgmr.msra.gmra.mrb[0].mxu0 %vm174_vm2, %v855_v9  ;;  %809 = vmatmul.mubr.msk.bf16.vlgmr.msra.gmra.mrb[0].mxu1 %vm174_vm2, %v856_v10 }
  0x1f   :  { %784 = vmatprep.mubr.msk.bf16.mxu0 %vm869_vm0, %v868_v0  ;;  %812 = vmatprep.mubr.msk.bf16.mxu1 %vm869_vm0, %v868_v0 }
  0x26   :  { %785 = vmatmul.mubr.msk.bf16.gmra.mrb[4].mxu0 %vm174_vm2, %v857_v11  ;;  %813 = vmatmul.mubr.msk.bf16.gmra.mrb[4].mxu1 %vm174_vm2, %v858_v12 }
  0x27   :  { %788 = vmatprep.mubr.msk.bf16.mxu0 %vm869_vm0, %v868_v0  ;;  %816 = vmatprep.mubr.msk.bf16.mxu1 %vm869_vm0, %v868_v0 }
  0x2e   :  { %789 = vmatmul.mubr.msk.bf16.gmra.mrb[8].mxu0 %vm174_vm2, %v859_v13  ;;  %817 = vmatmul.mubr.msk.bf16.gmra.mrb[8].mxu1 %vm174_vm2, %v860_v14 }
  0x2f   :  { %792 = vmatprep.mubr.msk.bf16.mxu0 %vm869_vm0, %v868_v0  ;;  %820 = vmatprep.mubr.msk.bf16.mxu1 %vm869_vm0, %v868_v0 }
  0x36   :  { %793 = vmatmul.mubr.msk.bf16.gmra.mrb[12].mxu0 %vm174_vm2, %v861_v15  ;;  %821 = vmatmul.mubr.msk.bf16.gmra.mrb[12].mxu1 %vm174_vm2, %v862_v16 }
  0x37   :  { %796 = vmatprep.mubr.msk.bf16.mxu0 %vm869_vm0, %v868_v0  ;;  %824 = vmatprep.mubr.msk.bf16.mxu1 %vm869_vm0, %v868_v0 }
  0x3e   :  { %797 = vmatmul.mubr.msk.bf16.gmra.mrb[16].mxu0 %vm174_vm2, %v863_v17  ;;  %825 = vmatmul.mubr.msk.bf16.gmra.mrb[16].mxu1 %vm174_vm2, %v864_v18 }
  0x3f   :  { %800 = vmatprep.mubr.msk.bf16.mxu0 %vm869_vm0, %v868_v0  ;;  %828 = vmatprep.mubr.msk.bf16.mxu1 %vm869_vm0, %v868_v0 }
  0x46   :  { %801 = vmatmul.mubr.msk.bf16.gmra.mrb[20].mxu0 %vm174_vm2, %v865_v19  ;;  %829 = vmatmul.mubr.msk.bf16.gmra.mrb[20].mxu1 %vm174_vm2, %v866_v20 }
  0x47   :  { %804 = vmatprep.mubr.msk.bf16.mxu0 %vm869_vm0, %v868_v0 }
  0x4e   :  { %805 = vmatmul.mubr.msk.bf16.gmra.mrb[24].mxu0 %vm174_vm2, %v867_v21 }
  0xf1   :  { %v252_v23 = vpop.f32.mrb[0].mxu0  ;;  %v308_v24 = vpop.f32.mrb[0].mxu1 }
  0xf2   :  { %v253_v25 = vadd.f32 %v1016_v22, %v252_v23  ;;  %v782_v26 = vpop.f32.mrb[1].mxu0  ;;  %v309_v27 = vadd.f32 %v1016_v22, %v308_v24  ;;  %v810_v28 = vpop.f32.mrb[1].mxu1 }
  0xf3   :  { %v255_v30 = vpop.f32.mrb[2].mxu0  ;;  %v311_v31 = vpop.f32.mrb[2].mxu1 }
  0xf4   :  { %v355_v32 = vmax.f32 %v253_v25, 0.0  ;;  %v256_v33 = vadd.f32 %v1016_v22, %v255_v30  ;;  %v783_v34 = vpop.f32.mrb[3].mxu0  ;;  %v369_v35 = vmax.f32 %v309_v27, 0.0  ;;  %v312_v36 = vadd.f32 %v1016_v22, %v311_v31  ;;  %v811_v37 = vpop.f32.mrb[3].mxu1 }
  0xf6   :  { %v388_v38 = vmul.f32 %v1023_v29, %v355_v32  ;;  %v356_v40 = vmax.f32 %v256_v33, 0.0  ;;  %v402_v41 = vmul.f32 %v1023_v29, %v369_v35  ;;  %v370_v42 = vmax.f32 %v312_v36, 0.0 }
  0xf8   :  { %v389_v43 = vmul.f32 %v1023_v29, %v356_v40  ;;  %v435_v44 = vadd.f32 %v1031_v39, %v402_v41  ;;  %v403_v45 = vmul.f32 %v1023_v29, %v370_v42  ;;  %v421_v46 = vadd.f32 %v1031_v39, %v388_v38 }
  0xf9   :  { %v260_v47 = vpop.f32.mrb[4].mxu0  ;;  %v316_v48 = vpop.f32.mrb[4].mxu1 }
  0xfa   :  { %v422_v49 = vadd.f32 %v1031_v39, %v389_v43  ;;  %v436_v50 = vadd.f32 %v1031_v39, %v403_v45  ;;  %v261_v51 = vadd.f32 %v1016_v22, %v260_v47  ;;  %v786_v52 = vpop.f32.mrb[5].mxu0  ;;  %v317_v53 = vadd.f32 %v1016_v22, %v316_v48  ;;  %v814_v54 = vpop.f32.mrb[5].mxu1 }
  0xfb   :  { %v263_v55 = vpop.f32.mrb[6].mxu0  ;;  %v319_v56 = vpop.f32.mrb[6].mxu1 }
  0xfc   :  { %v672_v57 = vpack.c.bf16 %v422_v49, %v421_v46  ;;  %v707_v58 = vpack.c.bf16 %v436_v50, %v435_v44  ;;  %v357_v59 = vmax.f32 %v261_v51, 0.0  ;;  %v264_v60 = vadd.f32 %v1016_v22, %v263_v55  ;;  %v787_v61 = vpop.f32.mrb[7].mxu0  ;;  %v815_v62 = vpop.f32.mrb[7].mxu1 }
  0xfd   :  { %v371_v63 = vmax.f32 %v317_v53, 0.0  ;;  %v320_v0 = vadd.f32 %v1016_v22, %v319_v56 }
  0xfe   :  { %673 = vst [vmem:[%s1150_s5] sm:$0xff] %v672_v57   ;;  %740 = vst [vmem:[%s1150_s5 + $0x38] sm:$0xff] %v707_v58   ;;  %v390_v1 = vmul.f32 %v1023_v29, %v357_v59  ;;  %v358_v2 = vmax.f32 %v264_v60, 0.0 }
  0xff   :  { %v404_v3 = vmul.f32 %v1023_v29, %v371_v63  ;;  %v372_v4 = vmax.f32 %v320_v0, 0.0 }
 0x100   :  { %v391_v5 = vmul.f32 %v1023_v29, %v358_v2  ;;  %v423_v10 = vadd.f32 %v1031_v39, %v390_v1 }
 0x101   :  { %v437_v6 = vadd.f32 %v1031_v39, %v404_v3  ;;  %v405_v7 = vmul.f32 %v1023_v29, %v372_v4  ;;  %v268_v8 = vpop.f32.mrb[8].mxu0  ;;  %v324_v9 = vpop.f32.mrb[8].mxu1 }
 0x102   :  { %v424_v11 = vadd.f32 %v1031_v39, %v391_v5  ;;  %v269_v12 = vadd.f32 %v1016_v22, %v268_v8  ;;  %v790_v13 = vpop.f32.mrb[9].mxu0  ;;  %v325_v14 = vadd.f32 %v1016_v22, %v324_v9  ;;  %v818_v15 = vpop.f32.mrb[9].mxu1 }
 0x103   :  { %v438_v16 = vadd.f32 %v1031_v39, %v405_v7  ;;  %v271_v17 = vpop.f32.mrb[10].mxu0  ;;  %v327_v18 = vpop.f32.mrb[10].mxu1 }
 0x104   :  { %v677_v19 = vpack.c.bf16 %v424_v11, %v423_v10  ;;  %v359_v20 = vmax.f32 %v269_v12, 0.0  ;;  %v272_v21 = vadd.f32 %v1016_v22, %v271_v17  ;;  %v791_v23 = vpop.f32.mrb[11].mxu0  ;;  %v373_v24 = vmax.f32 %v325_v14, 0.0  ;;  %v819_v25 = vpop.f32.mrb[11].mxu1 }
 0x105   :  { %v712_v26 = vpack.c.bf16 %v438_v16, %v437_v6  ;;  %v328_v27 = vadd.f32 %v1016_v22, %v327_v18 }
 0x106   :  { %734 = vst [vmem:[%s1150_s5 + $0x8] sm:$0xff] %v677_v19   ;;  %v392_v28 = vmul.f32 %v1023_v29, %v359_v20  ;;  %v360_v30 = vmax.f32 %v272_v21, 0.0  ;;  %v406_v31 = vmul.f32 %v1023_v29, %v373_v24 }
 0x107   :  { %741 = vst [vmem:[%s1150_s5 + $0x40] sm:$0xff] %v712_v26   ;;  %v374_v32 = vmax.f32 %v328_v27, 0.0 }
 0x108   :  { %v393_v33 = vmul.f32 %v1023_v29, %v360_v30  ;;  %v439_v34 = vadd.f32 %v1031_v39, %v406_v31  ;;  %v425_v38 = vadd.f32 %v1031_v39, %v392_v28 }
 0x109   :  { %v407_v35 = vmul.f32 %v1023_v29, %v374_v32  ;;  %v276_v36 = vpop.f32.mrb[12].mxu0  ;;  %v332_v37 = vpop.f32.mrb[12].mxu1 }
 0x10a   :  { %v426_v40 = vadd.f32 %v1031_v39, %v393_v33  ;;  %v277_v41 = vadd.f32 %v1016_v22, %v276_v36  ;;  %v794_v42 = vpop.f32.mrb[13].mxu0  ;;  %v333_v43 = vadd.f32 %v1016_v22, %v332_v37  ;;  %v822_v44 = vpop.f32.mrb[13].mxu1 }
 0x10b   :  { %v440_v45 = vadd.f32 %v1031_v39, %v407_v35  ;;  %v279_v46 = vpop.f32.mrb[14].mxu0  ;;  %v335_v47 = vpop.f32.mrb[14].mxu1 }
 0x10c   :  { %v682_v48 = vpack.c.bf16 %v426_v40, %v425_v38  ;;  %v361_v49 = vmax.f32 %v277_v41, 0.0  ;;  %v280_v50 = vadd.f32 %v1016_v22, %v279_v46  ;;  %v795_v51 = vpop.f32.mrb[15].mxu0  ;;  %v375_v52 = vmax.f32 %v333_v43, 0.0  ;;  %v823_v53 = vpop.f32.mrb[15].mxu1 }
 0x10d   :  { %v717_v54 = vpack.c.bf16 %v440_v45, %v439_v34  ;;  %v336_v55 = vadd.f32 %v1016_v22, %v335_v47 }
 0x10e   :  { %735 = vst [vmem:[%s1150_s5 + $0x10] sm:$0xff] %v682_v48   ;;  %v394_v56 = vmul.f32 %v1023_v29, %v361_v49  ;;  %v362_v57 = vmax.f32 %v280_v50, 0.0  ;;  %v408_v58 = vmul.f32 %v1023_v29, %v375_v52 }
 0x10f   :  { %742 = vst [vmem:[%s1150_s5 + $0x48] sm:$0xff] %v717_v54   ;;  %v376_v59 = vmax.f32 %v336_v55, 0.0 }
 0x110   :  { %v395_v60 = vmul.f32 %v1023_v29, %v362_v57  ;;  %v441_v61 = vadd.f32 %v1031_v39, %v408_v58  ;;  %v427_v1 = vadd.f32 %v1031_v39, %v394_v56 }
 0x111   :  { %v409_v62 = vmul.f32 %v1023_v29, %v376_v59  ;;  %v284_v63 = vpop.f32.mrb[16].mxu0  ;;  %v340_v0 = vpop.f32.mrb[16].mxu1 }
 0x112   :  { %v428_v2 = vadd.f32 %v1031_v39, %v395_v60  ;;  %v285_v3 = vadd.f32 %v1016_v22, %v284_v63  ;;  %v798_v4 = vpop.f32.mrb[17].mxu0  ;;  %v341_v5 = vadd.f32 %v1016_v22, %v340_v0  ;;  %v826_v6 = vpop.f32.mrb[17].mxu1 }
 0x113   :  { %v442_v7 = vadd.f32 %v1031_v39, %v409_v62  ;;  %v287_v8 = vpop.f32.mrb[18].mxu0  ;;  %v343_v9 = vpop.f32.mrb[18].mxu1 }
 0x114   :  { %v687_v10 = vpack.c.bf16 %v428_v2, %v427_v1  ;;  %v363_v11 = vmax.f32 %v285_v3, 0.0  ;;  %v288_v12 = vadd.f32 %v1016_v22, %v287_v8  ;;  %v799_v13 = vpop.f32.mrb[19].mxu0  ;;  %v377_v14 = vmax.f32 %v341_v5, 0.0  ;;  %v827_v15 = vpop.f32.mrb[19].mxu1 }
 0x115   :  { %v722_v16 = vpack.c.bf16 %v442_v7, %v441_v61  ;;  %v344_v17 = vadd.f32 %v1016_v22, %v343_v9 }
 0x116   :  { %736 = vst [vmem:[%s1150_s5 + $0x18] sm:$0xff] %v687_v10   ;;  %v396_v18 = vmul.f32 %v1023_v29, %v363_v11  ;;  %v364_v19 = vmax.f32 %v288_v12, 0.0  ;;  %v410_v20 = vmul.f32 %v1023_v29, %v377_v14 }
 0x117   :  { %743 = vst [vmem:[%s1150_s5 + $0x50] sm:$0xff] %v722_v16   ;;  %v378_v21 = vmax.f32 %v344_v17, 0.0 }
 0x118   :  { %v397_v23 = vmul.f32 %v1023_v29, %v364_v19  ;;  %v443_v24 = vadd.f32 %v1031_v39, %v410_v20  ;;  %v429_v28 = vadd.f32 %v1031_v39, %v396_v18 }
 0x119   :  { %v411_v25 = vmul.f32 %v1023_v29, %v378_v21  ;;  %v292_v26 = vpop.f32.mrb[20].mxu0  ;;  %v348_v27 = vpop.f32.mrb[20].mxu1 }
 0x11a   :  { %v430_v30 = vadd.f32 %v1031_v39, %v397_v23  ;;  %v293_v31 = vadd.f32 %v1016_v22, %v292_v26  ;;  %v802_v32 = vpop.f32.mrb[21].mxu0  ;;  %v349_v33 = vadd.f32 %v1016_v22, %v348_v27  ;;  %v830_v34 = vpop.f32.mrb[21].mxu1 }
 0x11b   :  { %v444_v35 = vadd.f32 %v1031_v39, %v411_v25  ;;  %v295_v36 = vpop.f32.mrb[22].mxu0  ;;  %v351_v37 = vpop.f32.mrb[22].mxu1 }
 0x11c   :  { %v692_v38 = vpack.c.bf16 %v430_v30, %v429_v28  ;;  %v365_v40 = vmax.f32 %v293_v31, 0.0  ;;  %v296_v41 = vadd.f32 %v1016_v22, %v295_v36  ;;  %v803_v42 = vpop.f32.mrb[23].mxu0  ;;  %v379_v43 = vmax.f32 %v349_v33, 0.0  ;;  %v831_v44 = vpop.f32.mrb[23].mxu1 }
 0x11d   :  { %v727_v45 = vpack.c.bf16 %v444_v35, %v443_v24  ;;  %v352_v46 = vadd.f32 %v1016_v22, %v351_v37 }
 0x11e   :  { %737 = vst [vmem:[%s1150_s5 + $0x20] sm:$0xff] %v692_v38   ;;  %v398_v47 = vmul.f32 %v1023_v29, %v365_v40  ;;  %v366_v48 = vmax.f32 %v296_v41, 0.0  ;;  %v412_v49 = vmul.f32 %v1023_v29, %v379_v43 }
 0x11f   :  { %744 = vst [vmem:[%s1150_s5 + $0x58] sm:$0xff] %v727_v45   ;;  %v380_v50 = vmax.f32 %v352_v46, 0.0 }
 0x120   :  { %v399_v51 = vmul.f32 %v1023_v29, %v366_v48  ;;  %v445_v52 = vadd.f32 %v1031_v39, %v412_v49  ;;  %v431_v55 = vadd.f32 %v1031_v39, %v398_v47 }
 0x121   :  { %v413_v53 = vmul.f32 %v1023_v29, %v380_v50  ;;  %v300_v54 = vpop.f32.mrb[24].mxu0 }
 0x122   :  { %v432_v56 = vadd.f32 %v1031_v39, %v399_v51  ;;  %v301_v57 = vadd.f32 %v1016_v22, %v300_v54  ;;  %v806_v58 = vpop.f32.mrb[25].mxu0 }
 0x123   :  { %v446_v59 = vadd.f32 %v1031_v39, %v413_v53  ;;  %v303_v60 = vpop.f32.mrb[26].mxu0 }
 0x124   :  { %v697_v61 = vpack.c.bf16 %v432_v56, %v431_v55  ;;  %v367_v62 = vmax.f32 %v301_v57, 0.0  ;;  %v304_v63 = vadd.f32 %v1016_v22, %v303_v60  ;;  %v807_v0 = vpop.f32.mrb[27].mxu0 }
 0x125   :  { %v732_v1 = vpack.c.bf16 %v446_v59, %v445_v52 }
 0x126   :  { %738 = vst [vmem:[%s1150_s5 + $0x28] sm:$0xff] %v697_v61   ;;  %v400_v2 = vmul.f32 %v1023_v29, %v367_v62  ;;  %v368_v3 = vmax.f32 %v304_v63, 0.0 }
 0x127   :  { %745 = vst [vmem:[%s1150_s5 + $0x60] sm:$0xff] %v732_v1  }
 0x128   :  { %v401_v4 = vmul.f32 %v1023_v29, %v368_v3  ;;  %v433_v5 = vadd.f32 %v1031_v39, %v400_v2 }
 0x12a   :  { %v434_v6 = vadd.f32 %v1031_v39, %v401_v4 }
 0x12c   :  { %v702_v22 = vpack.c.bf16 %v434_v6, %v433_v5 }
 0x12e   :  { %739 = vst [vmem:[%s1150_s5 + $0x30] sm:$0xff] %v702_v22  }

// kernel: model3_forward.9
= control target key start
LH: loop header
LB: loop body
LE: loop exit
PB: predicated region body
PF: predicated region fallthrough
CT: control target
= control target key end

     0   :  { %v596_v0 = vmov 0   ;;  %vm160_vm0 = vcmask 130048   ;;  %v597_v21 = vmov 0.0   ;;  %vm598_vm1 = vmmov 0   ;;  %s784_s1 = inlined_call_operand.vmem [shape: bf16[144,128], index: 1, kind: input, shape index: {}]   ;;  %s785_s0 = inlined_call_operand.vmem [shape: bf16[72,144], index: 0, kind: input, shape index: {}]   ;;  %s786_s6 = inlined_call_operand.vmem [shape: bf16[128,128], index: 6, kind: input, shape index: {}]   ;;  %s787_s2 = inlined_call_operand.vmem [shape: f32[1,128], index: 2, kind: input, shape index: {}]   ;;  %s788_s3 = inlined_call_operand.vmem [shape: f32[1,128], index: 3, kind: input, shape index: {}]   ;;  %s789_s4 = inlined_call_operand.vmem [shape: f32[1,128], index: 4, kind: input, shape index: {}]   ;;  %s790_s5 = inlined_call_operand.vmem [shape: bf16[8,72], index: 5, kind: input, shape index: {}]   ;;  %s791_s7 = inlined_call_operand.vmem [shape: f32[1,128], index: 7, kind: input, shape index: {}]   ;;  %s792_s8 = inlined_call_operand.vmem [shape: f32[8,128], index: 8, kind: output, shape index: {}]  }
   0x1   :  { %176 = vmatprep.subr.bf16.mxu0 %v596_v0  ;;  %v561_v1 = vld [vmem:[%s784_s1] sm:$0xff]   ;;  %v562_v2 = vld [vmem:[%s784_s1 + $0x8] sm:$0xff]   ;;  %v563_v3 = vld [vmem:[%s784_s1 + $0x10] sm:$0xff]   ;;  %524 = vmatprep.subr.bf16.mxu1 %v597_v21  ;;  %vm299_vm2 = vcmask 1043456   ;;  %vm295_vm3 = vcmask 588800  }
   0x2   :  { %177 = vmatpush1.bf16.msra.mxu0 %v561_v1  ;;  %v564_v4 = vld [vmem:[%s784_s1 + $0x18] sm:$0xff]   ;;  %v572_v5 = vld [vmem:[%s785_s0 + $0x4] ss:$8 sps:$4 sm:$0xff]   ;;  %v567_v8 = vld [vmem:[%s784_s1 + $0x30] sm:$0xff]   ;;  %534 = vmatprep.mubr.msk.bf16.mxu1 %vm598_vm1, %v597_v21 }
   0x3   :  { %178 = vmatprep.subr.bf16.mxu0 %v596_v0  ;;  %492 = vmatprep.mubr.msk.bf16.mxu0 %vm160_vm0, %v572_v5  ;;  %v565_v6 = vld [vmem:[%s784_s1 + $0x20] sm:$0xff]   ;;  %v566_v7 = vld [vmem:[%s784_s1 + $0x28] sm:$0xff]   ;;  %v568_v9 = vld [vmem:[%s784_s1 + $0x38] sm:$0xff]  }
   0x4   :  { %v569_v10 = vld [vmem:[%s784_s1 + $0x40] sm:$0xff]   ;;  %v573_v12 = vld [vmem:[%s785_s0 + $0x14] ss:$8 sps:$4 sm:$0xff]   ;;  %v575_v13 = vld [vmem:[%s785_s0 + $0x10] ss:$8 sps:$4 sm:$0xff]  }
   0x5   :  { %v570_v11 = vld [vmem:[%s785_s0] ss:$8 sps:$4 sm:$0xff]   ;;  %v576_v14 = vld [vmem:[%s785_s0 + $0x24] ss:$8 sps:$4 sm:$0xff]   ;;  %v579_v16 = vld [vmem:[%s785_s0 + $0x34] ss:$8 sps:$4 sm:$0xff]  }
   0x6   :  { %179 = vmatpush1.bf16.msra.mxu0 %v562_v2  ;;  %v578_v15 = vld [vmem:[%s785_s0 + $0x20] ss:$8 sps:$4 sm:$0xff]   ;;  %v581_v18 = vld [vmem:[%s785_s0 + $0x30] ss:$8 sps:$4 sm:$0xff]  }
   0x7   :  { %180 = vmatprep.subr.bf16.mxu0 %v596_v0  ;;  %v38_v17 = vld [vmem:[%s785_s0 + $0x40] sm:$0xff] }
   0x8   :  { %v482_v19 = vcombine.high %v38_v17, %v38_v17  ;;  %v481_v20 = vcombine.low %v38_v17, %v38_v17  ;;  %v709_v22 = vld [vmem:[%s787_s2] ss:$0 sm:$0xff] }
   0x9   :  { %v715_v26 = vld [vmem:[%s788_s3] ss:$0 sm:$0xff] }
   0xa   :  { %181 = vmatpush1.bf16.msra.mxu0 %v563_v3  ;;  %v498_v33 = vld [vmem:[%s789_s4] ss:$0 sm:$0xff] }
   0xb   :  { %182 = vmatprep.subr.bf16.mxu0 %v596_v0 }
   0xe   :  { %183 = vmatpush1.bf16.msra.mxu0 %v564_v4 }
   0xf   :  { %184 = vmatprep.subr.bf16.mxu0 %v596_v0 }
  0x12   :  { %185 = vmatpush1.bf16.msra.mxu0 %v565_v6 }
  0x13   :  { %186 = vmatprep.subr.bf16.mxu0 %v596_v0 }
  0x16   :  { %187 = vmatpush1.bf16.msra.mxu0 %v566_v7 }
  0x17   :  { %188 = vmatprep.subr.bf16.mxu0 %v596_v0 }
  0x1a   :  { %189 = vmatpush1.bf16.msra.mxu0 %v567_v8 }
  0x1b   :  { %190 = vmatprep.subr.bf16.mxu0 %v596_v0 }
  0x1e   :  { %191 = vmatpush1.bf16.msra.mxu0 %v568_v9 }
  0x1f   :  { %192 = vmatprep.subr.bf16.mxu0 %v596_v0 }
  0x22   :  { %193 = vmatpush1.bf16.msra.mxu0 %v569_v10 }
  0x25   :  { %209 = vmatmul.mubr.bf16.vlgmr.msra.gmra.mrb[0].mxu0 %v570_v11 }
  0x26   :  { %493 = vmatprep.mubr.msk.bf16.mxu0 %vm160_vm0, %v573_v12 }
  0x2d   :  { %217 = vmatmul.mubr.bf16.gmra.mrb[4].mxu0 %v575_v13 }
  0x2e   :  { %494 = vmatprep.mubr.msk.bf16.mxu0 %vm160_vm0, %v576_v14 }
  0x35   :  { %225 = vmatmul.mubr.bf16.gmra.mrb[8].mxu0 %v578_v15 }
  0x36   :  { %495 = vmatprep.mubr.msk.bf16.mxu0 %vm160_vm0, %v579_v16 }
  0x3d   :  { %233 = vmatmul.mubr.bf16.gmra.mrb[12].mxu0 %v581_v18 }
  0x3e   :  { %496 = vmatprep.mubr.msk.bf16.mxu0 %vm160_vm0, %v482_v19 }
  0x45   :  { %241 = vmatmul.mubr.bf16.gmra.mrb[16].mxu0 %v481_v20 }
  0xf8   :  { %v210_v23 = vpop.f32.mrb[0].mxu0 }
  0xf9   :  { %v211_v24 = vadd.f32 %v709_v22, %v210_v23  ;;  %v212_v25 = vpop.f32.mrb[1].mxu0 }
  0xfa   :  { %v213_v27 = vpop.f32.mrb[2].mxu0  ;;  %v289_v25 = vld [vmem:[%s790_s5] sm:$0xf] }
  0xfb   :  { %v248_v28 = vmax.f32 %v211_v24, 0.0  ;;  %v214_v29 = vadd.f32 %v709_v22, %v213_v27  ;;  %v215_v30 = vpop.f32.mrb[3].mxu0  ;;  %v586_v27 = vld [vmem:[%s786_s6 + $0x10] sm:$0xff]  }
  0xfc   :  { %v589_v30 = vld [vmem:[%s786_s6 + $0x28] sm:$0xff]  }
  0xfd   :  { %v264_v31 = vmul.f32 %v715_v26, %v248_v28  ;;  %v249_v32 = vmax.f32 %v214_v29, 0.0  ;;  %v587_v28 = vld [vmem:[%s786_s6 + $0x18] sm:$0xff]   ;;  %v588_v29 = vld [vmem:[%s786_s6 + $0x20] sm:$0xff]  }
  0xff   :  { %v265_v34 = vmul.f32 %v715_v26, %v249_v32  ;;  %v280_v38 = vadd.f32 %v498_v33, %v264_v31  ;;  %v590_v31 = vld [vmem:[%s786_s6 + $0x30] sm:$0xff]   ;;  %v591_v32 = vld [vmem:[%s786_s6 + $0x38] sm:$0xff]  }
 0x100   :  { %v218_v35 = vpop.f32.mrb[4].mxu0 }
 0x101   :  { %v219_v36 = vadd.f32 %v709_v22, %v218_v35  ;;  %v220_v37 = vpop.f32.mrb[5].mxu0  ;;  %v281_v39 = vadd.f32 %v498_v33, %v265_v34 }
 0x102   :  { %v221_v40 = vpop.f32.mrb[6].mxu0 }
 0x103   :  { %v250_v41 = vmax.f32 %v219_v36, 0.0  ;;  %v222_v42 = vadd.f32 %v709_v22, %v221_v40  ;;  %v223_v43 = vpop.f32.mrb[7].mxu0  ;;  %v290_v44 = vpack.c.bf16 %v281_v39, %v280_v38  ;;  %v500_v39 = vld [vmem:[%s791_s7] ss:$0 sm:$0xff] }
 0x105   :  { %v266_v45 = vmul.f32 %v715_v26, %v250_v41  ;;  %v251_v46 = vmax.f32 %v222_v42, 0.0  ;;  %525 = vmatpush3.bf16.msra.mxu1 %v290_v44 }
 0x106   :  { %526 = vmatprep.subr.bf16.mxu1 %v597_v21 }
 0x107   :  { %v267_v47 = vmul.f32 %v715_v26, %v251_v46  ;;  %v282_v49 = vadd.f32 %v498_v33, %v266_v45 }
 0x108   :  { %v226_v48 = vpop.f32.mrb[8].mxu0 }
 0x109   :  { %v283_v50 = vadd.f32 %v498_v33, %v267_v47  ;;  %v227_v51 = vadd.f32 %v709_v22, %v226_v48  ;;  %v228_v52 = vpop.f32.mrb[9].mxu0 }
 0x10a   :  { %v229_v53 = vpop.f32.mrb[10].mxu0 }
 0x10b   :  { %v252_v54 = vmax.f32 %v227_v51, 0.0  ;;  %v230_v55 = vadd.f32 %v709_v22, %v229_v53  ;;  %v231_v56 = vpop.f32.mrb[11].mxu0  ;;  %v291_v57 = vpack.c.bf16 %v283_v50, %v282_v49 }
 0x10d   :  { %v268_v58 = vmul.f32 %v715_v26, %v252_v54  ;;  %v253_v59 = vmax.f32 %v230_v55, 0.0  ;;  %527 = vmatpush3.bf16.msra.mxu1 %v291_v57 }
 0x10e   :  { %528 = vmatprep.subr.bf16.mxu1 %v597_v21 }
 0x10f   :  { %v269_v60 = vmul.f32 %v715_v26, %v253_v59  ;;  %v284_v62 = vadd.f32 %v498_v33, %v268_v58 }
 0x110   :  { %v234_v61 = vpop.f32.mrb[12].mxu0 }
 0x111   :  { %v285_v63 = vadd.f32 %v498_v33, %v269_v60  ;;  %v235_v0 = vadd.f32 %v709_v22, %v234_v61  ;;  %v236_v1 = vpop.f32.mrb[13].mxu0 }
 0x112   :  { %v237_v2 = vpop.f32.mrb[14].mxu0 }
 0x113   :  { %v254_v3 = vmax.f32 %v235_v0, 0.0  ;;  %v238_v4 = vadd.f32 %v709_v22, %v237_v2  ;;  %v239_v5 = vpop.f32.mrb[15].mxu0  ;;  %v292_v6 = vpack.c.bf16 %v285_v63, %v284_v62 }
 0x115   :  { %v270_v7 = vmul.f32 %v715_v26, %v254_v3  ;;  %v255_v8 = vmax.f32 %v238_v4, 0.0  ;;  %529 = vmatpush3.bf16.msra.mxu1 %v292_v6 }
 0x116   :  { %530 = vmatprep.subr.bf16.mxu1 %v597_v21 }
 0x117   :  { %v271_v9 = vmul.f32 %v715_v26, %v255_v8  ;;  %v286_v11 = vadd.f32 %v498_v33, %v270_v7 }
 0x118   :  { %v242_v10 = vpop.f32.mrb[16].mxu0 }
 0x119   :  { %v287_v12 = vadd.f32 %v498_v33, %v271_v9  ;;  %v243_v13 = vadd.f32 %v709_v22, %v242_v10  ;;  %v244_v14 = vpop.f32.mrb[17].mxu0  ;;  %v584_v22 = vld [vmem:[%s786_s6] sm:$0xff]  }
 0x11a   :  { %v245_v15 = vpop.f32.mrb[18].mxu0 }
 0x11b   :  { %v256_v16 = vmax.f32 %v243_v13, 0.0  ;;  %v246_v17 = vpop.f32.mrb[19].mxu0  ;;  %v293_v18 = vpack.c.bf16 %v287_v12, %v286_v11 }
 0x11d   :  { %v272_v19 = vmul.f32 %v715_v26, %v256_v16  ;;  %531 = vmatpush3.bf16.msra.mxu1 %v293_v18  ;;  %v585_v26 = vld [vmem:[%s786_s6 + $0x8] sm:$0xff]  }
 0x11e   :  { %532 = vmatprep.subr.bf16.mxu1 %v597_v21 }
 0x11f   :  { %v288_v20 = vadd.f32 %v498_v33, %v272_v19 }
 0x121   :  { %v294_v23 = vpack.c.bf16 %v288_v20, %v288_v20 }
 0x123   :  { %v301_v24 = vsel %vm299_vm2, %v294_v23, 0 }
 0x124   :  { %533 = vmatpush3.bf16.msra.mxu1 %v301_v24 }
 0x125   :  { %538 = vmatprep.subr.bf16.mxu1 %v597_v21 }
 0x127   :  { %535 = vmatmul.mubr.msk.bf16.vlgmr.msra.gmra.mrb[0].mxu1 %vm295_vm3, %v289_v25 }
 0x128   :  { %539 = vmatpush3.bf16.msra.mxu1 %v584_v22  ;;  %554 = vmatprep.mubr.msk.bf16.mxu1 %vm598_vm1, %v597_v21 }
 0x129   :  { %540 = vmatprep.subr.bf16.mxu1 %v597_v21 }
 0x12c   :  { %541 = vmatpush3.bf16.msra.mxu1 %v585_v26 }
 0x12d   :  { %542 = vmatprep.subr.bf16.mxu1 %v597_v21 }
 0x130   :  { %543 = vmatpush3.bf16.msra.mxu1 %v586_v27 }
 0x131   :  { %544 = vmatprep.subr.bf16.mxu1 %v597_v21 }
 0x134   :  { %545 = vmatpush3.bf16.msra.mxu1 %v587_v28 }
 0x135   :  { %546 = vmatprep.subr.bf16.mxu1 %v597_v21 }
 0x138   :  { %547 = vmatpush3.bf16.msra.mxu1 %v588_v29 }
 0x139   :  { %548 = vmatprep.subr.bf16.mxu1 %v597_v21 }
 0x13c   :  { %549 = vmatpush3.bf16.msra.mxu1 %v589_v30 }
 0x13d   :  { %550 = vmatprep.subr.bf16.mxu1 %v597_v21 }
 0x140   :  { %551 = vmatpush3.bf16.msra.mxu1 %v590_v31 }
 0x141   :  { %552 = vmatprep.subr.bf16.mxu1 %v597_v21 }
 0x144   :  { %553 = vmatpush3.bf16.msra.mxu1 %v591_v32 }
 0x1fa   :  { %v337_v33 = vpop.f32.mrb[0].mxu1 }
 0x1fb   :  { %v343_v34 = vmul.f32 0.11111111, %v337_v33  ;;  %v536_v35 = vpop.f32.mrb[1].mxu1 }
 0x1fc   :  { %v340_v36 = vpop.f32.mrb[2].mxu1 }
 0x1fd   :  { %v344_v37 = vpack.c.bf16 %v343_v34, %v343_v34  ;;  %v537_v38 = vpop.f32.mrb[3].mxu1 }
 0x1ff   :  { %555 = vmatmul.mubr.bf16.vlgmr.msra.gmra.mrb[4].mxu1 %v344_v37 }
 0x2d2   :  { %v450_v40 = vpop.f32.mrb[4].mxu1 }
 0x2d3   :  { %v451_v41 = vadd.f32 %v500_v39, %v450_v40  ;;  %v556_v42 = vpop.f32.mrb[5].mxu1 }
 0x2d4   :  { %v453_v21 = vpop.f32.mrb[6].mxu1 }
 0x2d5   :  { %456 = vmax.xlane.f32.xlu0 %v451_v41  ;;  %v557_v43 = vpop.f32.mrb[7].mxu1 }
 0x362   :  { %v457_v44 = vpop.xlane.xlu0 %456 }
 0x363   :  { %v458_v45 = vsub.f32 %v451_v41, %v457_v44 }
 0x365   :  { %v459_v46 = vmul.f32 1.442695, %v458_v45 }
 0x367   :  { %592 = vpow2.f32 %v459_v46 }
 0x371   :  { %v593_v47 = vpop.eup %592 }
 0x372   :  { %461 = vadd.xlane.f32.xlu0 %v593_v47 }
 0x3ff   :  { %v462_v48 = vpop.xlane.xlu0 %461 }
 0x400   :  { %594 = vlog2.f32 %v462_v48 }
 0x40a   :  { %v595_v49 = vpop.eup %594 }
 0x40b   :  { %v464_v50 = vmul.f32 0.6931472, %v595_v49 }
 0x40d   :  { %v465_v51 = vadd.f32 %v464_v50, %v457_v44 }
 0x40f   :  { %v466_v52 = vsub.f32 %v451_v41, %v465_v51 }
 0x411   :  { %467 = vst [vmem:[%s792_s8] sm:$0xff] %v466_v52 }

</bundles_post_ra>
